<compile_context>
chip_gen: v7x
topology: tpu7x:2x2x1
jax: 0.10.0
libtpu: 0.0.40
codegen_flags: <defaults>
</compile_context>

<pallas_src>
import functools
import math

import jax
import jax.numpy as jnp
from jax.experimental import pallas as pl
from jax.experimental.pallas import tpu as pltpu


# ---------------------------------------------------------------------------
# In-kernel helpers (batch tile folded into the row dimension; f32 VPU math,
# mxu_dtype operands on the MXU with f32 accumulation).
# ---------------------------------------------------------------------------

def _layernorm(x, ln, eps=1e-5):
    # x: (N, D) f32; ln: (2, D) f32 = [gamma; beta]
    g = ln[0:1, :]
    b = ln[1:2, :]
    mu = jnp.mean(x, axis=-1, keepdims=True)
    xc = x - mu
    var = jnp.mean(xc * xc, axis=-1, keepdims=True)
    return xc * jax.lax.rsqrt(var + eps) * g + b


def _ffn(x, w1_ref, b1_ref, w2_ref, b2_ref, *, mxu_dtype, dff_chunk):
    # x: (N, D) f32.  w1: (D, Dff), w2: (Dff, D) in mxu_dtype; biases f32.
    dff = w1_ref.shape[1]
    xm = x.astype(mxu_dtype)
    acc = None
    for j in range(0, dff, dff_chunk):      # Dff-chunked: bounded intermediate
        c = min(dff_chunk, dff - j)
        h = jnp.dot(xm, w1_ref[:, j:j + c],
                    preferred_element_type=jnp.float32) + b1_ref[:, j:j + c]
        h = jnp.maximum(h, 0.0)
        part = jnp.dot(h.astype(mxu_dtype), w2_ref[j:j + c, :],
                       preferred_element_type=jnp.float32)
        acc = part if acc is None else acc + part
    return acc + b2_ref[...]


def _mh_attention(xq, xkv, wq_ref, wkv_ref, *, Bt, Tq, Tk, H, hd,
                  masked, softmax, mxu_dtype, approx_recip):
    """Per-head channel-slice attention (matches the PyTorch modules).

    xq:  (Bt*Tq, D) f32 query source.
    xkv: (Bt*Tk, D) f32 key/value source.
    wq_ref:  (D, D)  block-diagonal W_q^T (1/sqrt(hd) folded in), mxu_dtype.
    wkv_ref: (D, 2D) block-diagonal [W_k^T | W_v^T], mxu_dtype.
    Returns (Bt*Tq, D) f32.
    """
    D = H * hd
    q = jnp.dot(xq.astype(mxu_dtype), wq_ref[...],
                preferred_element_type=jnp.float32)          # (Bt*Tq, D)
    kv = jnp.dot(xkv.astype(mxu_dtype), wkv_ref[...],
                 preferred_element_type=jnp.float32)         # (Bt*Tk, 2D)

    if masked:
        row = jax.lax.broadcasted_iota(jnp.int32, (1, Tq, Tk), 1)
        col = jax.lax.broadcasted_iota(jnp.int32, (1, Tq, Tk), 2)
        keep = col <= row                                     # causal

    head_outs = []
    for h in range(H):                       # small unroll over H only (H=4)
        cs = slice(h * hd, (h + 1) * hd)
        qh = q[:, cs].reshape(Bt, Tq, hd)
        kh = kv[:, cs].reshape(Bt, Tk, hd)
        vh = kv[:, D + h * hd: D + (h + 1) * hd].reshape(Bt, Tk, hd)

        s = jnp.einsum('bqd,bkd->bqk',
                       qh.astype(mxu_dtype), kh.astype(mxu_dtype),
                       preferred_element_type=jnp.float32)    # (Bt, Tq, Tk)
        if masked:
            s = jnp.where(keep, s, -1e30)
        if softmax:
            m = jnp.max(s, axis=-1, keepdims=True)
            e = jnp.exp(s - m)
            denom = jnp.sum(e, axis=-1, keepdims=True)
            if approx_recip:
                s = e * pl.reciprocal(denom, approx=True)     # EUP slot
            else:
                s = e / denom
        o = jnp.einsum('bqk,bkd->bqd',
                       s.astype(mxu_dtype), vh.astype(mxu_dtype),
                       preferred_element_type=jnp.float32)    # (Bt, Tq, hd)
        head_outs.append(o.reshape(Bt * Tq, hd))
    return jnp.concatenate(head_outs, axis=-1)                # (Bt*Tq, D)


# ---------------------------------------------------------------------------
# The fused TransformerBlock kernel (one batch tile per grid step).
# ---------------------------------------------------------------------------

def _transformer_block_kernel(
        ctx_ref, x_ref,
        sa_wq_ref, sa_wkv_ref, ln1_ref,
        enc_wq_ref, enc_wkv_ref, enc_ln1_ref,
        enc_ff1_w_ref, enc_ff1_b_ref, enc_ff2_w_ref, enc_ff2_b_ref, enc_ln2_ref,
        ca_wq_ref, ca_wkv_ref, ln2_ref,
        ff1_w_ref, ff1_b_ref, ff2_w_ref, ff2_b_ref, ln3_ref,
        ctx_out_ref, x_out_ref,
        *, Bt, Tq, Tk, H, hd, mxu_dtype, approx_recip, dff_chunk):
    D = H * hd
    x = x_ref[...].reshape(Bt * Tq, D)       # (Bt*Tq, D) f32
    ctx = ctx_ref[...].reshape(Bt * Tk, D)   # (Bt*Tk, D) f32

    # 1) masked multi-head self-attention + residual + LayerNorm1
    sa = _mh_attention(x, x, sa_wq_ref, sa_wkv_ref, Bt=Bt, Tq=Tq, Tk=Tq,
                       H=H, hd=hd, masked=True, softmax=True,
                       mxu_dtype=mxu_dtype, approx_recip=approx_recip)
    x = _layernorm(x + sa, ln1_ref[...])

    # 2) EncoderBlock on context (unmasked softmax MHA + LN, FFN + LN)
    ea = _mh_attention(ctx, ctx, enc_wq_ref, enc_wkv_ref, Bt=Bt, Tq=Tk, Tk=Tk,
                       H=H, hd=hd, masked=False, softmax=True,
                       mxu_dtype=mxu_dtype, approx_recip=approx_recip)
    ctx = _layernorm(ctx + ea, enc_ln1_ref[...])
    ef = _ffn(ctx, enc_ff1_w_ref, enc_ff1_b_ref, enc_ff2_w_ref, enc_ff2_b_ref,
              mxu_dtype=mxu_dtype, dff_chunk=dff_chunk)
    ctx = _layernorm(ctx + ef, enc_ln2_ref[...])

    # 3) multi-head cross attention (NO softmax, per the reference) + LN2
    ca = _mh_attention(x, ctx, ca_wq_ref, ca_wkv_ref, Bt=Bt, Tq=Tq, Tk=Tk,
                       H=H, hd=hd, masked=False, softmax=False,
                       mxu_dtype=mxu_dtype, approx_recip=approx_recip)
    x = _layernorm(x + ca, ln2_ref[...])

    # 4) decoder feed-forward + LN3
    ff = _ffn(x, ff1_w_ref, ff1_b_ref, ff2_w_ref, ff2_b_ref,
              mxu_dtype=mxu_dtype, dff_chunk=dff_chunk)
    x = _layernorm(x + ff, ln3_ref[...])

    ctx_out_ref[...] = ctx.reshape(Bt, Tk, D).astype(ctx_out_ref.dtype)
    x_out_ref[...] = x.reshape(Bt, Tq, D).astype(x_out_ref.dtype)


# ---------------------------------------------------------------------------
# Wrapper.
# ---------------------------------------------------------------------------

def transformer_block(context, X, kp, *, block_b=1, dff_chunk=512):
    """context: (B, Tk, D), X: (B, Tq, D); kp: packed kernel params."""
    B, Tk, D = context.shape
    _, Tq, _ = X.shape
    H = kp['H']
    hd = D // H
    Dff = kp['ff1_w'].shape[1]
    mxu_dtype = kp['sa_wq'].dtype
    approx_recip = (mxu_dtype == jnp.bfloat16)

    Bt = min(block_b, B)
    assert B % Bt == 0, "batch must divide the batch tile"
    grid = (B // Bt,)

    weights = (
        kp['sa_wq'], kp['sa_wkv'], kp['ln1'],
        kp['enc_wq'], kp['enc_wkv'], kp['enc_ln1'],
        kp['enc_ff1_w'], kp['enc_ff1_b'], kp['enc_ff2_w'], kp['enc_ff2_b'],
        kp['enc_ln2'],
        kp['ca_wq'], kp['ca_wkv'], kp['ln2'],
        kp['ff1_w'], kp['ff1_b'], kp['ff2_w'], kp['ff2_b'], kp['ln3'],
    )

    def act_spec(t):
        return pl.BlockSpec((Bt, t, D), lambda i: (i, 0, 0))

    def weight_spec(a):
        nd = a.ndim
        return pl.BlockSpec(a.shape, lambda i, nd=nd: (0,) * nd)  # resident

    in_specs = [act_spec(Tk), act_spec(Tq)] + [weight_spec(a) for a in weights]
    out_specs = (act_spec(Tk), act_spec(Tq))
    out_shape = (jax.ShapeDtypeStruct((B, Tk, D), context.dtype),
                 jax.ShapeDtypeStruct((B, Tq, D), X.dtype))

    # Explicit VMEM budget: resident weights + double-buffered activation
    # tiles + generous headroom for in-kernel intermediates.
    def nbytes(a):
        return int(math.prod(a.shape)) * a.dtype.itemsize

    weight_bytes = sum(nbytes(a) for a in weights)
    act_bytes = 2 * 2 * Bt * (Tq + Tk) * D * 4          # in+out, double buffer
    inter_bytes = 6 * 4 * Bt * ((Tq + Tk) * (3 * D + min(Dff, dff_chunk))
                                + Tq * Tq + Tk * Tk + Tq * Tk)
    vmem_limit = max(32 * 2 ** 20,
                     min(100 * 2 ** 20,
                         int(1.5 * (weight_bytes + act_bytes + inter_bytes))))

    def mm(m, k, n):
        return 2 * m * k * n

    Nq, Nk = B * Tq, B * Tk
    flops = (
        mm(Nq, D, D) + mm(Nq, D, 2 * D)
        + B * H * (mm(Tq, hd, Tq) + mm(Tq, Tq, hd))          # masked SA
        + mm(Nk, D, D) + mm(Nk, D, 2 * D)
        + B * H * (mm(Tk, hd, Tk) + mm(Tk, Tk, hd))          # encoder SA
        + mm(Nq, D, D) + mm(Nk, D, 2 * D)
        + B * H * (mm(Tq, hd, Tk) + mm(Tq, Tk, hd))          # cross attention
        + mm(Nq, D, Dff) + mm(Nq, Dff, D)                    # decoder FFN
        + mm(Nk, D, Dff) + mm(Nk, Dff, D)                    # encoder FFN
    )
    transcendentals = B * H * (Tq * Tq + Tk * Tk + Tq + Tk) + 3 * Nq + 2 * Nk
    bytes_accessed = weight_bytes + 2 * (Nq + Nk) * D * context.dtype.itemsize

    kernel = functools.partial(
        _transformer_block_kernel, Bt=Bt, Tq=Tq, Tk=Tk, H=H, hd=hd,
        mxu_dtype=mxu_dtype, approx_recip=approx_recip, dff_chunk=dff_chunk)

    ctx_out, x_out = pl.pallas_call(
        kernel,
        out_shape=out_shape,
        grid_spec=pltpu.PrefetchScalarGridSpec(
            num_scalar_prefetch=0,
            grid=grid,
            in_specs=in_specs,
            out_specs=out_specs,
        ),
        compiler_params=pltpu.CompilerParams(
            dimension_semantics=("parallel",),
            vmem_limit_bytes=vmem_limit),
        cost_estimate=pl.CostEstimate(
            flops=int(flops),
            transcendentals=int(transcendentals),
            bytes_accessed=int(bytes_accessed)),
    )(context, X, *weights)

    return ctx_out, x_out


# ---------------------------------------------------------------------------
# Parameter init (PyTorch layout) and packing into the kernel layout.
# ---------------------------------------------------------------------------

def init_params(key, D, H):
    hd = D // H
    Dff = 4 * D
    ks = iter(jax.random.split(key, 40))

    def w(shape, scale=0.1):
        return jax.random.normal(next(ks), shape, dtype=jnp.float32) * scale

    return dict(
        H=H, hd=hd,
        # decoder masked self-attention: per-head PyTorch (out, in) weights
        sa_q=w((H, hd, hd)), sa_k=w((H, hd, hd)), sa_v=w((H, hd, hd)),
        ln1_g=1.0 + w((D,)), ln1_b=w((D,)),
        # encoder block
        enc_q=w((H, hd, hd)), enc_k=w((H, hd, hd)), enc_v=w((H, hd, hd)),
        enc_ln1_g=1.0 + w((D,)), enc_ln1_b=w((D,)),
        enc_ff1_w=w((Dff, D)), enc_ff1_b=w((Dff,)),
        enc_ff2_w=w((D, Dff)), enc_ff2_b=w((D,)),
        enc_ln2_g=1.0 + w((D,)), enc_ln2_b=w((D,)),
        # cross attention
        ca_q=w((H, hd, hd)), ca_k=w((H, hd, hd)), ca_v=w((H, hd, hd)),
        ln2_g=1.0 + w((D,)), ln2_b=w((D,)),
        # decoder feed-forward
        ff1_w=w((Dff, D)), ff1_b=w((Dff,)),
        ff2_w=w((D, Dff)), ff2_b=w((D,)),
        ln3_g=1.0 + w((D,)), ln3_b=w((D,)),
    )


def pack_params(p, mxu_dtype=jnp.bfloat16):
    """Pack PyTorch-layout params into kernel layout.

    MXU weights (q/kv projections, FFN) are stored in `mxu_dtype` (bf16 on the
    perf path); LN params and biases stay f32 (added to f32 accumulators).
    """
    H, hd = p['H'], p['hd']
    D = H * hd
    scale = float(hd) ** (-0.5)

    def block_diag_t(w_heads):
        # (H, hd, hd) PyTorch (out, in) -> (D, D) block-diagonal of per-head W^T
        eye = jnp.eye(H, dtype=w_heads.dtype)
        wt = jnp.transpose(w_heads, (0, 2, 1))
        return jnp.einsum('hg,hij->higj', eye, wt).reshape(D, D)

    def wq(q):                     # fold the attention scale into Wq
        return (block_diag_t(q) * scale).astype(mxu_dtype)

    def wkv(k, v):                 # packed [Wk^T | Wv^T] -> one projection
        return jnp.concatenate([block_diag_t(k), block_diag_t(v)],
                               axis=1).astype(mxu_dtype)

    def ln(g, b):
        return jnp.stack([g, b])

    return dict(
        H=H,
        sa_wq=wq(p['sa_q']), sa_wkv=wkv(p['sa_k'], p['sa_v']),
        ln1=ln(p['ln1_g'], p['ln1_b']),
        enc_wq=wq(p['enc_q']), enc_wkv=wkv(p['enc_k'], p['enc_v']),
        enc_ln1=ln(p['enc_ln1_g'], p['enc_ln1_b']),
        enc_ff1_w=p['enc_ff1_w'].T.astype(mxu_dtype),
        enc_ff1_b=p['enc_ff1_b'].reshape(1, -1),
        enc_ff2_w=p['enc_ff2_w'].T.astype(mxu_dtype),
        enc_ff2_b=p['enc_ff2_b'].reshape(1, -1),
        enc_ln2=ln(p['enc_ln2_g'], p['enc_ln2_b']),
        ca_wq=wq(p['ca_q']), ca_wkv=wkv(p['ca_k'], p['ca_v']),
        ln2=ln(p['ln2_g'], p['ln2_b']),
        ff1_w=p['ff1_w'].T.astype(mxu_dtype), ff1_b=p['ff1_b'].reshape(1, -1),
        ff2_w=p['ff2_w'].T.astype(mxu_dtype), ff2_b=p['ff2_b'].reshape(1, -1),
        ln3=ln(p['ln3_g'], p['ln3_b']),
    )


# ---------------------------------------------------------------------------
# Pure-JAX reference mirroring the PyTorch forward (dropout = identity).
# ---------------------------------------------------------------------------

def transformer_block_ref(context, X, p):
    H, hd = p['H'], p['hd']
    PH = jax.lax.Precision.HIGHEST

    def linear(x, w):                       # PyTorch Linear (no bias): x @ W^T
        return jnp.einsum('btd,ed->bte', x, w, precision=PH)

    def mha(x, wq, wk, wv, masked):
        B, T, _ = x.shape
        outs = []
        for h in range(H):
            xh = x[:, :, h * hd:(h + 1) * hd]
            q, k, v = linear(xh, wq[h]), linear(xh, wk[h]), linear(xh, wv[h])
            w = jnp.einsum('btd,bsd->bts', q, k, precision=PH) * hd ** (-0.5)
            if masked:
                tril = jnp.tril(jnp.ones((T, T), dtype=w.dtype))
                w = jnp.where(tril == 0, -jnp.inf, w)
            w = jax.nn.softmax(w, axis=-1)
            outs.append(jnp.einsum('bts,bsd->btd', w, v, precision=PH))
        return jnp.concatenate(outs, axis=-1)

    def cross(ctx, x, wq, wk, wv):
        outs = []
        for h in range(H):
            xh = x[:, :, h * hd:(h + 1) * hd]
            ch = ctx[:, :, h * hd:(h + 1) * hd]
            q, k, v = linear(xh, wq[h]), linear(ch, wk[h]), linear(ch, wv[h])
            w = jnp.einsum('btd,bsd->bts', q, k, precision=PH) * hd ** (-0.5)
            outs.append(jnp.einsum('bts,bsd->btd', w, v, precision=PH))
        return jnp.concatenate(outs, axis=-1)

    def layernorm(x, g, b, eps=1e-5):
        mu = x.mean(-1, keepdims=True)
        var = ((x - mu) ** 2).mean(-1, keepdims=True)
        return (x - mu) / jnp.sqrt(var + eps) * g + b

    def ffn(x, w1, b1, w2, b2):
        h = jnp.maximum(jnp.einsum('btd,fd->btf', x, w1, precision=PH) + b1, 0.0)
        return jnp.einsum('btf,df->btd', h, w2, precision=PH) + b2

    x = layernorm(X + mha(X, p['sa_q'], p['sa_k'], p['sa_v'], True),
                  p['ln1_g'], p['ln1_b'])

    c = layernorm(context + mha(context, p['enc_q'], p['enc_k'], p['enc_v'], False),
                  p['enc_ln1_g'], p['enc_ln1_b'])
    c = layernorm(c + ffn(c, p['enc_ff1_w'], p['enc_ff1_b'],
                          p['enc_ff2_w'], p['enc_ff2_b']),
                  p['enc_ln2_g'], p['enc_ln2_b'])

    x = layernorm(x + cross(c, x, p['ca_q'], p['ca_k'], p['ca_v']),
                  p['ln2_g'], p['ln2_b'])
    x = layernorm(x + ffn(x, p['ff1_w'], p['ff1_b'], p['ff2_w'], p['ff2_b']),
                  p['ln3_g'], p['ln3_b'])
    return c, x


if __name__ == "__main__":
    D = 128         # "heads" in the PyTorch module (model width); lane-dense
    H = 4           # no_of_heads
    B, Tq, Tk = 2, 8, 16

    key = jax.random.PRNGKey(0)
    k_ctx, k_x, k_p = jax.random.split(key, 3)
    context = jax.random.normal(k_ctx, (B, Tk, D), dtype=jnp.float32)
    X = jax.random.normal(k_x, (B, Tq, D), dtype=jnp.float32)

    params = init_params(k_p, D, H)
    ctx_ref, x_ref_out = transformer_block_ref(context, X, params)

    # 1) exact-math verification path: f32 MXU operands
    kp_f32 = pack_params(params, mxu_dtype=jnp.float32)
    ctx32, x32 = transformer_block(context, X, kp_f32)
    ctx32, x32 = jax.block_until_ready((ctx32, x32))
    assert ctx32.shape == (B, Tk, D) and x32.shape == (B, Tq, D)
    assert jnp.allclose(ctx32, ctx_ref, atol=2e-3, rtol=2e-3), "f32 context mismatch"
    assert jnp.allclose(x32, x_ref_out, atol=2e-3, rtol=2e-3), "f32 output mismatch"

    # 2) performance path: bf16 MXU operands, f32 accumulation
    kp_bf16 = pack_params(params, mxu_dtype=jnp.bfloat16)
    ctxbf, xbf = transformer_block(context, X, kp_bf16)
    ctxbf, xbf = jax.block_until_ready((ctxbf, xbf))

    def rel_err(a, b):
        a = a.astype(jnp.float32)
        b = b.astype(jnp.float32)
        return float(jnp.sqrt(jnp.sum((a - b) ** 2))
                     / (jnp.sqrt(jnp.sum(b ** 2)) + 1e-12))

    assert rel_err(ctxbf, ctx_ref) < 0.1, "bf16 context drifted too far"
    assert rel_err(xbf, x_ref_out) < 0.1, "bf16 output drifted too far"

    print("KERNEL_OK")
</pallas_src>

<mosaic_0001>
module attributes {stable_mosaic.version = 11 : i64} {
  func.func @_transformer_block_kernel(%arg0: i32, %arg1: memref<1x16x128xf32, #tpu.memory_space<vmem>>, %arg2: memref<1x8x128xf32, #tpu.memory_space<vmem>>, %arg3: memref<128x128xf32, #tpu.memory_space<vmem>>, %arg4: memref<128x256xf32, #tpu.memory_space<vmem>>, %arg5: memref<2x128xf32, #tpu.memory_space<vmem>>, %arg6: memref<128x128xf32, #tpu.memory_space<vmem>>, %arg7: memref<128x256xf32, #tpu.memory_space<vmem>>, %arg8: memref<2x128xf32, #tpu.memory_space<vmem>>, %arg9: memref<128x512xf32, #tpu.memory_space<vmem>>, %arg10: memref<1x512xf32, #tpu.memory_space<vmem>>, %arg11: memref<512x128xf32, #tpu.memory_space<vmem>>, %arg12: memref<1x128xf32, #tpu.memory_space<vmem>>, %arg13: memref<2x128xf32, #tpu.memory_space<vmem>>, %arg14: memref<128x128xf32, #tpu.memory_space<vmem>>, %arg15: memref<128x256xf32, #tpu.memory_space<vmem>>, %arg16: memref<2x128xf32, #tpu.memory_space<vmem>>, %arg17: memref<128x512xf32, #tpu.memory_space<vmem>>, %arg18: memref<1x512xf32, #tpu.memory_space<vmem>>, %arg19: memref<512x128xf32, #tpu.memory_space<vmem>>, %arg20: memref<1x128xf32, #tpu.memory_space<vmem>>, %arg21: memref<2x128xf32, #tpu.memory_space<vmem>>, %arg22: memref<1x16x128xf32, #tpu.memory_space<vmem>>, %arg23: memref<1x8x128xf32, #tpu.memory_space<vmem>>) attributes {dimension_semantics = [#tpu.dimension_semantics<parallel>], iteration_bounds = array<i64: 2>, scalar_prefetch = 0 : i64, scratch_operands = 0 : i64, tpu.core_type = #tpu.core_type<tc>, window_params = [{transform_indices = @transform_0, window_bounds = array<i64: 1, 16, 128>}, {transform_indices = @transform_1, window_bounds = array<i64: 1, 8, 128>}, {pipeline_mode = #tpu.pipeline_mode<synchronous>, transform_indices = @transform_2, window_bounds = array<i64: 128, 128>}, {pipeline_mode = #tpu.pipeline_mode<synchronous>, transform_indices = @transform_3, window_bounds = array<i64: 128, 256>}, {pipeline_mode = #tpu.pipeline_mode<synchronous>, transform_indices = @transform_4, window_bounds = array<i64: 2, 128>}, {pipeline_mode = #tpu.pipeline_mode<synchronous>, transform_indices = @transform_5, window_bounds = array<i64: 128, 128>}, {pipeline_mode = #tpu.pipeline_mode<synchronous>, transform_indices = @transform_6, window_bounds = array<i64: 128, 256>}, {pipeline_mode = #tpu.pipeline_mode<synchronous>, transform_indices = @transform_7, window_bounds = array<i64: 2, 128>}, {pipeline_mode = #tpu.pipeline_mode<synchronous>, transform_indices = @transform_8, window_bounds = array<i64: 128, 512>}, {pipeline_mode = #tpu.pipeline_mode<synchronous>, transform_indices = @transform_9, window_bounds = array<i64: 1, 512>}, {pipeline_mode = #tpu.pipeline_mode<synchronous>, transform_indices = @transform_10, window_bounds = array<i64: 512, 128>}, {pipeline_mode = #tpu.pipeline_mode<synchronous>, transform_indices = @transform_11, window_bounds = array<i64: 1, 128>}, {pipeline_mode = #tpu.pipeline_mode<synchronous>, transform_indices = @transform_12, window_bounds = array<i64: 2, 128>}, {pipeline_mode = #tpu.pipeline_mode<synchronous>, transform_indices = @transform_13, window_bounds = array<i64: 128, 128>}, {pipeline_mode = #tpu.pipeline_mode<synchronous>, transform_indices = @transform_14, window_bounds = array<i64: 128, 256>}, {pipeline_mode = #tpu.pipeline_mode<synchronous>, transform_indices = @transform_15, window_bounds = array<i64: 2, 128>}, {pipeline_mode = #tpu.pipeline_mode<synchronous>, transform_indices = @transform_16, window_bounds = array<i64: 128, 512>}, {pipeline_mode = #tpu.pipeline_mode<synchronous>, transform_indices = @transform_17, window_bounds = array<i64: 1, 512>}, {pipeline_mode = #tpu.pipeline_mode<synchronous>, transform_indices = @transform_18, window_bounds = array<i64: 512, 128>}, {pipeline_mode = #tpu.pipeline_mode<synchronous>, transform_indices = @transform_19, window_bounds = array<i64: 1, 128>}, {pipeline_mode = #tpu.pipeline_mode<synchronous>, transform_indices = @transform_20, window_bounds = array<i64: 2, 128>}, {transform_indices = @transform_21, window_bounds = array<i64: 1, 16, 128>}, {transform_indices = @transform_22, window_bounds = array<i64: 1, 8, 128>}]} {
    %c0 = arith.constant 0 : index
    %c0_0 = arith.constant 0 : index
    %c0_1 = arith.constant 0 : index
    %0 = vector.load %arg2[%c0, %c0_0, %c0_1] : memref<1x8x128xf32, #tpu.memory_space<vmem>>, vector<1x8x128xf32>
    %1 = vector.shape_cast %0 : vector<1x8x128xf32> to vector<8x128xf32>
    %c0_2 = arith.constant 0 : index
    %c0_3 = arith.constant 0 : index
    %c0_4 = arith.constant 0 : index
    %2 = vector.load %arg1[%c0_2, %c0_3, %c0_4] : memref<1x16x128xf32, #tpu.memory_space<vmem>>, vector<1x16x128xf32>
    %3 = vector.shape_cast %2 : vector<1x16x128xf32> to vector<16x128xf32>
    %c0_5 = arith.constant 0 : index
    %c0_6 = arith.constant 0 : index
    %4 = vector.load %arg3[%c0_5, %c0_6] : memref<128x128xf32, #tpu.memory_space<vmem>>, vector<128x128xf32>
    %cst = arith.constant dense<0.000000e+00> : vector<8x128xf32>
    %5 = tpu.matmul %1, %4, %cst {dimension_numbers = #tpu.dot_dimension_numbers<[1], [0], [0], [1], [0, 0, 1, 1], [], []>} : vector<8x128xf32>, vector<128x128xf32>, vector<8x128xf32> -> vector<8x128xf32>
    %c0_7 = arith.constant 0 : index
    %c0_8 = arith.constant 0 : index
    %6 = vector.load %arg4[%c0_7, %c0_8] : memref<128x256xf32, #tpu.memory_space<vmem>>, vector<128x256xf32>
    %cst_9 = arith.constant dense<0.000000e+00> : vector<8x256xf32>
    %7 = tpu.matmul %1, %6, %cst_9 {dimension_numbers = #tpu.dot_dimension_numbers<[1], [0], [0], [1], [0, 0, 1, 1], [], []>} : vector<8x128xf32>, vector<128x256xf32>, vector<8x256xf32> -> vector<8x256xf32>
    %8 = tpu.iota {dimensions = array<i32: 1>} : vector<1x8x8xi32>
    %9 = tpu.iota {dimensions = array<i32: 2>} : vector<1x8x8xi32>
    %10 = arith.cmpi sle, %9, %8 : vector<1x8x8xi32>
    %11 = vector.extract_strided_slice %5 {offsets = [0, 0], sizes = [8, 32], strides = [1, 1]} : vector<8x128xf32> to vector<8x32xf32>
    %12 = vector.shape_cast %11 : vector<8x32xf32> to vector<1x8x32xf32>
    %13 = vector.extract_strided_slice %7 {offsets = [0, 0], sizes = [8, 32], strides = [1, 1]} : vector<8x256xf32> to vector<8x32xf32>
    %14 = vector.shape_cast %13 : vector<8x32xf32> to vector<1x8x32xf32>
    %15 = vector.extract_strided_slice %7 {offsets = [0, 128], sizes = [8, 32], strides = [1, 1]} : vector<8x256xf32> to vector<8x32xf32>
    %16 = vector.shape_cast %15 : vector<8x32xf32> to vector<1x8x32xf32>
    "tpu.trace_start"() <{level = 10 : i32, message = "bqd,bkd->bqk"}> : () -> ()
    %cst_10 = arith.constant dense<0.000000e+00> : vector<1x8x8xf32>
    %17 = tpu.matmul %12, %14, %cst_10 {dimension_numbers = #tpu.dot_dimension_numbers<[2], [2], [1], [1], [0, 0, 0, 1, 1, 1], [0], [0]>} : vector<1x8x32xf32>, vector<1x8x32xf32>, vector<1x8x8xf32> -> vector<1x8x8xf32>
    %cst_11 = arith.constant -1.000000e+30 : f32
    "tpu.trace_stop"() : () -> ()
    %18 = vector.broadcast %cst_11 : f32 to vector<1x8x8xf32>
    %19 = arith.select %10, %17, %18 : vector<1x8x8xi1>, vector<1x8x8xf32>
    %cst_12 = arith.constant dense<0xFF800000> : vector<1x8xf32>
    %20 = vector.multi_reduction <maximumf>, %19, %cst_12 [2] : vector<1x8x8xf32> to vector<1x8xf32>
    %21 = vector.shape_cast %20 : vector<1x8xf32> to vector<1x8x1xf32>
    %22 = vector.broadcast %21 : vector<1x8x1xf32> to vector<1x8x8xf32>
    %23 = arith.subf %19, %22 : vector<1x8x8xf32>
    %24 = math.exp %23 : vector<1x8x8xf32>
    %cst_13 = arith.constant dense<0.000000e+00> : vector<1x8xf32>
    %25 = vector.multi_reduction <add>, %24, %cst_13 [2] : vector<1x8x8xf32> to vector<1x8xf32>
    %26 = vector.shape_cast %25 : vector<1x8xf32> to vector<1x8x1xf32>
    %27 = vector.broadcast %26 : vector<1x8x1xf32> to vector<1x8x8xf32>
    %28 = arith.divf %24, %27 : vector<1x8x8xf32>
    "tpu.trace_start"() <{level = 10 : i32, message = "bqk,bkd->bqd"}> : () -> ()
    %cst_14 = arith.constant dense<0.000000e+00> : vector<1x8x32xf32>
    %29 = tpu.matmul %28, %16, %cst_14 {dimension_numbers = #tpu.dot_dimension_numbers<[2], [1], [1], [2], [0, 0, 0, 1, 1, 2], [0], [0]>} : vector<1x8x8xf32>, vector<1x8x32xf32>, vector<1x8x32xf32> -> vector<1x8x32xf32>
    "tpu.trace_stop"() : () -> ()
    %30 = vector.shape_cast %29 : vector<1x8x32xf32> to vector<8x32xf32>
    %31 = vector.extract_strided_slice %5 {offsets = [0, 32], sizes = [8, 32], strides = [1, 1]} : vector<8x128xf32> to vector<8x32xf32>
    %32 = vector.shape_cast %31 : vector<8x32xf32> to vector<1x8x32xf32>
    %33 = vector.extract_strided_slice %7 {offsets = [0, 32], sizes = [8, 32], strides = [1, 1]} : vector<8x256xf32> to vector<8x32xf32>
    %34 = vector.shape_cast %33 : vector<8x32xf32> to vector<1x8x32xf32>
    %35 = vector.extract_strided_slice %7 {offsets = [0, 160], sizes = [8, 32], strides = [1, 1]} : vector<8x256xf32> to vector<8x32xf32>
    %36 = vector.shape_cast %35 : vector<8x32xf32> to vector<1x8x32xf32>
    "tpu.trace_start"() <{level = 10 : i32, message = "bqd,bkd->bqk"}> : () -> ()
    %cst_15 = arith.constant dense<0.000000e+00> : vector<1x8x8xf32>
    %37 = tpu.matmul %32, %34, %cst_15 {dimension_numbers = #tpu.dot_dimension_numbers<[2], [2], [1], [1], [0, 0, 0, 1, 1, 1], [0], [0]>} : vector<1x8x32xf32>, vector<1x8x32xf32>, vector<1x8x8xf32> -> vector<1x8x8xf32>
    %cst_16 = arith.constant -1.000000e+30 : f32
    "tpu.trace_stop"() : () -> ()
    %38 = vector.broadcast %cst_16 : f32 to vector<1x8x8xf32>
    %39 = arith.select %10, %37, %38 : vector<1x8x8xi1>, vector<1x8x8xf32>
    %cst_17 = arith.constant dense<0xFF800000> : vector<1x8xf32>
    %40 = vector.multi_reduction <maximumf>, %39, %cst_17 [2] : vector<1x8x8xf32> to vector<1x8xf32>
    %41 = vector.shape_cast %40 : vector<1x8xf32> to vector<1x8x1xf32>
    %42 = vector.broadcast %41 : vector<1x8x1xf32> to vector<1x8x8xf32>
    %43 = arith.subf %39, %42 : vector<1x8x8xf32>
    %44 = math.exp %43 : vector<1x8x8xf32>
    %cst_18 = arith.constant dense<0.000000e+00> : vector<1x8xf32>
    %45 = vector.multi_reduction <add>, %44, %cst_18 [2] : vector<1x8x8xf32> to vector<1x8xf32>
    %46 = vector.shape_cast %45 : vector<1x8xf32> to vector<1x8x1xf32>
    %47 = vector.broadcast %46 : vector<1x8x1xf32> to vector<1x8x8xf32>
    %48 = arith.divf %44, %47 : vector<1x8x8xf32>
    "tpu.trace_start"() <{level = 10 : i32, message = "bqk,bkd->bqd"}> : () -> ()
    %cst_19 = arith.constant dense<0.000000e+00> : vector<1x8x32xf32>
    %49 = tpu.matmul %48, %36, %cst_19 {dimension_numbers = #tpu.dot_dimension_numbers<[2], [1], [1], [2], [0, 0, 0, 1, 1, 2], [0], [0]>} : vector<1x8x8xf32>, vector<1x8x32xf32>, vector<1x8x32xf32> -> vector<1x8x32xf32>
    "tpu.trace_stop"() : () -> ()
    %50 = vector.shape_cast %49 : vector<1x8x32xf32> to vector<8x32xf32>
    %51 = vector.extract_strided_slice %5 {offsets = [0, 64], sizes = [8, 32], strides = [1, 1]} : vector<8x128xf32> to vector<8x32xf32>
    %52 = vector.shape_cast %51 : vector<8x32xf32> to vector<1x8x32xf32>
    %53 = vector.extract_strided_slice %7 {offsets = [0, 64], sizes = [8, 32], strides = [1, 1]} : vector<8x256xf32> to vector<8x32xf32>
    %54 = vector.shape_cast %53 : vector<8x32xf32> to vector<1x8x32xf32>
    %55 = vector.extract_strided_slice %7 {offsets = [0, 192], sizes = [8, 32], strides = [1, 1]} : vector<8x256xf32> to vector<8x32xf32>
    %56 = vector.shape_cast %55 : vector<8x32xf32> to vector<1x8x32xf32>
    "tpu.trace_start"() <{level = 10 : i32, message = "bqd,bkd->bqk"}> : () -> ()
    %cst_20 = arith.constant dense<0.000000e+00> : vector<1x8x8xf32>
    %57 = tpu.matmul %52, %54, %cst_20 {dimension_numbers = #tpu.dot_dimension_numbers<[2], [2], [1], [1], [0, 0, 0, 1, 1, 1], [0], [0]>} : vector<1x8x32xf32>, vector<1x8x32xf32>, vector<1x8x8xf32> -> vector<1x8x8xf32>
    %cst_21 = arith.constant -1.000000e+30 : f32
    "tpu.trace_stop"() : () -> ()
    %58 = vector.broadcast %cst_21 : f32 to vector<1x8x8xf32>
    %59 = arith.select %10, %57, %58 : vector<1x8x8xi1>, vector<1x8x8xf32>
    %cst_22 = arith.constant dense<0xFF800000> : vector<1x8xf32>
    %60 = vector.multi_reduction <maximumf>, %59, %cst_22 [2] : vector<1x8x8xf32> to vector<1x8xf32>
    %61 = vector.shape_cast %60 : vector<1x8xf32> to vector<1x8x1xf32>
    %62 = vector.broadcast %61 : vector<1x8x1xf32> to vector<1x8x8xf32>
    %63 = arith.subf %59, %62 : vector<1x8x8xf32>
    %64 = math.exp %63 : vector<1x8x8xf32>
    %cst_23 = arith.constant dense<0.000000e+00> : vector<1x8xf32>
    %65 = vector.multi_reduction <add>, %64, %cst_23 [2] : vector<1x8x8xf32> to vector<1x8xf32>
    %66 = vector.shape_cast %65 : vector<1x8xf32> to vector<1x8x1xf32>
    %67 = vector.broadcast %66 : vector<1x8x1xf32> to vector<1x8x8xf32>
    %68 = arith.divf %64, %67 : vector<1x8x8xf32>
    "tpu.trace_start"() <{level = 10 : i32, message = "bqk,bkd->bqd"}> : () -> ()
    %cst_24 = arith.constant dense<0.000000e+00> : vector<1x8x32xf32>
    %69 = tpu.matmul %68, %56, %cst_24 {dimension_numbers = #tpu.dot_dimension_numbers<[2], [1], [1], [2], [0, 0, 0, 1, 1, 2], [0], [0]>} : vector<1x8x8xf32>, vector<1x8x32xf32>, vector<1x8x32xf32> -> vector<1x8x32xf32>
    "tpu.trace_stop"() : () -> ()
    %70 = vector.shape_cast %69 : vector<1x8x32xf32> to vector<8x32xf32>
    %71 = vector.extract_strided_slice %5 {offsets = [0, 96], sizes = [8, 32], strides = [1, 1]} : vector<8x128xf32> to vector<8x32xf32>
    %72 = vector.shape_cast %71 : vector<8x32xf32> to vector<1x8x32xf32>
    %73 = vector.extract_strided_slice %7 {offsets = [0, 96], sizes = [8, 32], strides = [1, 1]} : vector<8x256xf32> to vector<8x32xf32>
    %74 = vector.shape_cast %73 : vector<8x32xf32> to vector<1x8x32xf32>
    %75 = vector.extract_strided_slice %7 {offsets = [0, 224], sizes = [8, 32], strides = [1, 1]} : vector<8x256xf32> to vector<8x32xf32>
    %76 = vector.shape_cast %75 : vector<8x32xf32> to vector<1x8x32xf32>
    "tpu.trace_start"() <{level = 10 : i32, message = "bqd,bkd->bqk"}> : () -> ()
    %cst_25 = arith.constant dense<0.000000e+00> : vector<1x8x8xf32>
    %77 = tpu.matmul %72, %74, %cst_25 {dimension_numbers = #tpu.dot_dimension_numbers<[2], [2], [1], [1], [0, 0, 0, 1, 1, 1], [0], [0]>} : vector<1x8x32xf32>, vector<1x8x32xf32>, vector<1x8x8xf32> -> vector<1x8x8xf32>
    %cst_26 = arith.constant -1.000000e+30 : f32
    "tpu.trace_stop"() : () -> ()
    %78 = vector.broadcast %cst_26 : f32 to vector<1x8x8xf32>
    %79 = arith.select %10, %77, %78 : vector<1x8x8xi1>, vector<1x8x8xf32>
    %cst_27 = arith.constant dense<0xFF800000> : vector<1x8xf32>
    %80 = vector.multi_reduction <maximumf>, %79, %cst_27 [2] : vector<1x8x8xf32> to vector<1x8xf32>
    %81 = vector.shape_cast %80 : vector<1x8xf32> to vector<1x8x1xf32>
    %82 = vector.broadcast %81 : vector<1x8x1xf32> to vector<1x8x8xf32>
    %83 = arith.subf %79, %82 : vector<1x8x8xf32>
    %84 = math.exp %83 : vector<1x8x8xf32>
    %cst_28 = arith.constant dense<0.000000e+00> : vector<1x8xf32>
    %85 = vector.multi_reduction <add>, %84, %cst_28 [2] : vector<1x8x8xf32> to vector<1x8xf32>
    %86 = vector.shape_cast %85 : vector<1x8xf32> to vector<1x8x1xf32>
    %87 = vector.broadcast %86 : vector<1x8x1xf32> to vector<1x8x8xf32>
    %88 = arith.divf %84, %87 : vector<1x8x8xf32>
    "tpu.trace_start"() <{level = 10 : i32, message = "bqk,bkd->bqd"}> : () -> ()
    %cst_29 = arith.constant dense<0.000000e+00> : vector<1x8x32xf32>
    %89 = tpu.matmul %88, %76, %cst_29 {dimension_numbers = #tpu.dot_dimension_numbers<[2], [1], [1], [2], [0, 0, 0, 1, 1, 2], [0], [0]>} : vector<1x8x8xf32>, vector<1x8x32xf32>, vector<1x8x32xf32> -> vector<1x8x32xf32>
    "tpu.trace_stop"() : () -> ()
    %90 = vector.shape_cast %89 : vector<1x8x32xf32> to vector<8x32xf32>
    %91 = tpu.concatenate %30, %50, %70, %90 in 1 : vector<8x32xf32>, vector<8x32xf32>, vector<8x32xf32>, vector<8x32xf32> -> vector<8x128xf32>
    %92 = arith.addf %1, %91 : vector<8x128xf32>
    %c0_30 = arith.constant 0 : index
    %c0_31 = arith.constant 0 : index
    %93 = vector.load %arg5[%c0_30, %c0_31] : memref<2x128xf32, #tpu.memory_space<vmem>>, vector<2x128xf32>
    %94 = vector.extract_strided_slice %93 {offsets = [0, 0], sizes = [1, 128], strides = [1, 1]} : vector<2x128xf32> to vector<1x128xf32>
    %95 = vector.extract_strided_slice %93 {offsets = [1, 0], sizes = [1, 128], strides = [1, 1]} : vector<2x128xf32> to vector<1x128xf32>
    %cst_32 = arith.constant dense<0.000000e+00> : vector<8xf32>
    %96 = vector.multi_reduction <add>, %92, %cst_32 [1] : vector<8x128xf32> to vector<8xf32>
    %97 = vector.shape_cast %96 : vector<8xf32> to vector<8x1xf32>
    %cst_33 = arith.constant 1.280000e+02 : f32
    %98 = vector.broadcast %cst_33 : f32 to vector<8x1xf32>
    %99 = arith.divf %97, %98 : vector<8x1xf32>
    %100 = vector.broadcast %99 : vector<8x1xf32> to vector<8x128xf32>
    %101 = arith.subf %92, %100 : vector<8x128xf32>
    %102 = arith.mulf %101, %101 : vector<8x128xf32>
    %cst_34 = arith.constant dense<0.000000e+00> : vector<8xf32>
    %103 = vector.multi_reduction <add>, %102, %cst_34 [1] : vector<8x128xf32> to vector<8xf32>
    %104 = vector.shape_cast %103 : vector<8xf32> to vector<8x1xf32>
    %cst_35 = arith.constant 1.280000e+02 : f32
    %105 = vector.broadcast %cst_35 : f32 to vector<8x1xf32>
    %106 = arith.divf %104, %105 : vector<8x1xf32>
    %cst_36 = arith.constant 9.99999974E-6 : f32
    %107 = vector.broadcast %cst_36 : f32 to vector<8x1xf32>
    %108 = arith.addf %106, %107 : vector<8x1xf32>
    %109 = math.rsqrt %108 : vector<8x1xf32>
    %110 = vector.broadcast %109 : vector<8x1xf32> to vector<8x128xf32>
    %111 = arith.mulf %101, %110 : vector<8x128xf32>
    %112 = vector.broadcast %94 : vector<1x128xf32> to vector<8x128xf32>
    %113 = arith.mulf %111, %112 : vector<8x128xf32>
    %114 = vector.broadcast %95 : vector<1x128xf32> to vector<8x128xf32>
    %115 = arith.addf %113, %114 : vector<8x128xf32>
    %c0_37 = arith.constant 0 : index
    %c0_38 = arith.constant 0 : index
    %116 = vector.load %arg6[%c0_37, %c0_38] : memref<128x128xf32, #tpu.memory_space<vmem>>, vector<128x128xf32>
    %cst_39 = arith.constant dense<0.000000e+00> : vector<16x128xf32>
    %117 = tpu.matmul %3, %116, %cst_39 {dimension_numbers = #tpu.dot_dimension_numbers<[1], [0], [0], [1], [0, 0, 1, 1], [], []>} : vector<16x128xf32>, vector<128x128xf32>, vector<16x128xf32> -> vector<16x128xf32>
    %c0_40 = arith.constant 0 : index
    %c0_41 = arith.constant 0 : index
    %118 = vector.load %arg7[%c0_40, %c0_41] : memref<128x256xf32, #tpu.memory_space<vmem>>, vector<128x256xf32>
    %cst_42 = arith.constant dense<0.000000e+00> : vector<16x256xf32>
    %119 = tpu.matmul %3, %118, %cst_42 {dimension_numbers = #tpu.dot_dimension_numbers<[1], [0], [0], [1], [0, 0, 1, 1], [], []>} : vector<16x128xf32>, vector<128x256xf32>, vector<16x256xf32> -> vector<16x256xf32>
    %120 = vector.extract_strided_slice %117 {offsets = [0, 0], sizes = [16, 32], strides = [1, 1]} : vector<16x128xf32> to vector<16x32xf32>
    %121 = vector.shape_cast %120 : vector<16x32xf32> to vector<1x16x32xf32>
    %122 = vector.extract_strided_slice %119 {offsets = [0, 0], sizes = [16, 32], strides = [1, 1]} : vector<16x256xf32> to vector<16x32xf32>
    %123 = vector.shape_cast %122 : vector<16x32xf32> to vector<1x16x32xf32>
    %124 = vector.extract_strided_slice %119 {offsets = [0, 128], sizes = [16, 32], strides = [1, 1]} : vector<16x256xf32> to vector<16x32xf32>
    %125 = vector.shape_cast %124 : vector<16x32xf32> to vector<1x16x32xf32>
    "tpu.trace_start"() <{level = 10 : i32, message = "bqd,bkd->bqk"}> : () -> ()
    %cst_43 = arith.constant dense<0.000000e+00> : vector<1x16x16xf32>
    %126 = tpu.matmul %121, %123, %cst_43 {dimension_numbers = #tpu.dot_dimension_numbers<[2], [2], [1], [1], [0, 0, 0, 1, 1, 1], [0], [0]>} : vector<1x16x32xf32>, vector<1x16x32xf32>, vector<1x16x16xf32> -> vector<1x16x16xf32>
    "tpu.trace_stop"() : () -> ()
    %cst_44 = arith.constant dense<0xFF800000> : vector<1x16xf32>
    %127 = vector.multi_reduction <maximumf>, %126, %cst_44 [2] : vector<1x16x16xf32> to vector<1x16xf32>
    %128 = vector.shape_cast %127 : vector<1x16xf32> to vector<1x16x1xf32>
    %129 = vector.broadcast %128 : vector<1x16x1xf32> to vector<1x16x16xf32>
    %130 = arith.subf %126, %129 : vector<1x16x16xf32>
    %131 = math.exp %130 : vector<1x16x16xf32>
    %cst_45 = arith.constant dense<0.000000e+00> : vector<1x16xf32>
    %132 = vector.multi_reduction <add>, %131, %cst_45 [2] : vector<1x16x16xf32> to vector<1x16xf32>
    %133 = vector.shape_cast %132 : vector<1x16xf32> to vector<1x16x1xf32>
    %134 = vector.broadcast %133 : vector<1x16x1xf32> to vector<1x16x16xf32>
    %135 = arith.divf %131, %134 : vector<1x16x16xf32>
    "tpu.trace_start"() <{level = 10 : i32, message = "bqk,bkd->bqd"}> : () -> ()
    %cst_46 = arith.constant dense<0.000000e+00> : vector<1x16x32xf32>
    %136 = tpu.matmul %135, %125, %cst_46 {dimension_numbers = #tpu.dot_dimension_numbers<[2], [1], [1], [2], [0, 0, 0, 1, 1, 2], [0], [0]>} : vector<1x16x16xf32>, vector<1x16x32xf32>, vector<1x16x32xf32> -> vector<1x16x32xf32>
    "tpu.trace_stop"() : () -> ()
    %137 = vector.shape_cast %136 : vector<1x16x32xf32> to vector<16x32xf32>
    %138 = vector.extract_strided_slice %117 {offsets = [0, 32], sizes = [16, 32], strides = [1, 1]} : vector<16x128xf32> to vector<16x32xf32>
    %139 = vector.shape_cast %138 : vector<16x32xf32> to vector<1x16x32xf32>
    %140 = vector.extract_strided_slice %119 {offsets = [0, 32], sizes = [16, 32], strides = [1, 1]} : vector<16x256xf32> to vector<16x32xf32>
    %141 = vector.shape_cast %140 : vector<16x32xf32> to vector<1x16x32xf32>
    %142 = vector.extract_strided_slice %119 {offsets = [0, 160], sizes = [16, 32], strides = [1, 1]} : vector<16x256xf32> to vector<16x32xf32>
    %143 = vector.shape_cast %142 : vector<16x32xf32> to vector<1x16x32xf32>
    "tpu.trace_start"() <{level = 10 : i32, message = "bqd,bkd->bqk"}> : () -> ()
    %cst_47 = arith.constant dense<0.000000e+00> : vector<1x16x16xf32>
    %144 = tpu.matmul %139, %141, %cst_47 {dimension_numbers = #tpu.dot_dimension_numbers<[2], [2], [1], [1], [0, 0, 0, 1, 1, 1], [0], [0]>} : vector<1x16x32xf32>, vector<1x16x32xf32>, vector<1x16x16xf32> -> vector<1x16x16xf32>
    "tpu.trace_stop"() : () -> ()
    %cst_48 = arith.constant dense<0xFF800000> : vector<1x16xf32>
    %145 = vector.multi_reduction <maximumf>, %144, %cst_48 [2] : vector<1x16x16xf32> to vector<1x16xf32>
    %146 = vector.shape_cast %145 : vector<1x16xf32> to vector<1x16x1xf32>
    %147 = vector.broadcast %146 : vector<1x16x1xf32> to vector<1x16x16xf32>
    %148 = arith.subf %144, %147 : vector<1x16x16xf32>
    %149 = math.exp %148 : vector<1x16x16xf32>
    %cst_49 = arith.constant dense<0.000000e+00> : vector<1x16xf32>
    %150 = vector.multi_reduction <add>, %149, %cst_49 [2] : vector<1x16x16xf32> to vector<1x16xf32>
    %151 = vector.shape_cast %150 : vector<1x16xf32> to vector<1x16x1xf32>
    %152 = vector.broadcast %151 : vector<1x16x1xf32> to vector<1x16x16xf32>
    %153 = arith.divf %149, %152 : vector<1x16x16xf32>
    "tpu.trace_start"() <{level = 10 : i32, message = "bqk,bkd->bqd"}> : () -> ()
    %cst_50 = arith.constant dense<0.000000e+00> : vector<1x16x32xf32>
    %154 = tpu.matmul %153, %143, %cst_50 {dimension_numbers = #tpu.dot_dimension_numbers<[2], [1], [1], [2], [0, 0, 0, 1, 1, 2], [0], [0]>} : vector<1x16x16xf32>, vector<1x16x32xf32>, vector<1x16x32xf32> -> vector<1x16x32xf32>
    "tpu.trace_stop"() : () -> ()
    %155 = vector.shape_cast %154 : vector<1x16x32xf32> to vector<16x32xf32>
    %156 = vector.extract_strided_slice %117 {offsets = [0, 64], sizes = [16, 32], strides = [1, 1]} : vector<16x128xf32> to vector<16x32xf32>
    %157 = vector.shape_cast %156 : vector<16x32xf32> to vector<1x16x32xf32>
    %158 = vector.extract_strided_slice %119 {offsets = [0, 64], sizes = [16, 32], strides = [1, 1]} : vector<16x256xf32> to vector<16x32xf32>
    %159 = vector.shape_cast %158 : vector<16x32xf32> to vector<1x16x32xf32>
    %160 = vector.extract_strided_slice %119 {offsets = [0, 192], sizes = [16, 32], strides = [1, 1]} : vector<16x256xf32> to vector<16x32xf32>
    %161 = vector.shape_cast %160 : vector<16x32xf32> to vector<1x16x32xf32>
    "tpu.trace_start"() <{level = 10 : i32, message = "bqd,bkd->bqk"}> : () -> ()
    %cst_51 = arith.constant dense<0.000000e+00> : vector<1x16x16xf32>
    %162 = tpu.matmul %157, %159, %cst_51 {dimension_numbers = #tpu.dot_dimension_numbers<[2], [2], [1], [1], [0, 0, 0, 1, 1, 1], [0], [0]>} : vector<1x16x32xf32>, vector<1x16x32xf32>, vector<1x16x16xf32> -> vector<1x16x16xf32>
    "tpu.trace_stop"() : () -> ()
    %cst_52 = arith.constant dense<0xFF800000> : vector<1x16xf32>
    %163 = vector.multi_reduction <maximumf>, %162, %cst_52 [2] : vector<1x16x16xf32> to vector<1x16xf32>
    %164 = vector.shape_cast %163 : vector<1x16xf32> to vector<1x16x1xf32>
    %165 = vector.broadcast %164 : vector<1x16x1xf32> to vector<1x16x16xf32>
    %166 = arith.subf %162, %165 : vector<1x16x16xf32>
    %167 = math.exp %166 : vector<1x16x16xf32>
    %cst_53 = arith.constant dense<0.000000e+00> : vector<1x16xf32>
    %168 = vector.multi_reduction <add>, %167, %cst_53 [2] : vector<1x16x16xf32> to vector<1x16xf32>
    %169 = vector.shape_cast %168 : vector<1x16xf32> to vector<1x16x1xf32>
    %170 = vector.broadcast %169 : vector<1x16x1xf32> to vector<1x16x16xf32>
    %171 = arith.divf %167, %170 : vector<1x16x16xf32>
    "tpu.trace_start"() <{level = 10 : i32, message = "bqk,bkd->bqd"}> : () -> ()
    %cst_54 = arith.constant dense<0.000000e+00> : vector<1x16x32xf32>
    %172 = tpu.matmul %171, %161, %cst_54 {dimension_numbers = #tpu.dot_dimension_numbers<[2], [1], [1], [2], [0, 0, 0, 1, 1, 2], [0], [0]>} : vector<1x16x16xf32>, vector<1x16x32xf32>, vector<1x16x32xf32> -> vector<1x16x32xf32>
    "tpu.trace_stop"() : () -> ()
    %173 = vector.shape_cast %172 : vector<1x16x32xf32> to vector<16x32xf32>
    %174 = vector.extract_strided_slice %117 {offsets = [0, 96], sizes = [16, 32], strides = [1, 1]} : vector<16x128xf32> to vector<16x32xf32>
    %175 = vector.shape_cast %174 : vector<16x32xf32> to vector<1x16x32xf32>
    %176 = vector.extract_strided_slice %119 {offsets = [0, 96], sizes = [16, 32], strides = [1, 1]} : vector<16x256xf32> to vector<16x32xf32>
    %177 = vector.shape_cast %176 : vector<16x32xf32> to vector<1x16x32xf32>
    %178 = vector.extract_strided_slice %119 {offsets = [0, 224], sizes = [16, 32], strides = [1, 1]} : vector<16x256xf32> to vector<16x32xf32>
    %179 = vector.shape_cast %178 : vector<16x32xf32> to vector<1x16x32xf32>
    "tpu.trace_start"() <{level = 10 : i32, message = "bqd,bkd->bqk"}> : () -> ()
    %cst_55 = arith.constant dense<0.000000e+00> : vector<1x16x16xf32>
    %180 = tpu.matmul %175, %177, %cst_55 {dimension_numbers = #tpu.dot_dimension_numbers<[2], [2], [1], [1], [0, 0, 0, 1, 1, 1], [0], [0]>} : vector<1x16x32xf32>, vector<1x16x32xf32>, vector<1x16x16xf32> -> vector<1x16x16xf32>
    "tpu.trace_stop"() : () -> ()
    %cst_56 = arith.constant dense<0xFF800000> : vector<1x16xf32>
    %181 = vector.multi_reduction <maximumf>, %180, %cst_56 [2] : vector<1x16x16xf32> to vector<1x16xf32>
    %182 = vector.shape_cast %181 : vector<1x16xf32> to vector<1x16x1xf32>
    %183 = vector.broadcast %182 : vector<1x16x1xf32> to vector<1x16x16xf32>
    %184 = arith.subf %180, %183 : vector<1x16x16xf32>
    %185 = math.exp %184 : vector<1x16x16xf32>
    %cst_57 = arith.constant dense<0.000000e+00> : vector<1x16xf32>
    %186 = vector.multi_reduction <add>, %185, %cst_57 [2] : vector<1x16x16xf32> to vector<1x16xf32>
    %187 = vector.shape_cast %186 : vector<1x16xf32> to vector<1x16x1xf32>
    %188 = vector.broadcast %187 : vector<1x16x1xf32> to vector<1x16x16xf32>
    %189 = arith.divf %185, %188 : vector<1x16x16xf32>
    "tpu.trace_start"() <{level = 10 : i32, message = "bqk,bkd->bqd"}> : () -> ()
    %cst_58 = arith.constant dense<0.000000e+00> : vector<1x16x32xf32>
    %190 = tpu.matmul %189, %179, %cst_58 {dimension_numbers = #tpu.dot_dimension_numbers<[2], [1], [1], [2], [0, 0, 0, 1, 1, 2], [0], [0]>} : vector<1x16x16xf32>, vector<1x16x32xf32>, vector<1x16x32xf32> -> vector<1x16x32xf32>
    "tpu.trace_stop"() : () -> ()
    %191 = vector.shape_cast %190 : vector<1x16x32xf32> to vector<16x32xf32>
    %192 = tpu.concatenate %137, %155, %173, %191 in 1 : vector<16x32xf32>, vector<16x32xf32>, vector<16x32xf32>, vector<16x32xf32> -> vector<16x128xf32>
    %193 = arith.addf %3, %192 : vector<16x128xf32>
    %c0_59 = arith.constant 0 : index
    %c0_60 = arith.constant 0 : index
    %194 = vector.load %arg8[%c0_59, %c0_60] : memref<2x128xf32, #tpu.memory_space<vmem>>, vector<2x128xf32>
    %195 = vector.extract_strided_slice %194 {offsets = [0, 0], sizes = [1, 128], strides = [1, 1]} : vector<2x128xf32> to vector<1x128xf32>
    %196 = vector.extract_strided_slice %194 {offsets = [1, 0], sizes = [1, 128], strides = [1, 1]} : vector<2x128xf32> to vector<1x128xf32>
    %cst_61 = arith.constant dense<0.000000e+00> : vector<16xf32>
    %197 = vector.multi_reduction <add>, %193, %cst_61 [1] : vector<16x128xf32> to vector<16xf32>
    %198 = vector.shape_cast %197 : vector<16xf32> to vector<16x1xf32>
    %cst_62 = arith.constant 1.280000e+02 : f32
    %199 = vector.broadcast %cst_62 : f32 to vector<16x1xf32>
    %200 = arith.divf %198, %199 : vector<16x1xf32>
    %201 = vector.broadcast %200 : vector<16x1xf32> to vector<16x128xf32>
    %202 = arith.subf %193, %201 : vector<16x128xf32>
    %203 = arith.mulf %202, %202 : vector<16x128xf32>
    %cst_63 = arith.constant dense<0.000000e+00> : vector<16xf32>
    %204 = vector.multi_reduction <add>, %203, %cst_63 [1] : vector<16x128xf32> to vector<16xf32>
    %205 = vector.shape_cast %204 : vector<16xf32> to vector<16x1xf32>
    %cst_64 = arith.constant 1.280000e+02 : f32
    %206 = vector.broadcast %cst_64 : f32 to vector<16x1xf32>
    %207 = arith.divf %205, %206 : vector<16x1xf32>
    %cst_65 = arith.constant 9.99999974E-6 : f32
    %208 = vector.broadcast %cst_65 : f32 to vector<16x1xf32>
    %209 = arith.addf %207, %208 : vector<16x1xf32>
    %210 = math.rsqrt %209 : vector<16x1xf32>
    %211 = vector.broadcast %210 : vector<16x1xf32> to vector<16x128xf32>
    %212 = arith.mulf %202, %211 : vector<16x128xf32>
    %213 = vector.broadcast %195 : vector<1x128xf32> to vector<16x128xf32>
    %214 = arith.mulf %212, %213 : vector<16x128xf32>
    %215 = vector.broadcast %196 : vector<1x128xf32> to vector<16x128xf32>
    %216 = arith.addf %214, %215 : vector<16x128xf32>
    %c0_66 = arith.constant 0 : index
    %c0_67 = arith.constant 0 : index
    %217 = vector.load %arg9[%c0_66, %c0_67] : memref<128x512xf32, #tpu.memory_space<vmem>>, vector<128x512xf32>
    %cst_68 = arith.constant dense<0.000000e+00> : vector<16x512xf32>
    %218 = tpu.matmul %216, %217, %cst_68 {dimension_numbers = #tpu.dot_dimension_numbers<[1], [0], [0], [1], [0, 0, 1, 1], [], []>} : vector<16x128xf32>, vector<128x512xf32>, vector<16x512xf32> -> vector<16x512xf32>
    %c0_69 = arith.constant 0 : index
    %c0_70 = arith.constant 0 : index
    %219 = vector.load %arg10[%c0_69, %c0_70] : memref<1x512xf32, #tpu.memory_space<vmem>>, vector<1x512xf32>
    %220 = vector.broadcast %219 : vector<1x512xf32> to vector<16x512xf32>
    %221 = arith.addf %218, %220 : vector<16x512xf32>
    %cst_71 = arith.constant 0.000000e+00 : f32
    %222 = vector.broadcast %cst_71 : f32 to vector<16x512xf32>
    %223 = arith.maximumf %221, %222 : vector<16x512xf32>
    %c0_72 = arith.constant 0 : index
    %c0_73 = arith.constant 0 : index
    %224 = vector.load %arg11[%c0_72, %c0_73] : memref<512x128xf32, #tpu.memory_space<vmem>>, vector<512x128xf32>
    %cst_74 = arith.constant dense<0.000000e+00> : vector<16x128xf32>
    %225 = tpu.matmul %223, %224, %cst_74 {dimension_numbers = #tpu.dot_dimension_numbers<[1], [0], [0], [1], [0, 0, 1, 1], [], []>} : vector<16x512xf32>, vector<512x128xf32>, vector<16x128xf32> -> vector<16x128xf32>
    %c0_75 = arith.constant 0 : index
    %c0_76 = arith.constant 0 : index
    %226 = vector.load %arg12[%c0_75, %c0_76] : memref<1x128xf32, #tpu.memory_space<vmem>>, vector<1x128xf32>
    %227 = vector.broadcast %226 : vector<1x128xf32> to vector<16x128xf32>
    %228 = arith.addf %225, %227 : vector<16x128xf32>
    %229 = arith.addf %216, %228 : vector<16x128xf32>
    %c0_77 = arith.constant 0 : index
    %c0_78 = arith.constant 0 : index
    %230 = vector.load %arg13[%c0_77, %c0_78] : memref<2x128xf32, #tpu.memory_space<vmem>>, vector<2x128xf32>
    %231 = vector.extract_strided_slice %230 {offsets = [0, 0], sizes = [1, 128], strides = [1, 1]} : vector<2x128xf32> to vector<1x128xf32>
    %232 = vector.extract_strided_slice %230 {offsets = [1, 0], sizes = [1, 128], strides = [1, 1]} : vector<2x128xf32> to vector<1x128xf32>
    %cst_79 = arith.constant dense<0.000000e+00> : vector<16xf32>
    %233 = vector.multi_reduction <add>, %229, %cst_79 [1] : vector<16x128xf32> to vector<16xf32>
    %234 = vector.shape_cast %233 : vector<16xf32> to vector<16x1xf32>
    %cst_80 = arith.constant 1.280000e+02 : f32
    %235 = vector.broadcast %cst_80 : f32 to vector<16x1xf32>
    %236 = arith.divf %234, %235 : vector<16x1xf32>
    %237 = vector.broadcast %236 : vector<16x1xf32> to vector<16x128xf32>
    %238 = arith.subf %229, %237 : vector<16x128xf32>
    %239 = arith.mulf %238, %238 : vector<16x128xf32>
    %cst_81 = arith.constant dense<0.000000e+00> : vector<16xf32>
    %240 = vector.multi_reduction <add>, %239, %cst_81 [1] : vector<16x128xf32> to vector<16xf32>
    %241 = vector.shape_cast %240 : vector<16xf32> to vector<16x1xf32>
    %cst_82 = arith.constant 1.280000e+02 : f32
    %242 = vector.broadcast %cst_82 : f32 to vector<16x1xf32>
    %243 = arith.divf %241, %242 : vector<16x1xf32>
    %cst_83 = arith.constant 9.99999974E-6 : f32
    %244 = vector.broadcast %cst_83 : f32 to vector<16x1xf32>
    %245 = arith.addf %243, %244 : vector<16x1xf32>
    %246 = math.rsqrt %245 : vector<16x1xf32>
    %247 = vector.broadcast %246 : vector<16x1xf32> to vector<16x128xf32>
    %248 = arith.mulf %238, %247 : vector<16x128xf32>
    %249 = vector.broadcast %231 : vector<1x128xf32> to vector<16x128xf32>
    %250 = arith.mulf %248, %249 : vector<16x128xf32>
    %251 = vector.broadcast %232 : vector<1x128xf32> to vector<16x128xf32>
    %252 = arith.addf %250, %251 : vector<16x128xf32>
    %c0_84 = arith.constant 0 : index
    %c0_85 = arith.constant 0 : index
    %253 = vector.load %arg14[%c0_84, %c0_85] : memref<128x128xf32, #tpu.memory_space<vmem>>, vector<128x128xf32>
    %cst_86 = arith.constant dense<0.000000e+00> : vector<8x128xf32>
    %254 = tpu.matmul %115, %253, %cst_86 {dimension_numbers = #tpu.dot_dimension_numbers<[1], [0], [0], [1], [0, 0, 1, 1], [], []>} : vector<8x128xf32>, vector<128x128xf32>, vector<8x128xf32> -> vector<8x128xf32>
    %c0_87 = arith.constant 0 : index
    %c0_88 = arith.constant 0 : index
    %255 = vector.load %arg15[%c0_87, %c0_88] : memref<128x256xf32, #tpu.memory_space<vmem>>, vector<128x256xf32>
    %cst_89 = arith.constant dense<0.000000e+00> : vector<16x256xf32>
    %256 = tpu.matmul %252, %255, %cst_89 {dimension_numbers = #tpu.dot_dimension_numbers<[1], [0], [0], [1], [0, 0, 1, 1], [], []>} : vector<16x128xf32>, vector<128x256xf32>, vector<16x256xf32> -> vector<16x256xf32>
    %257 = vector.extract_strided_slice %254 {offsets = [0, 0], sizes = [8, 32], strides = [1, 1]} : vector<8x128xf32> to vector<8x32xf32>
    %258 = vector.shape_cast %257 : vector<8x32xf32> to vector<1x8x32xf32>
    %259 = vector.extract_strided_slice %256 {offsets = [0, 0], sizes = [16, 32], strides = [1, 1]} : vector<16x256xf32> to vector<16x32xf32>
    %260 = vector.shape_cast %259 : vector<16x32xf32> to vector<1x16x32xf32>
    %261 = vector.extract_strided_slice %256 {offsets = [0, 128], sizes = [16, 32], strides = [1, 1]} : vector<16x256xf32> to vector<16x32xf32>
    %262 = vector.shape_cast %261 : vector<16x32xf32> to vector<1x16x32xf32>
    "tpu.trace_start"() <{level = 10 : i32, message = "bqd,bkd->bqk"}> : () -> ()
    %cst_90 = arith.constant dense<0.000000e+00> : vector<1x8x16xf32>
    %263 = tpu.matmul %258, %260, %cst_90 {dimension_numbers = #tpu.dot_dimension_numbers<[2], [2], [1], [1], [0, 0, 0, 1, 1, 1], [0], [0]>} : vector<1x8x32xf32>, vector<1x16x32xf32>, vector<1x8x16xf32> -> vector<1x8x16xf32>
    "tpu.trace_stop"() : () -> ()
    "tpu.trace_start"() <{level = 10 : i32, message = "bqk,bkd->bqd"}> : () -> ()
    %cst_91 = arith.constant dense<0.000000e+00> : vector<1x8x32xf32>
    %264 = tpu.matmul %263, %262, %cst_91 {dimension_numbers = #tpu.dot_dimension_numbers<[2], [1], [1], [2], [0, 0, 0, 1, 1, 2], [0], [0]>} : vector<1x8x16xf32>, vector<1x16x32xf32>, vector<1x8x32xf32> -> vector<1x8x32xf32>
    "tpu.trace_stop"() : () -> ()
    %265 = vector.shape_cast %264 : vector<1x8x32xf32> to vector<8x32xf32>
    %266 = vector.extract_strided_slice %254 {offsets = [0, 32], sizes = [8, 32], strides = [1, 1]} : vector<8x128xf32> to vector<8x32xf32>
    %267 = vector.shape_cast %266 : vector<8x32xf32> to vector<1x8x32xf32>
    %268 = vector.extract_strided_slice %256 {offsets = [0, 32], sizes = [16, 32], strides = [1, 1]} : vector<16x256xf32> to vector<16x32xf32>
    %269 = vector.shape_cast %268 : vector<16x32xf32> to vector<1x16x32xf32>
    %270 = vector.extract_strided_slice %256 {offsets = [0, 160], sizes = [16, 32], strides = [1, 1]} : vector<16x256xf32> to vector<16x32xf32>
    %271 = vector.shape_cast %270 : vector<16x32xf32> to vector<1x16x32xf32>
    "tpu.trace_start"() <{level = 10 : i32, message = "bqd,bkd->bqk"}> : () -> ()
    %cst_92 = arith.constant dense<0.000000e+00> : vector<1x8x16xf32>
    %272 = tpu.matmul %267, %269, %cst_92 {dimension_numbers = #tpu.dot_dimension_numbers<[2], [2], [1], [1], [0, 0, 0, 1, 1, 1], [0], [0]>} : vector<1x8x32xf32>, vector<1x16x32xf32>, vector<1x8x16xf32> -> vector<1x8x16xf32>
    "tpu.trace_stop"() : () -> ()
    "tpu.trace_start"() <{level = 10 : i32, message = "bqk,bkd->bqd"}> : () -> ()
    %cst_93 = arith.constant dense<0.000000e+00> : vector<1x8x32xf32>
    %273 = tpu.matmul %272, %271, %cst_93 {dimension_numbers = #tpu.dot_dimension_numbers<[2], [1], [1], [2], [0, 0, 0, 1, 1, 2], [0], [0]>} : vector<1x8x16xf32>, vector<1x16x32xf32>, vector<1x8x32xf32> -> vector<1x8x32xf32>
    "tpu.trace_stop"() : () -> ()
    %274 = vector.shape_cast %273 : vector<1x8x32xf32> to vector<8x32xf32>
    %275 = vector.extract_strided_slice %254 {offsets = [0, 64], sizes = [8, 32], strides = [1, 1]} : vector<8x128xf32> to vector<8x32xf32>
    %276 = vector.shape_cast %275 : vector<8x32xf32> to vector<1x8x32xf32>
    %277 = vector.extract_strided_slice %256 {offsets = [0, 64], sizes = [16, 32], strides = [1, 1]} : vector<16x256xf32> to vector<16x32xf32>
    %278 = vector.shape_cast %277 : vector<16x32xf32> to vector<1x16x32xf32>
    %279 = vector.extract_strided_slice %256 {offsets = [0, 192], sizes = [16, 32], strides = [1, 1]} : vector<16x256xf32> to vector<16x32xf32>
    %280 = vector.shape_cast %279 : vector<16x32xf32> to vector<1x16x32xf32>
    "tpu.trace_start"() <{level = 10 : i32, message = "bqd,bkd->bqk"}> : () -> ()
    %cst_94 = arith.constant dense<0.000000e+00> : vector<1x8x16xf32>
    %281 = tpu.matmul %276, %278, %cst_94 {dimension_numbers = #tpu.dot_dimension_numbers<[2], [2], [1], [1], [0, 0, 0, 1, 1, 1], [0], [0]>} : vector<1x8x32xf32>, vector<1x16x32xf32>, vector<1x8x16xf32> -> vector<1x8x16xf32>
    "tpu.trace_stop"() : () -> ()
    "tpu.trace_start"() <{level = 10 : i32, message = "bqk,bkd->bqd"}> : () -> ()
    %cst_95 = arith.constant dense<0.000000e+00> : vector<1x8x32xf32>
    %282 = tpu.matmul %281, %280, %cst_95 {dimension_numbers = #tpu.dot_dimension_numbers<[2], [1], [1], [2], [0, 0, 0, 1, 1, 2], [0], [0]>} : vector<1x8x16xf32>, vector<1x16x32xf32>, vector<1x8x32xf32> -> vector<1x8x32xf32>
    "tpu.trace_stop"() : () -> ()
    %283 = vector.shape_cast %282 : vector<1x8x32xf32> to vector<8x32xf32>
    %284 = vector.extract_strided_slice %254 {offsets = [0, 96], sizes = [8, 32], strides = [1, 1]} : vector<8x128xf32> to vector<8x32xf32>
    %285 = vector.shape_cast %284 : vector<8x32xf32> to vector<1x8x32xf32>
    %286 = vector.extract_strided_slice %256 {offsets = [0, 96], sizes = [16, 32], strides = [1, 1]} : vector<16x256xf32> to vector<16x32xf32>
    %287 = vector.shape_cast %286 : vector<16x32xf32> to vector<1x16x32xf32>
    %288 = vector.extract_strided_slice %256 {offsets = [0, 224], sizes = [16, 32], strides = [1, 1]} : vector<16x256xf32> to vector<16x32xf32>
    %289 = vector.shape_cast %288 : vector<16x32xf32> to vector<1x16x32xf32>
    "tpu.trace_start"() <{level = 10 : i32, message = "bqd,bkd->bqk"}> : () -> ()
    %cst_96 = arith.constant dense<0.000000e+00> : vector<1x8x16xf32>
    %290 = tpu.matmul %285, %287, %cst_96 {dimension_numbers = #tpu.dot_dimension_numbers<[2], [2], [1], [1], [0, 0, 0, 1, 1, 1], [0], [0]>} : vector<1x8x32xf32>, vector<1x16x32xf32>, vector<1x8x16xf32> -> vector<1x8x16xf32>
    "tpu.trace_stop"() : () -> ()
    "tpu.trace_start"() <{level = 10 : i32, message = "bqk,bkd->bqd"}> : () -> ()
    %cst_97 = arith.constant dense<0.000000e+00> : vector<1x8x32xf32>
    %291 = tpu.matmul %290, %289, %cst_97 {dimension_numbers = #tpu.dot_dimension_numbers<[2], [1], [1], [2], [0, 0, 0, 1, 1, 2], [0], [0]>} : vector<1x8x16xf32>, vector<1x16x32xf32>, vector<1x8x32xf32> -> vector<1x8x32xf32>
    "tpu.trace_stop"() : () -> ()
    %292 = vector.shape_cast %291 : vector<1x8x32xf32> to vector<8x32xf32>
    %293 = tpu.concatenate %265, %274, %283, %292 in 1 : vector<8x32xf32>, vector<8x32xf32>, vector<8x32xf32>, vector<8x32xf32> -> vector<8x128xf32>
    %294 = arith.addf %115, %293 : vector<8x128xf32>
    %c0_98 = arith.constant 0 : index
    %c0_99 = arith.constant 0 : index
    %295 = vector.load %arg16[%c0_98, %c0_99] : memref<2x128xf32, #tpu.memory_space<vmem>>, vector<2x128xf32>
    %296 = vector.extract_strided_slice %295 {offsets = [0, 0], sizes = [1, 128], strides = [1, 1]} : vector<2x128xf32> to vector<1x128xf32>
    %297 = vector.extract_strided_slice %295 {offsets = [1, 0], sizes = [1, 128], strides = [1, 1]} : vector<2x128xf32> to vector<1x128xf32>
    %cst_100 = arith.constant dense<0.000000e+00> : vector<8xf32>
    %298 = vector.multi_reduction <add>, %294, %cst_100 [1] : vector<8x128xf32> to vector<8xf32>
    %299 = vector.shape_cast %298 : vector<8xf32> to vector<8x1xf32>
    %cst_101 = arith.constant 1.280000e+02 : f32
    %300 = vector.broadcast %cst_101 : f32 to vector<8x1xf32>
    %301 = arith.divf %299, %300 : vector<8x1xf32>
    %302 = vector.broadcast %301 : vector<8x1xf32> to vector<8x128xf32>
    %303 = arith.subf %294, %302 : vector<8x128xf32>
    %304 = arith.mulf %303, %303 : vector<8x128xf32>
    %cst_102 = arith.constant dense<0.000000e+00> : vector<8xf32>
    %305 = vector.multi_reduction <add>, %304, %cst_102 [1] : vector<8x128xf32> to vector<8xf32>
    %306 = vector.shape_cast %305 : vector<8xf32> to vector<8x1xf32>
    %cst_103 = arith.constant 1.280000e+02 : f32
    %307 = vector.broadcast %cst_103 : f32 to vector<8x1xf32>
    %308 = arith.divf %306, %307 : vector<8x1xf32>
    %cst_104 = arith.constant 9.99999974E-6 : f32
    %309 = vector.broadcast %cst_104 : f32 to vector<8x1xf32>
    %310 = arith.addf %308, %309 : vector<8x1xf32>
    %311 = math.rsqrt %310 : vector<8x1xf32>
    %312 = vector.broadcast %311 : vector<8x1xf32> to vector<8x128xf32>
    %313 = arith.mulf %303, %312 : vector<8x128xf32>
    %314 = vector.broadcast %296 : vector<1x128xf32> to vector<8x128xf32>
    %315 = arith.mulf %313, %314 : vector<8x128xf32>
    %316 = vector.broadcast %297 : vector<1x128xf32> to vector<8x128xf32>
    %317 = arith.addf %315, %316 : vector<8x128xf32>
    %c0_105 = arith.constant 0 : index
    %c0_106 = arith.constant 0 : index
    %318 = vector.load %arg17[%c0_105, %c0_106] : memref<128x512xf32, #tpu.memory_space<vmem>>, vector<128x512xf32>
    %cst_107 = arith.constant dense<0.000000e+00> : vector<8x512xf32>
    %319 = tpu.matmul %317, %318, %cst_107 {dimension_numbers = #tpu.dot_dimension_numbers<[1], [0], [0], [1], [0, 0, 1, 1], [], []>} : vector<8x128xf32>, vector<128x512xf32>, vector<8x512xf32> -> vector<8x512xf32>
    %c0_108 = arith.constant 0 : index
    %c0_109 = arith.constant 0 : index
    %320 = vector.load %arg18[%c0_108, %c0_109] : memref<1x512xf32, #tpu.memory_space<vmem>>, vector<1x512xf32>
    %321 = vector.broadcast %320 : vector<1x512xf32> to vector<8x512xf32>
    %322 = arith.addf %319, %321 : vector<8x512xf32>
    %cst_110 = arith.constant 0.000000e+00 : f32
    %323 = vector.broadcast %cst_110 : f32 to vector<8x512xf32>
    %324 = arith.maximumf %322, %323 : vector<8x512xf32>
    %c0_111 = arith.constant 0 : index
    %c0_112 = arith.constant 0 : index
    %325 = vector.load %arg19[%c0_111, %c0_112] : memref<512x128xf32, #tpu.memory_space<vmem>>, vector<512x128xf32>
    %cst_113 = arith.constant dense<0.000000e+00> : vector<8x128xf32>
    %326 = tpu.matmul %324, %325, %cst_113 {dimension_numbers = #tpu.dot_dimension_numbers<[1], [0], [0], [1], [0, 0, 1, 1], [], []>} : vector<8x512xf32>, vector<512x128xf32>, vector<8x128xf32> -> vector<8x128xf32>
    %c0_114 = arith.constant 0 : index
    %c0_115 = arith.constant 0 : index
    %327 = vector.load %arg20[%c0_114, %c0_115] : memref<1x128xf32, #tpu.memory_space<vmem>>, vector<1x128xf32>
    %328 = vector.broadcast %327 : vector<1x128xf32> to vector<8x128xf32>
    %329 = arith.addf %326, %328 : vector<8x128xf32>
    %330 = arith.addf %317, %329 : vector<8x128xf32>
    %c0_116 = arith.constant 0 : index
    %c0_117 = arith.constant 0 : index
    %331 = vector.load %arg21[%c0_116, %c0_117] : memref<2x128xf32, #tpu.memory_space<vmem>>, vector<2x128xf32>
    %332 = vector.extract_strided_slice %331 {offsets = [0, 0], sizes = [1, 128], strides = [1, 1]} : vector<2x128xf32> to vector<1x128xf32>
    %333 = vector.extract_strided_slice %331 {offsets = [1, 0], sizes = [1, 128], strides = [1, 1]} : vector<2x128xf32> to vector<1x128xf32>
    %cst_118 = arith.constant dense<0.000000e+00> : vector<8xf32>
    %334 = vector.multi_reduction <add>, %330, %cst_118 [1] : vector<8x128xf32> to vector<8xf32>
    %335 = vector.shape_cast %334 : vector<8xf32> to vector<8x1xf32>
    %cst_119 = arith.constant 1.280000e+02 : f32
    %336 = vector.broadcast %cst_119 : f32 to vector<8x1xf32>
    %337 = arith.divf %335, %336 : vector<8x1xf32>
    %338 = vector.broadcast %337 : vector<8x1xf32> to vector<8x128xf32>
    %339 = arith.subf %330, %338 : vector<8x128xf32>
    %340 = arith.mulf %339, %339 : vector<8x128xf32>
    %cst_120 = arith.constant dense<0.000000e+00> : vector<8xf32>
    %341 = vector.multi_reduction <add>, %340, %cst_120 [1] : vector<8x128xf32> to vector<8xf32>
    %342 = vector.shape_cast %341 : vector<8xf32> to vector<8x1xf32>
    %cst_121 = arith.constant 1.280000e+02 : f32
    %343 = vector.broadcast %cst_121 : f32 to vector<8x1xf32>
    %344 = arith.divf %342, %343 : vector<8x1xf32>
    %cst_122 = arith.constant 9.99999974E-6 : f32
    %345 = vector.broadcast %cst_122 : f32 to vector<8x1xf32>
    %346 = arith.addf %344, %345 : vector<8x1xf32>
    %347 = math.rsqrt %346 : vector<8x1xf32>
    %348 = vector.broadcast %347 : vector<8x1xf32> to vector<8x128xf32>
    %349 = arith.mulf %339, %348 : vector<8x128xf32>
    %350 = vector.broadcast %332 : vector<1x128xf32> to vector<8x128xf32>
    %351 = arith.mulf %349, %350 : vector<8x128xf32>
    %352 = vector.broadcast %333 : vector<1x128xf32> to vector<8x128xf32>
    %353 = arith.addf %351, %352 : vector<8x128xf32>
    %354 = vector.shape_cast %252 : vector<16x128xf32> to vector<1x16x128xf32>
    %c0_123 = arith.constant 0 : index
    %c0_124 = arith.constant 0 : index
    %c0_125 = arith.constant 0 : index
    %355 = vector.load %arg22[%c0_123, %c0_124, %c0_125] : memref<1x16x128xf32, #tpu.memory_space<vmem>>, vector<1x16x128xf32>
    tpu.vector_store %arg22[%c0_123, %c0_124, %c0_125], %354 {strides = array<i32>} : memref<1x16x128xf32, #tpu.memory_space<vmem>>, vector<1x16x128xf32>,
    %356 = vector.shape_cast %353 : vector<8x128xf32> to vector<1x8x128xf32>
    %c0_126 = arith.constant 0 : index
    %c0_127 = arith.constant 0 : index
    %c0_128 = arith.constant 0 : index
    %357 = vector.load %arg23[%c0_126, %c0_127, %c0_128] : memref<1x8x128xf32, #tpu.memory_space<vmem>>, vector<1x8x128xf32>
    tpu.vector_store %arg23[%c0_126, %c0_127, %c0_128], %356 {strides = array<i32>} : memref<1x8x128xf32, #tpu.memory_space<vmem>>, vector<1x8x128xf32>,
    return
  }
  func.func @transform_0(%arg0: i32) -> (i32, i32, i32) {
    %c0_i32 = arith.constant 0 : i32
    %c0_i32_0 = arith.constant 0 : i32
    %c0_i32_1 = arith.constant 0 : i32
    return %arg0, %c0_i32, %c0_i32_0 : i32, i32, i32
  }
  func.func @transform_1(%arg0: i32) -> (i32, i32, i32) {
    %c0_i32 = arith.constant 0 : i32
    %c0_i32_0 = arith.constant 0 : i32
    %c0_i32_1 = arith.constant 0 : i32
    return %arg0, %c0_i32, %c0_i32_0 : i32, i32, i32
  }
  func.func @transform_2(%arg0: i32) -> (i32, i32) {
    %c0_i32 = arith.constant 0 : i32
    %c0_i32_0 = arith.constant 0 : i32
    %c0_i32_1 = arith.constant 0 : i32
    return %c0_i32, %c0_i32_0 : i32, i32
  }
  func.func @transform_3(%arg0: i32) -> (i32, i32) {
    %c0_i32 = arith.constant 0 : i32
    %c0_i32_0 = arith.constant 0 : i32
    %c0_i32_1 = arith.constant 0 : i32
    return %c0_i32, %c0_i32_0 : i32, i32
  }
  func.func @transform_4(%arg0: i32) -> (i32, i32) {
    %c0_i32 = arith.constant 0 : i32
    %c0_i32_0 = arith.constant 0 : i32
    %c0_i32_1 = arith.constant 0 : i32
    return %c0_i32, %c0_i32_0 : i32, i32
  }
  func.func @transform_5(%arg0: i32) -> (i32, i32) {
    %c0_i32 = arith.constant 0 : i32
    %c0_i32_0 = arith.constant 0 : i32
    %c0_i32_1 = arith.constant 0 : i32
    return %c0_i32, %c0_i32_0 : i32, i32
  }
  func.func @transform_6(%arg0: i32) -> (i32, i32) {
    %c0_i32 = arith.constant 0 : i32
    %c0_i32_0 = arith.constant 0 : i32
    %c0_i32_1 = arith.constant 0 : i32
    return %c0_i32, %c0_i32_0 : i32, i32
  }
  func.func @transform_7(%arg0: i32) -> (i32, i32) {
    %c0_i32 = arith.constant 0 : i32
    %c0_i32_0 = arith.constant 0 : i32
    %c0_i32_1 = arith.constant 0 : i32
    return %c0_i32, %c0_i32_0 : i32, i32
  }
  func.func @transform_8(%arg0: i32) -> (i32, i32) {
    %c0_i32 = arith.constant 0 : i32
    %c0_i32_0 = arith.constant 0 : i32
    %c0_i32_1 = arith.constant 0 : i32
    return %c0_i32, %c0_i32_0 : i32, i32
  }
  func.func @transform_9(%arg0: i32) -> (i32, i32) {
    %c0_i32 = arith.constant 0 : i32
    %c0_i32_0 = arith.constant 0 : i32
    %c0_i32_1 = arith.constant 0 : i32
    return %c0_i32, %c0_i32_0 : i32, i32
  }
  func.func @transform_10(%arg0: i32) -> (i32, i32) {
    %c0_i32 = arith.constant 0 : i32
    %c0_i32_0 = arith.constant 0 : i32
    %c0_i32_1 = arith.constant 0 : i32
    return %c0_i32, %c0_i32_0 : i32, i32
  }
  func.func @transform_11(%arg0: i32) -> (i32, i32) {
    %c0_i32 = arith.constant 0 : i32
    %c0_i32_0 = arith.constant 0 : i32
    %c0_i32_1 = arith.constant 0 : i32
    return %c0_i32, %c0_i32_0 : i32, i32
  }
  func.func @transform_12(%arg0: i32) -> (i32, i32) {
    %c0_i32 = arith.constant 0 : i32
    %c0_i32_0 = arith.constant 0 : i32
    %c0_i32_1 = arith.constant 0 : i32
    return %c0_i32, %c0_i32_0 : i32, i32
  }
  func.func @transform_13(%arg0: i32) -> (i32, i32) {
    %c0_i32 = arith.constant 0 : i32
    %c0_i32_0 = arith.constant 0 : i32
    %c0_i32_1 = arith.constant 0 : i32
    return %c0_i32, %c0_i32_0 : i32, i32
  }
  func.func @transform_14(%arg0: i32) -> (i32, i32) {
    %c0_i32 = arith.constant 0 : i32
    %c0_i32_0 = arith.constant 0 : i32
    %c0_i32_1 = arith.constant 0 : i32
    return %c0_i32, %c0_i32_0 : i32, i32
  }
  func.func @transform_15(%arg0: i32) -> (i32, i32) {
    %c0_i32 = arith.constant 0 : i32
    %c0_i32_0 = arith.constant 0 : i32
    %c0_i32_1 = arith.constant 0 : i32
    return %c0_i32, %c0_i32_0 : i32, i32
  }
  func.func @transform_16(%arg0: i32) -> (i32, i32) {
    %c0_i32 = arith.constant 0 : i32
    %c0_i32_0 = arith.constant 0 : i32
    %c0_i32_1 = arith.constant 0 : i32
    return %c0_i32, %c0_i32_0 : i32, i32
  }
  func.func @transform_17(%arg0: i32) -> (i32, i32) {
    %c0_i32 = arith.constant 0 : i32
    %c0_i32_0 = arith.constant 0 : i32
    %c0_i32_1 = arith.constant 0 : i32
    return %c0_i32, %c0_i32_0 : i32, i32
  }
  func.func @transform_18(%arg0: i32) -> (i32, i32) {
    %c0_i32 = arith.constant 0 : i32
    %c0_i32_0 = arith.constant 0 : i32
    %c0_i32_1 = arith.constant 0 : i32
    return %c0_i32, %c0_i32_0 : i32, i32
  }
  func.func @transform_19(%arg0: i32) -> (i32, i32) {
    %c0_i32 = arith.constant 0 : i32
    %c0_i32_0 = arith.constant 0 : i32
    %c0_i32_1 = arith.constant 0 : i32
    return %c0_i32, %c0_i32_0 : i32, i32
  }
  func.func @transform_20(%arg0: i32) -> (i32, i32) {
    %c0_i32 = arith.constant 0 : i32
    %c0_i32_0 = arith.constant 0 : i32
    %c0_i32_1 = arith.constant 0 : i32
    return %c0_i32, %c0_i32_0 : i32, i32
  }
  func.func @transform_21(%arg0: i32) -> (i32, i32, i32) {
    %c0_i32 = arith.constant 0 : i32
    %c0_i32_0 = arith.constant 0 : i32
    %c0_i32_1 = arith.constant 0 : i32
    return %arg0, %c0_i32, %c0_i32_0 : i32, i32, i32
  }
  func.func @transform_22(%arg0: i32) -> (i32, i32, i32) {
    %c0_i32 = arith.constant 0 : i32
    %c0_i32_0 = arith.constant 0 : i32
    %c0_i32_1 = arith.constant 0 : i32
    return %arg0, %c0_i32, %c0_i32_0 : i32, i32, i32
  }
}

</mosaic_0001>

<bundles_post_ra>
// kernel: tpu_custom_call.1
= control target key start
LH: loop header
LB: loop body
LE: loop exit
PB: predicated region body
PF: predicated region fallthrough
CT: control target
= control target key end

     0   :  { %s7926_s0 = inlined_call_operand.hbm [shape: f32[2,16,128], index: 0, kind: input, shape index: {}]   ;;  %s7927_s1 = inlined_call_operand.hbm [shape: f32[2,8,128], index: 1, kind: input, shape index: {}]   ;;  %s7928_s2 = inlined_call_operand.hbm [shape: f32[128,128], index: 2, kind: input, shape index: {}]   ;;  %s7929_s3 = inlined_call_operand.hbm [shape: f32[128,256], index: 3, kind: input, shape index: {}]   ;;  %s7930_s4 = inlined_call_operand.vmem [shape: f32[2,128], index: 4, kind: input, shape index: {}]   ;;  %s7931_s5 = inlined_call_operand.hbm [shape: f32[128,128], index: 5, kind: input, shape index: {}]   ;;  %s7932_s6 = inlined_call_operand.hbm [shape: f32[128,256], index: 6, kind: input, shape index: {}]   ;;  %s7933_s7 = inlined_call_operand.vmem [shape: f32[2,128], index: 7, kind: input, shape index: {}]   ;;  %s7934_s8 = inlined_call_operand.hbm [shape: f32[128,512], index: 8, kind: input, shape index: {}]   ;;  %s7935_s9 = inlined_call_operand.vmem [shape: f32[1,512], index: 9, kind: input, shape index: {}]   ;;  %s7936_s10 = inlined_call_operand.hbm [shape: f32[512,128], index: 10, kind: input, shape index: {}]   ;;  %s7937_s11 = inlined_call_operand.vmem [shape: f32[1,128], index: 11, kind: input, shape index: {}]   ;;  %s7938_s12 = inlined_call_operand.vmem [shape: f32[2,128], index: 12, kind: input, shape index: {}]   ;;  %s7939_s13 = inlined_call_operand.hbm [shape: f32[128,128], index: 13, kind: input, shape index: {}]   ;;  %s7940_s14 = inlined_call_operand.hbm [shape: f32[128,256], index: 14, kind: input, shape index: {}]   ;;  %s7941_s15 = inlined_call_operand.vmem [shape: f32[2,128], index: 15, kind: input, shape index: {}]   ;;  %s7942_s16 = inlined_call_operand.hbm [shape: f32[128,512], index: 16, kind: input, shape index: {}]   ;;  %s7943_s17 = inlined_call_operand.vmem [shape: f32[1,512], index: 17, kind: input, shape index: {}]   ;;  %s7944_s18 = inlined_call_operand.hbm [shape: f32[512,128], index: 18, kind: input, shape index: {}]   ;;  %s7945_s19 = inlined_call_operand.vmem [shape: f32[1,128], index: 19, kind: input, shape index: {}]   ;;  %s7946_s20 = inlined_call_operand.vmem [shape: f32[2,128], index: 20, kind: input, shape index: {}]   ;;  %s7947_s21 = inlined_call_operand.hbm [shape: f32[2,16,128], index: 21, kind: output, shape index: {0}]   ;;  %s7948_s22 = inlined_call_operand.hbm [shape: f32[2,8,128], index: 22, kind: output, shape index: {1}]  }
   0x1   :  { %7968 = sst [smem:[#allocation35_spill]] %s7926_s0 }
   0x2   :  { %7969 = sst [smem:[#allocation36_spill]] %s7927_s1 }
   0x3   :  { %7970 = sst [smem:[#allocation37_spill]] %s7928_s2 }
   0x4   :  { %7971 = sst [smem:[#allocation38_spill]] %s7929_s3 }
   0x5   :  { %7972 = sst [smem:[#allocation39_spill]] %s7930_s4 }
   0x6   :  { %7973 = sst [smem:[#allocation40_spill]] %s7931_s5 }
   0x7   :  { %7974 = sst [smem:[#allocation41_spill]] %s7932_s6 }
   0x8   :  { %7975 = sst [smem:[#allocation42_spill]] %s7933_s7 }
   0x9   :  { %7976 = sst [smem:[#allocation43_spill]] %s7934_s8 }
   0xa   :  { %7977 = sst [smem:[#allocation44_spill]] %s7935_s9 }
   0xb   :  { %7978 = sst [smem:[#allocation45_spill]] %s7936_s10 }
   0xc   :  { %7979 = sst [smem:[#allocation46_spill]] %s7937_s11 }
   0xd   :  { %7980 = sst [smem:[#allocation47_spill]] %s7938_s12 }
   0xe   :  { %7981 = sst [smem:[#allocation48_spill]] %s7939_s13 }
   0xf   :  { %7982 = sst [smem:[#allocation49_spill]] %s7940_s14 }
  0x10   :  { %7983 = sst [smem:[#allocation50_spill]] %s7941_s15 }
  0x11   :  { %7984 = sst [smem:[#allocation51_spill]] %s7942_s16 }
  0x12   :  { %7985 = sst [smem:[#allocation52_spill]] %s7943_s17 }
  0x13   :  { %7986 = sst [smem:[#allocation53_spill]] %s7944_s18 }
  0x14   :  { %7987 = sst [smem:[#allocation54_spill]] %s7945_s19 }
  0x15   :  { %7988 = sst [smem:[#allocation55_spill]] %s7946_s20 }
  0x16   :  { %7989 = sst [smem:[#allocation56_spill]] %s7947_s21 }
  0x17   :  { %7990 = sst [smem:[#allocation57_spill]] %s7948_s22 }
  0x18   :  { %28 = vsyncpa [#allocation3], 0 }
  0x19   :  { %30 = vsyncpa [#allocation3 + $0x1], 0 }
  0x1a   :  { %31 = vsyncpa [#allocation6], 0 }
  0x1b   :  { %33 = vsyncpa [#allocation6 + $0x1], 0 }
  0x1c   :  { %34 = vsyncpa [#allocation9], 0 }
  0x1d   :  { %35 = vsyncpa [#allocation12], 0 }
  0x1e   :  { %36 = vsyncpa [#allocation15], 0 }
  0x1f   :  { %37 = vsyncpa [#allocation18], 0 }
  0x20   :  { %38 = vsyncpa [#allocation21], 0 }
  0x21   :  { %39 = vsyncpa [#allocation4], 0 }
  0x22   :  { %41 = vsyncpa [#allocation4 + $0x1], 0 }
  0x23   :  { %42 = vsyncpa [#allocation24], 0 }
  0x24   :  { %44 = vsyncpa [#allocation24 + $0x1], 0  ;;  %s6983_s3 = smov 0   ;;  %s6985_s28 = smov 0  }
  0x25   :  { %s6987_s29 = smov 0   ;;  %s6989_s30 = smov 0  }
  0x26 LB: > { %s6840_s4 = smov [#allocation7]   ;;  %s7004_s23 = sadd.s32 4294967295, %s6838_s30   ;;  %s6838_s30 = sphi %s6989_s30, %s8048_s30   ;;  %s6834_s29 = sphi %s6987_s29, %s8047_s29   ;;  %s6830_s28 = sphi %s6985_s28, %s8046_s28   ;;  %s6826_s3 = sphi %s6983_s3, %s8045_s3  }
  0x27   : > { %s570_s0 = sshll.u32 %s6840_s4, 4  ;;  %p4956_p0 = scmp.ge.s32.totalorder %s6838_s30, 1  ;;  %s7009_s0 = int_to_ptr.vmem [resolvable:$true] %s570_s0 }
  0x28   : > { %p7961_p1 = scmp.eq.s32.totalorder %s7004_s23, 0  ;;  %p558_p2 = scmp.lt.s32.totalorder %s6838_s30, 3 }
  0x29   : > { %s6841_s5 = smov [#allocation8]   ;;  %s6842_s25 = smov [#allocation11]  }
  0x2a   : > { %p7011_p3 = pnand %p4956_p0, %p558_p2  ;;  %s583_s24 = sshll.u32 %s6841_s5, 4  ;;  %s7024_s24 = int_to_ptr.vmem [resolvable:$true] %s583_s24 }
  0x2b   : > { %s7026_s26 = sshll.u32 %s6842_s25, 4  ;;  %s7993_s4 = sld [smem:[#allocation37_spill]]  ;;  %s613_s26 = int_to_ptr.vmem [resolvable:$true] %s7026_s26 }
  0x2c   : > { %s7991_s1 = scalar_select %p7011_p3, 1, 0 }
  0x2d   : > { %p6126_p5 = pneg %p7011_p3 }
  0x2f   : > { %p7020_p6 = pnand %p6126_p5, %p7961_p1 }
  0x31   : > { %s6372_s22 = scalar_lea.hbm %s7993_s4, 2048  ;;  %p7036_p8 = pneg %p7020_p6 }
  0x32   : > { %p6373_p7 = scmp.ne.s32.totalorder %s7993_s4, %s6372_s22  ;;  %p6379_p11 = scmp.lt.u32.totalorder %s6372_s22, %s7993_s4 }
  0x34   : > { %p6375_p9 = pnand %p7036_p8, %p6373_p7 }
  0x36   : > { %p6376_p10 = pneg %p6375_p9 }
  0x38   : > { %p6381_p12 = pnand %p6379_p11, %p6376_p10 }
  0x3a   : > { %6384 = shalt.err (!%p6381_p12)
}
  0x3b   : > { %s6385_s20 = scalar_lea.vmem %s7009_s0, 2048  ;;  %p6393_p5 = scmp.lt.s32.totalorder %s7009_s0, %s7009_s0 }
  0x3c   : > { %p6386_p13 = scmp.ne.s32.totalorder %s7009_s0, %s6385_s20  ;;  %p6394_p4 = scmp.lt.s32.totalorder %s6385_s20, %s6385_s20 }
  0x3e   : > { %p6388_p0 = pnand %p6386_p13, %p7036_p8  ;;  %p6395_p7 = por %p6394_p4, %p6393_p5 }
  0x40   : > { %p6389_p2 = pneg %p6388_p0 }
  0x42   : > { %p6396_p9 = pnand %p6395_p7, %p6389_p2 }
  0x44   : > { %6399 = shalt.err (!%p6396_p9)
}
  0x45   : > { %s7957_s21 = smov 128   ;;  %s7959_s19 = smov 8  }
  0x46   : > { %6129 = dma.hbm_to_vmem [thread:$0]  (!%p7020_p6), %s7993_s4, 2048, %s7009_s0, [#allocation6], %s7957_s21, %s7957_s21, %s7959_s19  }
  0x47   : > { %s7995_s17 = sld [smem:[#allocation38_spill]] }
  0x4d   : > { %s6400_s20 = scalar_lea.hbm %s7995_s17, 4096 }
  0x4e   : > { %p6401_p4 = scmp.ne.s32.totalorder %s7995_s17, %s6400_s20  ;;  %p6407_p12 = scmp.lt.u32.totalorder %s6400_s20, %s7995_s17 }
  0x50   : > { %p6403_p10 = pnand %p6401_p4, %p7036_p8 }
  0x52   : > { %p6404_p11 = pneg %p6403_p10 }
  0x54   : > { %p6409_p13 = pnand %p6407_p12, %p6404_p11 }
  0x56   : > { %6412 = shalt.err (!%p6409_p13)
}
  0x57   : > { %s6413_s0 = scalar_lea.vmem %s7024_s24, 4096  ;;  %p6421_p7 = scmp.lt.s32.totalorder %s7024_s24, %s7024_s24 }
  0x58   : > { %p6414_p0 = scmp.ne.s32.totalorder %s7024_s24, %s6413_s0  ;;  %p6422_p9 = scmp.lt.s32.totalorder %s6413_s0, %s6413_s0 }
  0x5a   : > { %p6416_p2 = pnand %p6414_p0, %p7036_p8  ;;  %p6423_p4 = por %p6422_p9, %p6421_p7 }
  0x5c   : > { %p6417_p5 = pneg %p6416_p2 }
  0x5e   : > { %p6424_p10 = pnand %p6423_p4, %p6417_p5 }
  0x60   : > { %6427 = shalt.err (!%p6424_p10)
}
  0x61   : > { %s6845_s12 = smov 256   ;;  %s6846_s9 = smov 16  }
  0x62   : > { %6132 = dma.hbm_to_vmem [thread:$0]  (!%p7020_p6), %s7995_s17, 4096, %s7024_s24, [#allocation9], %s6845_s12, %s6845_s12, %s6846_s9  }
  0x63   : > { %s7996_s27 = sld [smem:[#allocation41_spill]] }
  0x69   : > { %s6428_s25 = scalar_lea.hbm %s7996_s27, 4096 }
  0x6a   : > { %p6429_p11 = scmp.ne.s32.totalorder %s7996_s27, %s6428_s25  ;;  %p6435_p0 = scmp.lt.u32.totalorder %s6428_s25, %s7996_s27 }
  0x6c   : > { %p6431_p12 = pnand %p6429_p11, %p7036_p8 }
  0x6e   : > { %p6432_p13 = pneg %p6431_p12 }
  0x70   : > { %p6437_p2 = pnand %p6435_p0, %p6432_p13 }
  0x72   : > { %6440 = shalt.err (!%p6437_p2)
}
  0x73   : > { %s6441_s11 = scalar_lea.vmem %s613_s26, 4096  ;;  %p6449_p4 = scmp.lt.s32.totalorder %s613_s26, %s613_s26 }
  0x74   : > { %p6442_p5 = scmp.ne.s32.totalorder %s613_s26, %s6441_s11  ;;  %p6450_p10 = scmp.lt.s32.totalorder %s6441_s11, %s6441_s11 }
  0x76   : > { %p6444_p7 = pnand %p6442_p5, %p7036_p8  ;;  %p6451_p1 = por %p6450_p10, %p6449_p4 }
  0x78   : > { %p6445_p9 = pneg %p6444_p7 }
  0x7a   : > { %p6452_p3 = pnand %p6451_p1, %p6445_p9 }
  0x7c   : > { %6455 = shalt.err (!%p6452_p3)
}
  0x7d   : > { %6138 = dma.hbm_to_vmem [thread:$0]  (!%p7020_p6), %s7996_s27, 4096, %s613_s26, [#allocation12], %s6845_s12, %s6845_s12, %s6846_s9  }
  0x7e   : > { %s6847_s19 = smov [#allocation14]   ;;  %s6848_s22 = smov [#allocation17]  }
  0x7f   : > { %s644_s15 = sshll.u32 %s6847_s19, 4  ;;  %s676_s2 = sshll.u32 %s6848_s22, 4  ;;  %s645_s15 = int_to_ptr.vmem [resolvable:$true] %s644_s15  ;;  %s677_s2 = int_to_ptr.vmem [resolvable:$true] %s676_s2 }
  0x80   : > { %s7997_s10 = sld [smem:[#allocation45_spill]] }
  0x86   : > { %s6456_s0 = scalar_lea.hbm %s7997_s10, 8192 }
  0x87   : > { %p6457_p1 = scmp.ne.s32.totalorder %s7997_s10, %s6456_s0  ;;  %p6463_p12 = scmp.lt.u32.totalorder %s6456_s0, %s7997_s10 }
  0x89   : > { %p6459_p3 = pnand %p6457_p1, %p7036_p8 }
  0x8b   : > { %p6460_p11 = pneg %p6459_p3 }
  0x8d   : > { %p6465_p13 = pnand %p6463_p12, %p6460_p11 }
  0x8f   : > { %6468 = shalt.err (!%p6465_p13)
}
  0x90   : > { %s6469_s26 = scalar_lea.vmem %s645_s15, 8192  ;;  %p6477_p7 = scmp.lt.s32.totalorder %s645_s15, %s645_s15 }
  0x91   : > { %p6470_p0 = scmp.ne.s32.totalorder %s645_s15, %s6469_s26  ;;  %p6478_p9 = scmp.lt.s32.totalorder %s6469_s26, %s6469_s26 }
  0x93   : > { %p6472_p2 = pnand %p6470_p0, %p7036_p8  ;;  %p6479_p4 = por %p6478_p9, %p6477_p7 }
  0x95   : > { %p6473_p5 = pneg %p6472_p2 }
  0x97   : > { %p6480_p10 = pnand %p6479_p4, %p6473_p5 }
  0x99   : > { %6483 = shalt.err (!%p6480_p10)
}
  0x9a   : > { %s7998_s4 = smov 8   ;;  %s7999_s21 = smov 128  }
  0x9b   : > { %6144 = dma.hbm_to_vmem [thread:$0]  (!%p7020_p6), %s7997_s10, 8192, %s645_s15, [#allocation15], %s7999_s21, %s7999_s21, %s7998_s4  }
  0x9c   : > { %s8000_s14 = sld [smem:[#allocation49_spill]] }
  0xa2   : > { %s6484_s20 = scalar_lea.hbm %s8000_s14, 4096 }
  0xa3   : > { %p6485_p1 = scmp.ne.s32.totalorder %s8000_s14, %s6484_s20  ;;  %p6491_p12 = scmp.lt.u32.totalorder %s6484_s20, %s8000_s14 }
  0xa5   : > { %p6487_p3 = pnand %p6485_p1, %p7036_p8 }
  0xa7   : > { %p6488_p11 = pneg %p6487_p3 }
  0xa9   : > { %p6493_p13 = pnand %p6491_p12, %p6488_p11 }
  0xab   : > { %6496 = shalt.err (!%p6493_p13)
}
  0xac   : > { %s6497_s17 = scalar_lea.vmem %s677_s2, 4096  ;;  %p6505_p7 = scmp.lt.s32.totalorder %s677_s2, %s677_s2 }
  0xad   : > { %p6498_p0 = scmp.ne.s32.totalorder %s677_s2, %s6497_s17  ;;  %p6506_p9 = scmp.lt.s32.totalorder %s6497_s17, %s6497_s17 }
  0xaf   : > { %p6500_p2 = pnand %p6498_p0, %p7036_p8  ;;  %p6507_p4 = por %p6506_p9, %p6505_p7 }
  0xb1   : > { %p6501_p5 = pneg %p6500_p2 }
  0xb3   : > { %p6508_p10 = pnand %p6507_p4, %p6501_p5 }
  0xb5   : > { %6511 = shalt.err (!%p6508_p10)
}
  0xb6   : > { %6150 = dma.hbm_to_vmem [thread:$0]  (!%p7020_p6), %s8000_s14, 4096, %s677_s2, [#allocation18], %s6845_s12, %s6845_s12, %s6846_s9  }
  0xb7   : > { %s6849_s22 = smov [#allocation10]   ;;  %s6850_s20 = smov [#allocation13]  }
  0xb8   : > { %s599_s25 = sshll.u32 %s6849_s22, 4  ;;  %s628_s0 = sshll.u32 %s6850_s20, 4  ;;  %s600_s25 = int_to_ptr.vmem [resolvable:$true] %s599_s25  ;;  %s629_s0 = int_to_ptr.vmem [resolvable:$true] %s628_s0 }
  0xb9   : > { %s8001_s26 = sld [smem:[#allocation40_spill]] }
  0xbf   : > { %s6512_s17 = scalar_lea.hbm %s8001_s26, 2048 }
  0xc0   : > { %p6513_p1 = scmp.ne.s32.totalorder %s8001_s26, %s6512_s17  ;;  %p6519_p12 = scmp.lt.u32.totalorder %s6512_s17, %s8001_s26 }
  0xc2   : > { %p6515_p3 = pnand %p6513_p1, %p7036_p8 }
  0xc4   : > { %p6516_p11 = pneg %p6515_p3 }
  0xc6   : > { %p6521_p13 = pnand %p6519_p12, %p6516_p11 }
  0xc8   : > { %6524 = shalt.err (!%p6521_p13)
}
  0xc9   : > { %s6525_s12 = scalar_lea.vmem %s600_s25, 2048  ;;  %p6533_p7 = scmp.lt.s32.totalorder %s600_s25, %s600_s25 }
  0xca   : > { %p6526_p0 = scmp.ne.s32.totalorder %s600_s25, %s6525_s12  ;;  %p6534_p9 = scmp.lt.s32.totalorder %s6525_s12, %s6525_s12 }
  0xcc   : > { %p6528_p2 = pnand %p6526_p0, %p7036_p8  ;;  %p6535_p4 = por %p6534_p9, %p6533_p7 }
  0xce   : > { %p6529_p5 = pneg %p6528_p2 }
  0xd0   : > { %p6536_p10 = pnand %p6535_p4, %p6529_p5 }
  0xd2   : > { %6539 = shalt.err (!%p6536_p10)
}
  0xd3   : > { %6135 = dma.hbm_to_vmem [thread:$0]  (!%p7020_p6), %s8001_s26, 2048, %s600_s25, [#allocation9], %s7999_s21, %s7999_s21, %s7998_s4  }
  0xd4   : > { %s8002_s8 = sld [smem:[#allocation43_spill]] }
  0xda   : > { %s6540_s2 = scalar_lea.hbm %s8002_s8, 8192 }
  0xdb   : > { %p6541_p1 = scmp.ne.s32.totalorder %s8002_s8, %s6540_s2  ;;  %p6547_p12 = scmp.lt.u32.totalorder %s6540_s2, %s8002_s8 }
  0xdd   : > { %p6543_p3 = pnand %p6541_p1, %p7036_p8 }
  0xdf   : > { %p6544_p11 = pneg %p6543_p3 }
  0xe1   : > { %p6549_p13 = pnand %p6547_p12, %p6544_p11 }
  0xe3   : > { %6552 = shalt.err (!%p6549_p13)
}
  0xe4   : > { %s6553_s24 = scalar_lea.vmem %s629_s0, 8192  ;;  %p6561_p7 = scmp.lt.s32.totalorder %s629_s0, %s629_s0 }
  0xe5   : > { %p6554_p0 = scmp.ne.s32.totalorder %s629_s0, %s6553_s24  ;;  %p6562_p9 = scmp.lt.s32.totalorder %s6553_s24, %s6553_s24 }
  0xe7   : > { %p6556_p2 = pnand %p6554_p0, %p7036_p8  ;;  %p6563_p4 = por %p6562_p9, %p6561_p7 }
  0xe9   : > { %p6557_p5 = pneg %p6556_p2 }
  0xeb   : > { %p6564_p10 = pnand %p6563_p4, %p6557_p5 }
  0xed   : > { %6567 = shalt.err (!%p6564_p10)
}
  0xee   : > { %s6851_s25 = smov 512   ;;  %s6852_s17 = smov 32  }
  0xef   : > { %6141 = dma.hbm_to_vmem [thread:$0]  (!%p7020_p6), %s8002_s8, 8192, %s629_s0, [#allocation12], %s6851_s25, %s6851_s25, %s6852_s17  }
  0xf0   : > { %s6853_s7 = smov [#allocation16]   ;;  %s6854_s9 = smov [#allocation19]  }
  0xf1   : > { %s663_s10 = sshll.u32 %s6853_s7, 4  ;;  %s692_s27 = sshll.u32 %s6854_s9, 4  ;;  %s664_s10 = int_to_ptr.vmem [resolvable:$true] %s663_s10  ;;  %s693_s27 = int_to_ptr.vmem [resolvable:$true] %s692_s27 }
  0xf2   : > { %s8003_s13 = sld [smem:[#allocation48_spill]] }
  0xf8   : > { %s6568_s22 = scalar_lea.hbm %s8003_s13, 2048 }
  0xf9   : > { %p6569_p1 = scmp.ne.s32.totalorder %s8003_s13, %s6568_s22  ;;  %p6575_p12 = scmp.lt.u32.totalorder %s6568_s22, %s8003_s13 }
  0xfb   : > { %p6571_p3 = pnand %p6569_p1, %p7036_p8 }
  0xfd   : > { %p6572_p11 = pneg %p6571_p3 }
  0xff   : > { %p6577_p13 = pnand %p6575_p12, %p6572_p11 }
 0x101   : > { %6580 = shalt.err (!%p6577_p13)
}
 0x102   : > { %s6581_s0 = scalar_lea.vmem %s664_s10, 2048  ;;  %p6589_p7 = scmp.lt.s32.totalorder %s664_s10, %s664_s10 }
 0x103   : > { %p6582_p0 = scmp.ne.s32.totalorder %s664_s10, %s6581_s0  ;;  %p6590_p9 = scmp.lt.s32.totalorder %s6581_s0, %s6581_s0 }
 0x105   : > { %p6584_p2 = pnand %p6582_p0, %p7036_p8  ;;  %p6591_p4 = por %p6590_p9, %p6589_p7 }
 0x107   : > { %p6585_p5 = pneg %p6584_p2 }
 0x109   : > { %p6592_p10 = pnand %p6591_p4, %p6585_p5 }
 0x10b   : > { %6595 = shalt.err (!%p6592_p10)
}
 0x10c   : > { %6147 = dma.hbm_to_vmem [thread:$0]  (!%p7020_p6), %s8003_s13, 2048, %s664_s10, [#allocation15], %s7999_s21, %s7999_s21, %s7998_s4  }
 0x10d   : > { %s8004_s16 = sld [smem:[#allocation51_spill]] }
 0x113   : > { %s6596_s9 = scalar_lea.hbm %s8004_s16, 8192 }
 0x114   : > { %p6597_p1 = scmp.ne.s32.totalorder %s8004_s16, %s6596_s9  ;;  %p6603_p12 = scmp.lt.u32.totalorder %s6596_s9, %s8004_s16 }
 0x116   : > { %p6599_p3 = pnand %p6597_p1, %p7036_p8 }
 0x118   : > { %p6600_p11 = pneg %p6599_p3 }
 0x11a   : > { %p6605_p13 = pnand %p6603_p12, %p6600_p11 }
 0x11c   : > { %6608 = shalt.err (!%p6605_p13)
}
 0x11d   : > { %s6609_s11 = scalar_lea.vmem %s693_s27, 8192  ;;  %p6617_p7 = scmp.lt.s32.totalorder %s693_s27, %s693_s27 }
 0x11e   : > { %p6610_p0 = scmp.ne.s32.totalorder %s693_s27, %s6609_s11  ;;  %p6618_p9 = scmp.lt.s32.totalorder %s6609_s11, %s6609_s11 }
 0x120   : > { %p6612_p2 = pnand %p6610_p0, %p7036_p8  ;;  %p6619_p4 = por %p6618_p9, %p6617_p7 }
 0x122   : > { %p6613_p5 = pneg %p6612_p2 }
 0x124   : > { %p6620_p10 = pnand %p6619_p4, %p6613_p5 }
 0x126   : > { %6623 = shalt.err (!%p6620_p10)
}
 0x127   : > { %6153 = dma.hbm_to_vmem [thread:$0]  (!%p7020_p6), %s8004_s16, 8192, %s693_s27, [#allocation18], %s6851_s25, %s6851_s25, %s6852_s17  }
 0x128   : > { %s6855_s0 = smov [#allocation20]   ;;  %s8005_s18 = sld [smem:[#allocation53_spill]] }
 0x129   : > { %s708_s14 = sshll.u32 %s6855_s0, 4  ;;  %s709_s14 = int_to_ptr.vmem [resolvable:$true] %s708_s14 }
 0x12e   : > { %s6624_s7 = scalar_lea.hbm %s8005_s18, 8192 }
 0x12f   : > { %p6625_p1 = scmp.ne.s32.totalorder %s8005_s18, %s6624_s7  ;;  %p6631_p12 = scmp.lt.u32.totalorder %s6624_s7, %s8005_s18 }
 0x131   : > { %p6627_p3 = pnand %p6625_p1, %p7036_p8 }
 0x133   : > { %p6628_p11 = pneg %p6627_p3 }
 0x135   : > { %p6633_p13 = pnand %p6631_p12, %p6628_p11 }
 0x137   : > { %6636 = shalt.err (!%p6633_p13)
}
 0x138   : > { %s6637_s25 = scalar_lea.vmem %s709_s14, 8192  ;;  %p6645_p7 = scmp.lt.s32.totalorder %s709_s14, %s709_s14 }
 0x139   : > { %p6638_p0 = scmp.ne.s32.totalorder %s709_s14, %s6637_s25  ;;  %p6646_p9 = scmp.lt.s32.totalorder %s6637_s25, %s6637_s25 }
 0x13b   : > { %p6640_p2 = pnand %p6638_p0, %p7036_p8  ;;  %p6647_p4 = por %p6646_p9, %p6645_p7 }
 0x13d   : > { %p6641_p5 = pneg %p6640_p2 }
 0x13f   : > { %p6648_p10 = pnand %p6647_p4, %p6641_p5 }
 0x141   : > { %6651 = shalt.err (!%p6648_p10)
}
 0x142   : > { %6156 = dma.hbm_to_vmem [thread:$0]  (!%p7020_p6), %s8005_s18, 8192, %s709_s14, [#allocation21], %s7999_s21, %s7999_s21, %s7998_s4  }
 0x143   : > { %s4955_s6 = sadd.s32 4294967294, %s6838_s30   ;;  %s7257_s5 = sadd.s32 1, %s6838_s30  }
 0x144   : > { %s54_s20 = ssub.s32 %s6838_s30, %s7257_s5  ;;  %s57_s11 = sadd.s32 1, %s6834_s29 }
 0x145   : > { %p55_p8 = scmp.eq.s32.totalorder %s54_s20, 0  ;;  %p64_p1 = scmp.ne.s32.totalorder %s6834_s29, %s6830_s28 }
 0x146   : > { %p65_p3 = scmp.eq.s32.totalorder %s6838_s30, 0  ;;  %p70_p11 = scmp.ne.s32.totalorder %s6830_s28, %s6826_s3 }
 0x147   : > { %s7268_s10 = scalar_select %p55_p8, %s6834_s29, %s57_s11  }
 0x148   : > { %p7270_p12 = por %p65_p3, %p64_p1  ;;  %p8007_p13 = scmp.eq.s32.totalorder %s7004_s23, 0 }
 0x149   : > { %p519_p0 = scmp.eq.s32.totalorder %s7004_s23, 1  ;;  %p525_p2 = scmp.eq.s32.totalorder %s4955_s6, 1 }
 0x14a   : > { %p7276_p6 = por %p8007_p13, %p70_p11  ;;  %p6181_p5 = scmp.lt.s32.totalorder %s6838_s30, 2 }
 0x14b   : > { %s7283_s14 = sand.u32 1, %s6834_s29   ;;  %p7285_p7 = por %p519_p0, %p64_p1 }
 0x14c   : > { %s8008_s0 = scalar_select %p7276_p6, 1, 0 }
 0x14d   : > { %s8009_s15 = scalar_select %p7285_p7, 1, 0 }
 0x14e   : > { %p7289_p9 = por %p525_p2, %p70_p11  ;;  %s4968_s7 = sshll.u32 %s7283_s14, 4 }
 0x14f   : > { %s5049_s9 = sshll.u32 %s6838_s30, 8  ;;  %s8011_s22 = sld [smem:[#allocation35_spill]] }
 0x150   : > { %s8010_s12 = scalar_select %p7289_p9, 1, 0 }
 0x151   : > { %s732_s17 = scalar_lea.vmem [#allocation2], %s4968_s7  ;;  %p7304_p4 = pnand %p6181_p5, %p7270_p12 }
 0x152   : > { %s739_s27 = sshll.u32 %s732_s17, 4  ;;  %s4971_s11 = sshll.u32 %s7283_s14, 3  ;;  %s7300_s27 = int_to_ptr.vmem [resolvable:$true] %s739_s27 }
 0x153   : > { %s729_s2 = scalar_lea.sflag [#allocation3], %s7283_s14  ;;  %p6654_p8 = pneg %p7304_p4 }
 0x155   : > { %s7298_s25 = scalar_lea.hbm %s8011_s22, %s5049_s9  ;;  %s6657_s24 = scalar_lea.hbm %s8011_s22, 512 }
 0x156   : > { %s6652_s9 = scalar_lea.hbm %s7298_s25, 256  ;;  %p6658_p11 = scmp.lt.u32.totalorder %s7298_s25, %s8011_s22 }
 0x157   : > { %p6653_p10 = scmp.ne.s32.totalorder %s7298_s25, %s6652_s9  ;;  %p6659_p12 = scmp.lt.u32.totalorder %s6657_s24, %s6652_s9 }
 0x158   : > { %p6661_p0 = scmp.lt.u32.totalorder %s6652_s9, %s7298_s25 }
 0x159   : > { %p6655_p1 = pnand %p6654_p8, %p6653_p10  ;;  %p6660_p13 = por %p6659_p12, %p6658_p11 }
 0x15b   : > { %p6656_p3 = pneg %p6655_p1  ;;  %p6662_p2 = por %p6661_p0, %p6660_p13 }
 0x15d   : > { %p6663_p5 = pnand %p6662_p2, %p6656_p3 }
 0x15f   : > { %6666 = shalt.err (!%p6663_p5)
}
 0x160   : > { %s6667_s20 = scalar_lea.vmem %s7300_s27, 256  ;;  %s6856_s7 = smov [#allocation2]  }
 0x161   : > { %p6668_p10 = scmp.ne.s32.totalorder %s7300_s27, %s6667_s20  ;;  %s6672_s19 = sshll.u32 %s6856_s7, 4  ;;  %s6673_s19 = int_to_ptr.vmem [resolvable:$false] %s6672_s19 }
 0x162   : > { %s6674_s8 = scalar_lea.vmem %s6673_s19, 512  ;;  %p6675_p7 = scmp.lt.s32.totalorder %s7300_s27, %s6673_s19 }
 0x163   : > { %p6670_p1 = pnand %p6668_p10, %p6654_p8  ;;  %p6676_p11 = scmp.lt.s32.totalorder %s6674_s8, %s6667_s20 }
 0x165   : > { %p6671_p9 = pneg %p6670_p1  ;;  %p6677_p12 = por %p6676_p11, %p6675_p7 }
 0x167   : > { %p6678_p13 = pnand %p6677_p12, %p6671_p9 }
 0x169   : > { %6681 = shalt.err (!%p6678_p13)
}
 0x16a   : > { %6160 = dma.hbm_to_vmem [thread:$0]  (!%p7304_p4), %s7298_s25, 256, %s7300_s27, %s729_s2, %s7999_s21, %s7999_s21, %s7998_s4  }
 0x16b   : > { %s4972_s9 = sshll.u32 %s6838_s30, 7  ;;  %s8013_s17 = sld [smem:[#allocation36_spill]] }
 0x16c   : > { %s753_s19 = scalar_lea.vmem [#allocation5], %s4971_s11  ;;  %s8014_s13 = sand.u32 1, %s6838_s30  }
 0x16d   : > { %s760_s8 = sshll.u32 %s753_s19, 4  ;;  %s750_s16 = scalar_lea.sflag [#allocation6], %s8014_s13  ;;  %s761_s8 = int_to_ptr.vmem [resolvable:$true] %s760_s8 }
 0x171   : > { %s7345_s7 = scalar_lea.hbm %s8013_s17, %s4972_s9  ;;  %s6687_s25 = scalar_lea.hbm %s8013_s17, 256 }
 0x172   : > { %s6682_s18 = scalar_lea.hbm %s7345_s7, 128  ;;  %p6688_p0 = scmp.lt.u32.totalorder %s7345_s7, %s8013_s17 }
 0x173   : > { %p6683_p7 = scmp.ne.s32.totalorder %s7345_s7, %s6682_s18  ;;  %p6689_p2 = scmp.lt.u32.totalorder %s6687_s25, %s6682_s18 }
 0x174   : > { %p6691_p10 = scmp.lt.u32.totalorder %s6682_s18, %s7345_s7 }
 0x175   : > { %p6685_p9 = pnand %p6683_p7, %p6654_p8  ;;  %p6690_p5 = por %p6689_p2, %p6688_p0 }
 0x177   : > { %p6686_p3 = pneg %p6685_p9  ;;  %p6692_p1 = por %p6691_p10, %p6690_p5 }
 0x179   : > { %p6693_p11 = pnand %p6692_p1, %p6686_p3 }
 0x17b   : > { %6696 = shalt.err (!%p6693_p11)
}
 0x17c   : > { %s6697_s13 = scalar_lea.vmem %s761_s8, 128  ;;  %s6857_s11 = smov [#allocation5]  }
 0x17d   : > { %p6698_p12 = scmp.ne.s32.totalorder %s761_s8, %s6697_s13  ;;  %s6702_s2 = sshll.u32 %s6857_s11, 4  ;;  %s6703_s2 = int_to_ptr.vmem [resolvable:$false] %s6702_s2 }
 0x17e   : > { %s6704_s9 = scalar_lea.vmem %s6703_s2, 256  ;;  %p6705_p9 = scmp.lt.s32.totalorder %s761_s8, %s6703_s2 }
 0x17f   : > { %p6700_p13 = pnand %p6698_p12, %p6654_p8  ;;  %p6706_p6 = scmp.lt.s32.totalorder %s6704_s9, %s6697_s13 }
 0x181   : > { %p6701_p7 = pneg %p6700_p13  ;;  %p6707_p0 = por %p6706_p6, %p6705_p9 }
 0x183   : > { %p6708_p2 = pnand %p6707_p0, %p6701_p7 }
 0x185   : > { %6711 = shalt.err (!%p6708_p2)
}
 0x186   : > { %6163 = dma.hbm_to_vmem [thread:$0]  (!%p7304_p4), %s7345_s7, 128, %s761_s8, %s750_s16  }
 0x187   : > { %p8015_p3 = scmp.ne.s32.totalorder %s7991_s1, 0 }
 0x188   : > { %s7373_s18 = sand.u32 (!%p8015_p3), 1, %s6830_s28   ;;  %p8016_p6 = scmp.ne.s32.totalorder (!%p8015_p3), %s8008_s0, 0 }
 0x189   : > { %769 = sbr.rel (%p8015_p3) target bundleno = 7104 (0x1bc0), region = 104  ;;  %s4974_s24 = sshll.u32 (!%p8015_p3), %s7373_s18, 4 }
 0x18a   : > { %s772_s20 = scalar_lea.sflag (!%p8015_p3), [#allocation3], %s7373_s18  ;;  %s7379_s19 = scalar_lea.vmem (!%p8015_p3), [#allocation2], %s4974_s24 }
 0x190   : > { %6785 = dma.done.wait (%p8016_p6), %s772_s20, 256  }
 0x191   : > { %6787 = vsyncadd (%p8016_p6), %s772_s20, 4294967040  ;;  %s780_s16 = sand.u32 1, %s7004_s23   ;;  %s4975_s1 = sshll.u32 %s7373_s18, 3 }
 0x192   : > { %s781_s6 = scalar_lea.sflag [#allocation6], %s780_s16  ;;  %s7389_s7 = scalar_lea.vmem [#allocation5], %s4975_s1 }
 0x193   : > { %6789 = dma.done.wait (%p8016_p6), %s781_s6, 128  }
 0x194   : > { %6791 = vsyncadd (%p8016_p6), %s781_s6, 4294967168  ;;  %p8017_p4 = scmp.eq.s32.totalorder %s7004_s23, 0 }
 0x196   : > { %6793 = dma.done.wait (%p8017_p4), [#allocation6], 2048   ;;  %p8018_p8 = pmov %p8017_p4 }
 0x197   : > { %p8019_p5 = pmov %p8017_p4 }
 0x198   : > { %6795 = vsyncadd (%p8018_p8), [#allocation6], 4294965248 }
 0x199   : > { %6797 = dma.done.wait (%p8019_p5), [#allocation9], 6144   ;;  %p8020_p10 = pmov %p8017_p4 }
 0x19a   : > { %p8021_p1 = pmov %p8017_p4 }
 0x19b   : > { %6799 = vsyncadd (%p8020_p10), [#allocation9], 4294961152 }
 0x19c   : > { %6801 = dma.done.wait (%p8021_p1), [#allocation12], 12288   ;;  %p8022_p11 = pmov %p8021_p1 }
 0x19d   : > { %p8023_p12 = pmov %p8021_p1 }
 0x19e   : > { %6803 = vsyncadd (%p8022_p11), [#allocation12], 4294955008 }
 0x19f   : > { %6805 = dma.done.wait (%p8023_p12), [#allocation15], 10240   ;;  %p8024_p13 = pmov %p8021_p1 }
 0x1a0   : > { %p8025_p7 = pmov %p8021_p1 }
 0x1a1   : > { %6807 = vsyncadd (%p8024_p13), [#allocation15], 4294957056 }
 0x1a2   : > { %6809 = dma.done.wait (%p8025_p7), [#allocation18], 12288   ;;  %p8026_p9 = pmov %p8021_p1 }
 0x1a3   : > { %p8027_p0 = pmov %p8021_p1 }
 0x1a4   : > { %6811 = vsyncadd (%p8026_p9), [#allocation18], 4294955008 }
 0x1a5   : > { %6813 = dma.done.wait (%p8027_p0), [#allocation21], 8192   ;;  %p8028_p2 = pmov %p8027_p0 }
 0x1a6   : > { %v6858_v0 = vmov 0.0|0.0   ;;  %v6859_v1 = vmov 0.0   ;;  %vm6860_vm0 = vmmov 0   ;;  %v985_v2 = vld [vmem:[#allocation8 + $0x8] sm:$0xff]  ;;  %v987_v3 = vld [vmem:[#allocation8 + $0x18] sm:$0xff]  ;;  %v984_v4 = vld [vmem:[#allocation8] sm:$0xff] }
 0x1a7   : > { %6815 = vsyncadd (%p8028_p2), [#allocation21], 4294959104  ;;  %5578 = vmatprep.subr.bf16.mxu0 %v6858_v0  ;;  %1080 = vmatprep.mubr.f32.mxu1 %v6859_v1  ;;  %v5602_v5 = vpack.c.bf16 %v987_v3, %v985_v2  ;;  %v986_v6 = vld [vmem:[#allocation8 + $0x10] sm:$0xff]  ;;  %v898_v7 = vld [vmem:[#allocation7] sm:$0xff]  ;;  %vm1092_vm1 = vcmask 261120   ;;  %s6861_s0 = smov 64  }
 0x1a8   : > { %5353 = vmatprep.mubr.msk.f32.mxu0 %vm6860_vm0, %v6859_v1  ;;  %v899_v8 = vld [vmem:[#allocation7 + $0x8] sm:$0xff]  ;;  %v5604_v9 = vpack.c.bf16 %v986_v6, %v984_v4  ;;  %v991_v12 = vld [vmem:[#allocation8 + $0x38] sm:$0xff]  ;;  %v988_v13 = vld [vmem:[#allocation8 + $0x20] sm:$0xff]  ;;  %s6862_s8 = smov 96   ;;  %s6863_s4 = smov 32   ;;  %vm1170_vm3 = vcmask 64512  }
 0x1a9   : > { %v5579_v10 = vpack.c.bf16 %v899_v8, %v898_v7  ;;  %v989_v11 = vld [vmem:[#allocation8 + $0x28] sm:$0xff]  ;;  %5603 = vmatprep.subr.bf16.mxu1 %v5602_v5  ;;  %v990_v15 = vld [vmem:[#allocation8 + $0x30] sm:$0xff]  ;;  %v901_v17 = vld [vmem:[#allocation7 + $0x18] sm:$0xff]  ;;  %vm2082_vm5 = vcmask 130048   ;;  %vm1767_vm6 = vcmask 523264   ;;  %vm1769_vm7 = vcmask 785408  }
 0x1aa   : > { %v5606_v14 = vpack.c.bf16 %v991_v12, %v989_v11  ;;  %v900_v16 = vld [vmem:[#allocation7 + $0x10] sm:$0xff]  ;;  %5605 = vmatpush1.bf16.msra.mxu1 %v5604_v9  ;;  %v5608_v18 = vpack.c.bf16 %v990_v15, %v988_v13  ;;  %v993_v20 = vld [vmem:[#allocation8 + $0x48] sm:$0xff]  ;;  %v995_v21 = vld [vmem:[#allocation8 + $0x58] sm:$0xff]  ;;  %s8031_s14 = sld [smem:[#allocation42_spill]]  ;;  %s8032_s11 = sld [smem:[#allocation44_spill]] }
 0x1ab   : > { %5580 = vmatpush3.bf16.msra.mxu0 %v5579_v10  ;;  %v5582_v19 = vpack.c.bf16 %v901_v17, %v900_v16  ;;  %v992_v22 = vld [vmem:[#allocation8 + $0x40] sm:$0xff]  ;;  %v5610_v23 = vpack.c.bf16 %v995_v21, %v993_v20  ;;  %v994_v24 = vld [vmem:[#allocation8 + $0x50] sm:$0xff]  ;;  %v903_v26 = vld [vmem:[#allocation7 + $0x28] sm:$0xff]  ;;  %s8033_s20 = sld [smem:[#allocation46_spill]]  ;;  %s8034_s6 = sld [smem:[#allocation47_spill]] }
 0x1ac   : > { %5607 = vmatprep.subr.bf16.mxu1 %v5606_v14  ;;  %5581 = vmatprep.subr.bf16.mxu0 %v6858_v0  ;;  %v902_v25 = vld [vmem:[#allocation7 + $0x20] sm:$0xff]  ;;  %v997_v27 = vld [vmem:[#allocation8 + $0x68] sm:$0xff]  ;;  %v999_v28 = vld [vmem:[#allocation8 + $0x78] sm:$0xff]  ;;  %v5612_v29 = vpack.c.bf16 %v994_v24, %v992_v22  ;;  %s8035_s25 = sld [smem:[#allocation39_spill]]  ;;  %s8037_s13 = sld [smem:[#allocation52_spill]] }
 0x1ad   : > { %v5585_v30 = vpack.c.bf16 %v903_v26, %v902_v25  ;;  %v996_v31 = vld [vmem:[#allocation8 + $0x60] sm:$0xff]  ;;  %v5614_v32 = vpack.c.bf16 %v999_v28, %v997_v27  ;;  %v998_v33 = vld [vmem:[#allocation8 + $0x70] sm:$0xff]  ;;  %v905_v35 = vld [vmem:[#allocation7 + $0x38] sm:$0xff]  ;;  %s8038_s9 = sld [smem:[#allocation54_spill]]  ;;  %p8040_p6 = scmp.ne.s32.totalorder %s8009_s15, 0 }
 0x1ae   : > { %5609 = vmatpush1.bf16.msra.mxu1 %v5608_v18  ;;  %v904_v34 = vld [vmem:[#allocation7 + $0x30] sm:$0xff]  ;;  %v1001_v36 = vld [vmem:[#allocation8 + $0x88] sm:$0xff]  ;;  %v1003_v37 = vld [vmem:[#allocation8 + $0x98] sm:$0xff]  ;;  %v5616_v38 = vpack.c.bf16 %v998_v33, %v996_v31 }
 0x1af   : > { %5583 = vmatpush3.bf16.msra.mxu0 %v5582_v19  ;;  %5611 = vmatprep.subr.bf16.mxu1 %v5610_v23  ;;  %v5588_v39 = vpack.c.bf16 %v905_v35, %v904_v34  ;;  %v1000_v40 = vld [vmem:[#allocation8 + $0x80] sm:$0xff]  ;;  %v5618_v41 = vpack.c.bf16 %v1003_v37, %v1001_v36  ;;  %v1002_v42 = vld [vmem:[#allocation8 + $0x90] sm:$0xff]  ;;  %v907_v44 = vld [vmem:[#allocation7 + $0x48] sm:$0xff]  ;;  %v1087_v23 = vlaneseq }
 0x1b0   : > { %5584 = vmatprep.subr.bf16.mxu0 %v6858_v0  ;;  %v906_v43 = vld [vmem:[#allocation7 + $0x40] sm:$0xff]  ;;  %v1005_v45 = vld [vmem:[#allocation8 + $0xa8] sm:$0xff]  ;;  %v1007_v46 = vld [vmem:[#allocation8 + $0xb8] sm:$0xff]  ;;  %v5620_v47 = vpack.c.bf16 %v1002_v42, %v1000_v40 }
 0x1b1   : > { %v5591_v48 = vpack.c.bf16 %v907_v44, %v906_v43  ;;  %v1004_v49 = vld [vmem:[#allocation8 + $0xa0] sm:$0xff]  ;;  %v5622_v50 = vpack.c.bf16 %v1007_v46, %v1005_v45  ;;  %v1006_v51 = vld [vmem:[#allocation8 + $0xb0] sm:$0xff]  ;;  %v909_v53 = vld [vmem:[#allocation7 + $0x58] sm:$0xff]  ;;  %v7464_v24 = vshrl.u32 %v1087_v23, 7  ;;  %v1090_v25 = vand.u32 127, %v1087_v23 }
 0x1b2   : > { %5613 = vmatpush1.bf16.msra.mxu1 %v5612_v29  ;;  %v908_v52 = vld [vmem:[#allocation7 + $0x50] sm:$0xff]  ;;  %v1009_v54 = vld [vmem:[#allocation8 + $0xc8] sm:$0xff]  ;;  %v1011_v55 = vld [vmem:[#allocation8 + $0xd8] sm:$0xff]  ;;  %v5624_v56 = vpack.c.bf16 %v1006_v51, %v1004_v49 }
 0x1b3   : > { %5586 = vmatpush3.bf16.msra.mxu0 %v5585_v30  ;;  %5615 = vmatprep.subr.bf16.mxu1 %v5614_v32  ;;  %v5594_v57 = vpack.c.bf16 %v909_v53, %v908_v52  ;;  %v1008_v58 = vld [vmem:[#allocation8 + $0xc0] sm:$0xff]  ;;  %v5626_v59 = vpack.c.bf16 %v1011_v55, %v1009_v54  ;;  %v1010_v60 = vld [vmem:[#allocation8 + $0xd0] sm:$0xff]  ;;  %v911_v62 = vld [vmem:[#allocation7 + $0x68] sm:$0xff]  ;;  %vm1091_vm2 = vcmp.le.s32.totalorder %v1090_v25, %v7464_v24 }
 0x1b4   : > { %5587 = vmatprep.subr.bf16.mxu0 %v6858_v0  ;;  %v910_v61 = vld [vmem:[#allocation7 + $0x60] sm:$0xff]  ;;  %v1013_v63 = vld [vmem:[#allocation8 + $0xe8] sm:$0xff]  ;;  %v1015_v2 = vld [vmem:[#allocation8 + $0xf8] sm:$0xff]  ;;  %v5628_v3 = vpack.c.bf16 %v1010_v60, %v1008_v58 }
 0x1b5   : > { %v5597_v4 = vpack.c.bf16 %v911_v62, %v910_v61  ;;  %v1012_v5 = vld [vmem:[#allocation8 + $0xe0] sm:$0xff]  ;;  %v5630_v6 = vpack.c.bf16 %v1015_v2, %v1013_v63  ;;  %v1014_v7 = vld [vmem:[#allocation8 + $0xf0] sm:$0xff]  ;;  %v913_v9 = vld [vmem:[#allocation7 + $0x78] sm:$0xff] }
 0x1b6   : > { %5617 = vmatpush1.bf16.msra.mxu1 %v5616_v38  ;;  %v912_v8 = vld [vmem:[#allocation7 + $0x70] sm:$0xff]  ;;  %v5632_v10 = vpack.c.bf16 %v1014_v7, %v1012_v5  ;;  %v1795_v2 = vld [vmem:[#allocation10] sm:$0xff]  ;;  %v1808_v25 = vld [vmem:[#allocation10 + $0x68] sm:$0xff] }
 0x1b7   : > { %5589 = vmatpush3.bf16.msra.mxu0 %v5588_v39  ;;  %5619 = vmatprep.subr.bf16.mxu1 %v5618_v41  ;;  %v5600_v11 = vpack.c.bf16 %v913_v9, %v912_v8  ;;  %v895_v12 = vld [vmem:[%s7389_s7] sm:$0xff]  ;;  %v1807_v23 = vld [vmem:[#allocation10 + $0x60] sm:$0xff]  ;;  %vm7543_vm4 = vmpackc.low %vm1092_vm1, %vm1092_vm1 }
 0x1b8   : > { %5590 = vmatprep.subr.bf16.mxu0 %v6858_v0  ;;  %v1797_v7 = vld [vmem:[#allocation10 + $0x10] sm:$0xff]  ;;  %v1798_v8 = vld [vmem:[#allocation10 + $0x18] sm:$0xff] }
 0x1b9   : > { %v5638_v9 = vpack.c.bf16 %v1798_v8, %v1797_v7  ;;  %v1902_v7 = vld [vmem:[#allocation11 + $0x80] sm:$0xff]  ;;  %v1904_v8 = vld [vmem:[#allocation11 + $0x90] sm:$0xff] }
 0x1ba   : > { %5621 = vmatpush1.bf16.msra.mxu1 %v5620_v47 }
 0x1bb   : > { %5592 = vmatpush3.bf16.msra.mxu0 %v5591_v48  ;;  %5623 = vmatprep.subr.bf16.mxu1 %v5622_v50 }
 0x1bc   : > { %5593 = vmatprep.subr.bf16.mxu0 %v6858_v0 }
 0x1be   : > { %5625 = vmatpush1.bf16.msra.mxu1 %v5624_v56 }
 0x1bf   : > { %5595 = vmatpush3.bf16.msra.mxu0 %v5594_v57  ;;  %5627 = vmatprep.subr.bf16.mxu1 %v5626_v59 }
 0x1c0   : > { %5596 = vmatprep.subr.bf16.mxu0 %v6858_v0 }
 0x1c2   : > { %5629 = vmatpush1.bf16.msra.mxu1 %v5628_v3  ;;  %v1796_v3 = vld [vmem:[#allocation10 + $0x8] sm:$0xff] }
 0x1c3   : > { %5598 = vmatpush3.bf16.msra.mxu0 %v5597_v4  ;;  %5631 = vmatprep.subr.bf16.mxu1 %v5630_v6  ;;  %v5634_v4 = vpack.c.bf16 %v1796_v3, %v1795_v2  ;;  %v1900_v2 = vld [vmem:[#allocation11 + $0x70] sm:$0xff]  ;;  %v1903_v3 = vld [vmem:[#allocation11 + $0x88] sm:$0xff] }
 0x1c4   : > { %5599 = vmatprep.subr.bf16.mxu0 %v6858_v0 }
 0x1c6   : > { %5633 = vmatpush1.bf16.msra.mxu1 %v5632_v10  ;;  %v1799_v10 = vld [vmem:[#allocation10 + $0x20] sm:$0xff] }
 0x1c7   : > { %5601 = vmatpush3.bf16.msra.mxu0 %v5600_v11  ;;  %5361 = vmatprep.subr.mxu1 %v6859_v1  ;;  %v1800_v11 = vld [vmem:[#allocation10 + $0x28] sm:$0xff] }
 0x1c8   : > { %5356 = vmatprep.subr.mxu0 %v6859_v1 }
 0x1c9   : > { %1081 = vmatmul.mubr.f32.vlgmr.msra.gmra.mrb[0].mxu1 %v895_v12 }
 0x1ca   : > { %5354 = vmatmul.mubr.f32.vlgmr.msra.gmra.mrb[0].mxu0 %v895_v12  ;;  %5363 = vmatprep.mubr.msk.f32.mxu1 %vm6860_vm0, %v6859_v1  ;;  %v5642_v12 = vpack.c.bf16 %v1800_v11, %v1799_v10  ;;  %v1909_v10 = vld [vmem:[#allocation11 + $0xb8] sm:$0xff]  ;;  %v5684_v11 = vpack.c.bf16 %v1904_v8, %v1902_v7 }
 0x1cb   : > { %5358 = vmatprep.mubr.msk.f32.mxu0 %vm6860_vm0, %v6859_v1 }
 0x29c   : > { %v1082_v13 = vpop.f32.mrb[0].mxu1 }
 0x29d   : > { %v980_v14 = vpop.f32.mrb[0].mxu0  ;;  %1424 = vrot.lane.b32.xlu1 %v1082_v13, %s6861_s0  ;;  %1257 = vrot.lane.b32.xlu0 %v1082_v13, %s6862_s8  ;;  %v7439_v15 = vpop.f32.mrb[1].mxu1 }
 0x29e   : > { %v5355_v16 = vpop.f32.mrb[1].mxu0  ;;  %5357 = vmatpush3.xpose.msk.msra.mxu0 %vm1092_vm1, %v1082_v13  ;;  %5362 = vmatpush3.msra.mxu1 %v7439_v15 }
 0x29f   : > { %5366 = vmatprep.subr.mxu0 %v6859_v1  ;;  %5371 = vmatprep.subr.mxu1 %v6859_v1  ;;  %v1803_v16 = vld [vmem:[#allocation10 + $0x40] sm:$0xff] }
 0x2a1   : > { %5359 = vmatmul.mubr.msk.f32.vlgmr.msra.gmra.mrb[2].mxu0 %vm1092_vm1, %v980_v14  ;;  %1422 = vrot.lane.b32.xlu1 %v980_v14, %s6861_s0 }
 0x2a2   : > { %1255 = vrot.lane.b32.xlu0 %v980_v14, %s6862_s8  ;;  %5368 = vmatprep.mubr.msk.f32.mxu0 %vm6860_vm0, %v6859_v1 }
 0x2a5   : > { %1588 = vrot.lane.b32.xlu1 %v980_v14, %s6863_s4  ;;  %v1802_v14 = vld [vmem:[#allocation10 + $0x38] sm:$0xff] }
 0x2a6   : > { %1590 = vrot.lane.b32.xlu0 %v1082_v13, %s6863_s4  ;;  %v1801_v13 = vld [vmem:[#allocation10 + $0x30] sm:$0xff] }
 0x30f   : > { %v1258_v17 = vpop.permute.xlu0 %1257  ;;  %v1425_v18 = vpop.permute.xlu1 %1424 }
 0x310   : > { %5367 = vmatpush3.xpose.msk.msra.mxu0 %vm1092_vm1, %v1258_v17  ;;  %v1804_v17 = vld [vmem:[#allocation10 + $0x48] sm:$0xff] }
 0x311   : > { %5376 = vmatprep.subr.mxu0 %v6859_v1 }
 0x313   : > { %v1423_v20 = vpop.permute.xlu1 %1422 }
 0x314   : > { %v1256_v19 = vpop.permute.xlu0 %1255 }
 0x315   : > { %5369 = vmatmul.mubr.msk.f32.vlgmr.msra.gmra.mrb[4].mxu0 %vm1092_vm1, %v1256_v19  ;;  %v1805_v19 = vld [vmem:[#allocation10 + $0x50] sm:$0xff] }
 0x316   : > { %5377 = vmatpush3.xpose.msk.msra.mxu0 %vm1092_vm1, %v1425_v18  ;;  %5378 = vmatprep.mubr.msk.f32.mxu0 %vm6860_vm0, %v6859_v1  ;;  %v5650_v18 = vpack.c.bf16 %v1804_v17, %v1803_v16  ;;  %v1913_v16 = vld [vmem:[#allocation11 + $0xd8] sm:$0xff] }
 0x317   : > { %5386 = vmatprep.subr.mxu0 %v6859_v1  ;;  %v1589_v22 = vpop.permute.xlu1 %1588 }
 0x318   : > { %v1591_v21 = vpop.permute.xlu0 %1590 }
 0x319   : > { %5379 = vmatmul.mubr.msk.f32.vlgmr.msra.gmra.mrb[6].mxu0 %vm1092_vm1, %v1423_v20  ;;  %v1806_v20 = vld [vmem:[#allocation10 + $0x58] sm:$0xff] }
 0x31a   : > { %5387 = vmatpush3.xpose.msk.msra.mxu0 %vm1092_vm1, %v1591_v21  ;;  %5388 = vmatprep.mubr.msk.f32.mxu0 %vm6860_vm0, %v6859_v1  ;;  %v7503_v21 = vld [vmem:[%s7379_s19] sm:$0xff] }
 0x31b   : > { %5635 = vmatprep.subr.bf16.mxu0 %v5634_v4 }
 0x31d   : > { %5389 = vmatmul.mubr.msk.f32.vlgmr.msra.gmra.mrb[8].mxu0 %vm1092_vm1, %v1589_v22  ;;  %v5654_v22 = vpack.c.bf16 %v1806_v20, %v1805_v19  ;;  %v1910_v19 = vld [vmem:[#allocation11 + $0xc0] sm:$0xff]  ;;  %v1912_v20 = vld [vmem:[#allocation11 + $0xd0] sm:$0xff] }
 0x31e   : > { %5637 = vmatpush3.bf16.msra.mxu0 %v5634_v4  ;;  %5428 = vmatprep.mubr.f32.mxu0 %v7503_v21  ;;  %v1905_v4 = vld [vmem:[#allocation11 + $0x98] sm:$0xff] }
 0x31f   : > { %5639 = vmatprep.subr.bf16.mxu0 %v5638_v9 }
 0x322   : > { %5641 = vmatpush3.bf16.msra.mxu0 %v5638_v9  ;;  %v1907_v9 = vld [vmem:[#allocation11 + $0xa8] sm:$0xff] }
 0x323   : > { %5643 = vmatprep.subr.bf16.mxu0 %v5642_v12 }
 0x326   : > { %5645 = vmatpush3.bf16.msra.mxu0 %v5642_v12  ;;  %v5686_v12 = vpack.c.bf16 %v1909_v10, %v1907_v9 }
 0x374   : > { %v1165_v26 = vpop.f32.mrb[2].mxu0 }
 0x375   : > { %v1169_v27 = vsel %vm1091_vm2, %v1165_v26, -1e+30  ;;  %v5360_v28 = vpop.f32.mrb[3].mxu0  ;;  %v5658_v26 = vpack.c.bf16 %v1808_v25, %v1807_v23  ;;  %v1917_v23 = vld [vmem:[#allocation11 + $0xf8] sm:$0xff]  ;;  %v5692_v25 = vpack.c.bf16 %v1912_v20, %v1910_v19 }
 0x376   : > { %v1171_v29 = vsel %vm1170_vm3, %v1169_v27, -inf  ;;  %v1810_v28 = vld [vmem:[#allocation10 + $0x78] sm:$0xff] }
 0x377   : > { %1172 = vmax.xlane.f32.xlu0 %v1171_v29 }
 0x3e8   : > { %v1329_v30 = vpop.f32.mrb[4].mxu0 }
 0x3e9   : > { %v1333_v31 = vsel %vm1091_vm2, %v1329_v30, -1e+30  ;;  %v5370_v32 = vpop.f32.mrb[5].mxu0  ;;  %v7507_v30 = vld [vmem:[%s7379_s19 + $0x8] sm:$0xff]  ;;  %s5050_s19 = sshll.u32 %s7004_s23, 8 }
 0x3ea   : > { %v1334_v33 = vsel %vm1170_vm3, %v1333_v31, -inf }
 0x3eb   : > { %1335 = vmax.xlane.f32.xlu1 %v1334_v33 }
 0x3ec   : > { %v1496_v34 = vpop.f32.mrb[6].mxu0 }
 0x3ed   : > { %v1500_v35 = vsel %vm1091_vm2, %v1496_v34, -1e+30  ;;  %v5380_v36 = vpop.f32.mrb[7].mxu0 }
 0x3ee   : > { %v1501_v37 = vsel %vm1170_vm3, %v1500_v35, -inf }
 0x3ef   : > { %1502 = vmax.xlane.f32.xlu0 %v1501_v37  ;;  %v1887_v37 = vld [vmem:[#allocation11 + $0x8] sm:$0xff] }
 0x3f0   : > { %v1662_v38 = vpop.f32.mrb[8].mxu0 }
 0x3f1   : > { %v1666_v39 = vsel %vm1091_vm2, %v1662_v38, -1e+30  ;;  %v5390_v40 = vpop.f32.mrb[9].mxu0  ;;  %v1889_v38 = vld [vmem:[#allocation11 + $0x18] sm:$0xff] }
 0x3f2   : > { %v1667_v41 = vsel %vm1170_vm3, %v1666_v39, -inf }
 0x3f3   : > { %1668 = vmax.xlane.f32.xlu0 %v1667_v41  ;;  %v5666_v41 = vpack.c.bf16 %v1889_v38, %v1887_v37 }
 0x3fc   : > { %1346 = vrot.lane.b32.xlu1 %v7439_v15, %s6862_s8 }
 0x404   : > { %v1173_v42 = vpop.xlane.xlu0 %1172 }
 0x405   : > { %v1174_v43 = vsub.f32 %v1169_v27, %v1173_v42  ;;  %v1809_v27 = vld [vmem:[#allocation10 + $0x70] sm:$0xff]  ;;  %v1886_v42 = vld [vmem:[#allocation11] sm:$0xff] }
 0x406   : > { %v5662_v29 = vpack.c.bf16 %v1810_v28, %v1809_v27  ;;  %v1914_v27 = vld [vmem:[#allocation11 + $0xe0] sm:$0xff]  ;;  %v1916_v28 = vld [vmem:[#allocation11 + $0xf0] sm:$0xff] }
 0x407   : > { %v1175_v44 = vmul.f32 1.442695, %v1174_v43  ;;  %v1888_v43 = vld [vmem:[#allocation11 + $0x10] sm:$0xff] }
 0x409   : > { %6309 = vpow2.f32 %v1175_v44  ;;  %v1891_v44 = vld [vmem:[#allocation11 + $0x28] sm:$0xff] }
 0x413   : > { %v6310_v45 = vpop.eup %6309 }
 0x414   : > { %v1177_v46 = vsel %vm1170_vm3, %v6310_v45, 0.0 }
 0x420   : > { %1178 = vadd.xlane.f32.xlu1 %v1177_v46 }
 0x478   : > { %v1336_v47 = vpop.xlane.xlu1 %1335 }
 0x479   : > { %v1337_v48 = vsub.f32 %v1333_v31, %v1336_v47 }
 0x47b   : > { %v1338_v49 = vmul.f32 1.442695, %v1337_v48  ;;  %v5668_v48 = vpack.c.bf16 %v1888_v43, %v1886_v42 }
 0x47c   : > { %v1503_v50 = vpop.xlane.xlu0 %1502  ;;  %v1347_v62 = vpop.permute.xlu1 %1346 }
 0x47d   : > { %6311 = vpow2.f32 %v1338_v49  ;;  %v1504_v51 = vsub.f32 %v1500_v35, %v1503_v50 }
 0x47f   : > { %v1505_v52 = vmul.f32 1.442695, %v1504_v51  ;;  %v1890_v51 = vld [vmem:[#allocation11 + $0x20] sm:$0xff] }
 0x480   : > { %v1669_v53 = vpop.xlane.xlu0 %1668 }
 0x481   : > { %6313 = vpow2.f32 %v1505_v52  ;;  %v1670_v54 = vsub.f32 %v1666_v39, %v1669_v53  ;;  %v1892_v52 = vld [vmem:[#allocation11 + $0x30] sm:$0xff]  ;;  %v1895_v53 = vld [vmem:[#allocation11 + $0x48] sm:$0xff] }
 0x483   : > { %v1671_v55 = vmul.f32 1.442695, %v1670_v54  ;;  %v1897_v54 = vld [vmem:[#allocation11 + $0x58] sm:$0xff] }
 0x485   : > { %6315 = vpow2.f32 %v1671_v55  ;;  %v5672_v55 = vpack.c.bf16 %v1892_v52, %v1890_v51 }
 0x487   : > { %v7482_v56 = vpop.eup %6311 }
 0x488   : > { %v1340_v57 = vsel %vm1170_vm3, %v7482_v56, 0.0 }
 0x489   : > { %1341 = vadd.xlane.f32.xlu0 %v1340_v57  ;;  %v1894_v57 = vld [vmem:[#allocation11 + $0x40] sm:$0xff] }
 0x48b   : > { %v7486_v58 = vpop.eup %6313 }
 0x48c   : > { %v1507_v59 = vsel %vm1170_vm3, %v7486_v58, 0.0 }
 0x48d   : > { %1508 = vadd.xlane.f32.xlu1 %v1507_v59  ;;  %v1899_v59 = vld [vmem:[#allocation11 + $0x68] sm:$0xff] }
 0x48f   : > { %v7490_v60 = vpop.eup %6315 }
 0x490   : > { %v1673_v61 = vsel %vm1170_vm3, %v7490_v60, 0.0 }
 0x491   : > { %1674 = vadd.xlane.f32.xlu0 %v1673_v61  ;;  %v1901_v61 = vld [vmem:[#allocation11 + $0x78] sm:$0xff] }
 0x49e   : > { %1678 = vrot.lane.b32.xlu1 %v7439_v15, %s6863_s4 }
 0x4a7   : > { %1512 = vrot.lane.b32.xlu0 %v7439_v15, %s6861_s0  ;;  %v5646_v15 = vpack.c.bf16 %v1802_v14, %v1801_v13  ;;  %v1906_v13 = vld [vmem:[#allocation11 + $0xa0] sm:$0xff]  ;;  %v1908_v14 = vld [vmem:[#allocation11 + $0xb0] sm:$0xff] }
 0x4a8   : > { %v5688_v17 = vpack.c.bf16 %v1908_v14, %v1906_v13 }
 0x4a9   : > { %5647 = vmatprep.subr.bf16.mxu0 %v5646_v15 }
 0x4aa   : > { %5649 = vmatpush3.bf16.msra.mxu0 %v5646_v15  ;;  %v1911_v15 = vld [vmem:[#allocation11 + $0xc8] sm:$0xff] }
 0x4ab   : > { %5651 = vmatprep.subr.bf16.mxu0 %v5650_v18 }
 0x4ad   : > { %v1179_v63 = vpop.xlane.xlu1 %1178 }
 0x4ae   : > { %6317 = vrcp.f32 %v1179_v63  ;;  %5653 = vmatpush3.bf16.msra.mxu0 %v5650_v18  ;;  %v1898_v63 = vld [vmem:[#allocation11 + $0x60] sm:$0xff]  ;;  %v5690_v18 = vpack.c.bf16 %v1913_v16, %v1911_v15 }
 0x4af   : > { %5655 = vmatprep.subr.bf16.mxu0 %v5654_v22 }
 0x4b2   : > { %5657 = vmatpush3.bf16.msra.mxu0 %v5654_v22  ;;  %v1915_v22 = vld [vmem:[#allocation11 + $0xe8] sm:$0xff] }
 0x4b3   : > { %5659 = vmatprep.subr.bf16.mxu0 %v5658_v26 }
 0x4b6   : > { %5661 = vmatpush3.bf16.msra.mxu0 %v5658_v26  ;;  %v5694_v26 = vpack.c.bf16 %v1917_v23, %v1915_v22 }
 0x4b7   : > { %5663 = vmatprep.subr.bf16.mxu0 %v5662_v29 }
 0x4b8   : > { %v6318_v5 = vpop.eup %6317 }
 0x4b9   : > { %v1181_v6 = vmul.f32 %v6318_v5, %v6310_v45  ;;  %v1893_v45 = vld [vmem:[#allocation11 + $0x38] sm:$0xff]  ;;  %v5680_v5 = vpack.c.bf16 %v1900_v2, %v1898_v63 }
 0x4ba   : > { %5665 = vmatpush3.bf16.msra.mxu0 %v5662_v29  ;;  %v5670_v50 = vpack.c.bf16 %v1893_v45, %v1891_v44  ;;  %v5696_v29 = vpack.c.bf16 %v1916_v28, %v1914_v27 }
 0x4bb   : > { %5364 = vmatmul.mubr.msk.f32.vlgmr.msra.gmra.mrb[2].mxu1 %vm1170_vm3, %v1181_v6  ;;  %v5682_v6 = vpack.c.bf16 %v1905_v4, %v1903_v3 }
 0x4bc   : > { %5372 = vmatpush3.msra.mxu1 %v1347_v62  ;;  %5373 = vmatprep.mubr.msk.f32.mxu1 %vm6860_vm0, %v6859_v1  ;;  %v5678_v62 = vpack.c.bf16 %v1901_v61, %v1899_v59 }
 0x4bd   : > { %5381 = vmatprep.subr.mxu1 %v6859_v1  ;;  %5429 = vmatmul.mubr.f32.vlgmr.msra.gmra.mrb[10].mxu0 %v7507_v30 }
 0x516   : > { %v1342_v31 = vpop.xlane.xlu0 %1341 }
 0x517   : > { %6319 = vrcp.f32 %v1342_v31 }
 0x51a   : > { %v1509_v32 = vpop.xlane.xlu1 %1508 }
 0x51b   : > { %6321 = vrcp.f32 %v1509_v32 }
 0x51e   : > { %v1675_v33 = vpop.xlane.xlu0 %1674  ;;  %v1679_v46 = vpop.permute.xlu1 %1678 }
 0x51f   : > { %6323 = vrcp.f32 %v1675_v33 }
 0x521   : > { %v6320_v34 = vpop.eup %6319 }
 0x522   : > { %v1344_v35 = vmul.f32 %v6320_v34, %v7482_v56  ;;  %v1513_v36 = vpop.permute.xlu0 %1512  ;;  %v5674_v56 = vpack.c.bf16 %v1897_v54, %v1895_v53 }
 0x524   : > { %5374 = vmatmul.mubr.msk.f32.vlgmr.msra.gmra.mrb[4].mxu1 %vm1170_vm3, %v1344_v35 }
 0x525   : > { %v6322_v39 = vpop.eup %6321  ;;  %5382 = vmatpush3.msra.mxu1 %v1513_v36  ;;  %5383 = vmatprep.mubr.msk.f32.mxu1 %vm6860_vm0, %v6859_v1 }
 0x526   : > { %v1511_v40 = vmul.f32 %v6322_v39, %v7486_v58  ;;  %5391 = vmatprep.subr.mxu1 %v6859_v1  ;;  %v1896_v58 = vld [vmem:[#allocation11 + $0x50] sm:$0xff] }
 0x528   : > { %5384 = vmatmul.mubr.msk.f32.vlgmr.msra.gmra.mrb[6].mxu1 %vm1170_vm3, %v1511_v40 }
 0x529   : > { %v6324_v47 = vpop.eup %6323  ;;  %5392 = vmatpush3.msra.mxu1 %v1679_v46  ;;  %5393 = vmatprep.mubr.msk.f32.mxu1 %vm6860_vm0, %v6859_v1 }
 0x52a   : > { %v1677_v49 = vmul.f32 %v6324_v47, %v7490_v60  ;;  %5667 = vmatprep.subr.bf16.mxu1 %v5666_v41  ;;  %v5676_v60 = vpack.c.bf16 %v1896_v58, %v1894_v57 }
 0x52c   : > { %5394 = vmatmul.mubr.msk.f32.vlgmr.msra.gmra.mrb[8].mxu1 %vm1170_vm3, %v1677_v49 }
 0x52d   : > { %5669 = vmatpush1.bf16.msra.mxu1 %v5668_v48  ;;  %1982 = vmatprep.mubr.f32.mxu1 %v6859_v1 }
 0x52e   : > { %5671 = vmatprep.subr.bf16.mxu1 %v5670_v50 }
 0x531   : > { %5673 = vmatpush1.bf16.msra.mxu1 %v5672_v55 }
 0x532   : > { %5675 = vmatprep.subr.bf16.mxu1 %v5674_v56 }
 0x535   : > { %5677 = vmatpush1.bf16.msra.mxu1 %v5676_v60 }
 0x536   : > { %5679 = vmatprep.subr.bf16.mxu1 %v5678_v62 }
 0x539   : > { %5681 = vmatpush1.bf16.msra.mxu1 %v5680_v5 }
 0x53a   : > { %5683 = vmatprep.subr.bf16.mxu1 %v5682_v6 }
 0x53d   : > { %5685 = vmatpush1.bf16.msra.mxu1 %v5684_v11 }
 0x53e   : > { %5687 = vmatprep.subr.bf16.mxu1 %v5686_v12 }
 0x541   : > { %5689 = vmatpush1.bf16.msra.mxu1 %v5688_v17 }
 0x542   : > { %5691 = vmatprep.subr.bf16.mxu1 %v5690_v18 }
 0x545   : > { %5693 = vmatpush1.bf16.msra.mxu1 %v5692_v25 }
 0x546   : > { %5695 = vmatprep.subr.bf16.mxu1 %v5694_v26 }
 0x549   : > { %5697 = vmatpush1.bf16.msra.mxu1 %v5696_v29 }
 0x54c   : > { %1983 = vmatmul.mubr.f32.vlgmr.msra.gmra.mrb[10].mxu1 %v7503_v21 }
 0x54d   : > { %1988 = vmatprep.mubr.f32.mxu1 %v6859_v1 }
 0x550   : > { %1989 = vmatmul.mubr.f32.gmra.mrb[12].mxu1 %v7507_v30 }
 0x58e   : > { %v7525_v31 = vpop.f32.mrb[2].mxu1 }
 0x58f   : > { %v5365_v32 = vpop.f32.mrb[3].mxu1 }
 0x590   : > { %v7527_v33 = vpop.f32.mrb[10].mxu0 }
 0x591   : > { %v7529_v34 = vpop.f32.mrb[11].mxu0 }
 0x592   : > { %5435 = vmatprep.mubr.msk.f32.mxu0 %vm1092_vm1, %v7529_v34  ;;  %2186 = vrot.lane.b32.xlu0 %v7529_v34, %s6862_s8 }
 0x5f7   : > { %v7535_v35 = vpop.f32.mrb[4].mxu1 }
 0x5f8   : > { %v5375_v36 = vpop.f32.mrb[5].mxu1 }
 0x5fb   : > { %v7537_v37 = vpop.f32.mrb[6].mxu1 }
 0x5fc   : > { %v5385_v38 = vpop.f32.mrb[7].mxu1 }
 0x5ff   : > { %v7539_v39 = vpop.f32.mrb[8].mxu1 }
 0x600   : > { %v5395_v40 = vpop.f32.mrb[9].mxu1 }
 0x604   : > { %v2187_v50 = vpop.permute.xlu0 %2186 }
 0x61f   : > { %v1984_v41 = vpop.f32.mrb[10].mxu1 }
 0x620   : > { %v1986_v42 = vpop.f32.mrb[11].mxu1 }
 0x623   : > { %v1990_v43 = vpop.f32.mrb[12].mxu1 }
 0x624   : > { %v5698_v45 = vpack.c.bf16 %v1990_v43, %v1984_v41  ;;  %v1992_v46 = vpop.f32.mrb[13].mxu1  ;;  %v7547_v47 = vpack.i.bf16 %v1990_v43, %v1984_v41 }
 0x625   : > { %v5704_v48 = vpack.c.bf16 %v1992_v46, %v1986_v42  ;;  %v7549_v49 = vpack.i.bf16 %v1992_v46, %v1986_v42 }
 0x626   : > { %6250 = vrot.lane.b32.xlu1 %v7547_v47, %s6862_s8  ;;  %5700 = vmatprep.subr.msk.bf16.mxu0 %vm7543_vm4, %v5698_v45 }
 0x627   : > { %5703 = vmatpush3.bf16.xpose.msk.msra.mxu0 %vm7543_vm4, %v5698_v45  ;;  %5705 = vmatprep.subr.bf16.mxu1 %v5704_v48 }
 0x628   : > { %5707 = vmatpush3.bf16.msra.mxu1 %v5704_v48 }
 0x62a   : > { %2188 = vrot.lane.b32.xlu1 %v7527_v33, %s6862_s8 }
 0x62e   : > { %5436 = vmatmul.mubr.msk.f32.vlgmr.msra.gmra.mrb[12].mxu0 %vm1092_vm1, %v7527_v33 }
 0x62f   : > { %5449 = vmatprep.mubr.msk.f32.mxu0 %vm1092_vm1, %v2187_v50 }
 0x698   : > { %v6251_v51 = vpop.permute.xlu1 %6250 }
 0x699   : > { %v6253_v52 = vunpack.i.h.bf16 %v6251_v51  ;;  %v6252_v53 = vunpack.i.l.bf16 %v6251_v51 }
 0x69b   : > { %v5708_v54 = vpack.c.bf16 %v6253_v52, %v6252_v53 }
 0x69c   : > { %v2189_v55 = vpop.permute.xlu1 %2188 }
 0x69d   : > { %5710 = vmatprep.subr.msk.bf16.mxu0 %vm7543_vm4, %v5708_v54 }
 0x69e   : > { %5713 = vmatpush3.bf16.xpose.msk.msra.mxu0 %vm7543_vm4, %v5708_v54 }
 0x6a5   : > { %5450 = vmatmul.mubr.msk.f32.vlgmr.msra.gmra.mrb[14].mxu0 %vm1092_vm1, %v2189_v55 }
 0x701   : > { %v5437_v56 = vpop.f32.mrb[12].mxu0 }
 0x702   : > { %v2073_v57 = vpop.f32.mrb[13].mxu0  ;;  %v2086_v58 = vsel %vm2082_vm5, %v5437_v56, -inf }
 0x703   : > { %2087 = vmax.xlane.f32.xlu1 %v2086_v58  ;;  %v2083_v59 = vsel %vm2082_vm5, %v2073_v57, -inf }
 0x704   : > { %2084 = vmax.xlane.f32.xlu0 %v2083_v59 }
 0x714   : > { %6255 = vrot.lane.b32.xlu1 %v7549_v49, %s6862_s8 }
 0x778   : > { %v5451_v61 = vpop.f32.mrb[14].mxu0 }
 0x779   : > { %v2268_v60 = vpop.f32.mrb[15].mxu0  ;;  %v2280_v63 = vsel %vm2082_vm5, %v5451_v61, -inf }
 0x77a   : > { %v2277_v62 = vsel %vm2082_vm5, %v2268_v60, -inf }
 0x77b   : > { %2278 = vmax.xlane.f32.xlu0 %v2277_v62 }
 0x77f   : > { %2281 = vmax.xlane.f32.xlu0 %v2280_v63 }
 0x790   : > { %v2088_v2 = vpop.xlane.xlu1 %2087 }
 0x791   : > { %v2090_v3 = vsub.f32 %v5437_v56, %v2088_v2  ;;  %v2085_v4 = vpop.xlane.xlu0 %2084 }
 0x792   : > { %v2089_v5 = vsub.f32 %v2073_v57, %v2085_v4 }
 0x793   : > { %v2093_v6 = vmul.f32 1.442695, %v2090_v3 }
 0x794   : > { %v2091_v7 = vmul.f32 1.442695, %v2089_v5  ;;  %v6256_v8 = vpop.permute.xlu1 %6255 }
 0x795   : > { %6325 = vpow2.f32 %v2093_v6  ;;  %v6258_v9 = vunpack.i.h.bf16 %v6256_v8  ;;  %v6257_v10 = vunpack.i.l.bf16 %v6256_v8 }
 0x796   : > { %6327 = vpow2.f32 %v2091_v7 }
 0x797   : > { %v5714_v11 = vpack.c.bf16 %v6258_v9, %v6257_v10 }
 0x799   : > { %5715 = vmatprep.subr.bf16.mxu1 %v5714_v11 }
 0x79f   : > { %v6326_v12 = vpop.eup %6325 }
 0x7a0   : > { %v6328_v13 = vpop.eup %6327  ;;  %v2098_v14 = vsel %vm2082_vm5, %v6326_v12, 0.0 }
 0x7a1   : > { %2099 = vadd.xlane.f32.xlu0 %v2098_v14  ;;  %v2095_v15 = vsel %vm2082_vm5, %v6328_v13, 0.0 }
 0x7a2   : > { %2096 = vadd.xlane.f32.xlu1 %v2095_v15 }
 0x7b3   : > { %2388 = vrot.lane.b32.xlu1 %v7529_v34, %s6861_s0 }
 0x808   : > { %v2279_v16 = vpop.xlane.xlu0 %2278 }
 0x809   : > { %v2283_v17 = vsub.f32 %v2268_v60, %v2279_v16 }
 0x80b   : > { %v2285_v18 = vmul.f32 1.442695, %v2283_v17 }
 0x80c   : > { %v2282_v19 = vpop.xlane.xlu0 %2281 }
 0x80d   : > { %6329 = vpow2.f32 %v2285_v18  ;;  %v2284_v20 = vsub.f32 %v5451_v61, %v2282_v19 }
 0x80f   : > { %v2287_v22 = vmul.f32 1.442695, %v2284_v20 }
 0x811   : > { %6331 = vpow2.f32 %v2287_v22 }
 0x817   : > { %v6330_v23 = vpop.eup %6329 }
 0x818   : > { %v2289_v25 = vsel %vm2082_vm5, %v6330_v23, 0.0 }
 0x819   : > { %2290 = vadd.xlane.f32.xlu1 %v2289_v25 }
 0x81b   : > { %v6332_v26 = vpop.eup %6331 }
 0x81c   : > { %v2292_v27 = vsel %vm2082_vm5, %v6332_v26, 0.0 }
 0x81d   : > { %2293 = vadd.xlane.f32.xlu0 %v2292_v27 }
 0x82a   : > { %2390 = vrot.lane.b32.xlu1 %v7527_v33, %s6861_s0 }
 0x82e   : > { %v2100_v28 = vpop.xlane.xlu0 %2099 }
 0x82f   : > { %6333 = vrcp.f32 %v2100_v28  ;;  %v2097_v29 = vpop.xlane.xlu1 %2096 }
 0x830   : > { %6335 = vrcp.f32 %v2097_v29 }
 0x833   : > { %6260 = vrot.lane.b32.xlu0 %v7547_v47, %s6861_s0  ;;  %v2389_v41 = vpop.permute.xlu1 %2388 }
 0x839   : > { %v6334_v32 = vpop.eup %6333 }
 0x83a   : > { %v6336_v36 = vpop.eup %6335  ;;  %v2104_v40 = vmul.f32 %v6334_v32, %v6326_v12 }
 0x83b   : > { %v2102_v38 = vmul.f32 %v6336_v36, %v6328_v13 }
 0x83d   : > { %5442 = vmatprep.mubr.msk.f32.mxu1 %vm2082_vm5, %v2102_v38 }
 0x83e   : > { %5443 = vmatmul.mubr.msk.f32.vlgmr.msra.gmra.mrb[14].mxu1 %vm2082_vm5, %v2104_v40 }
 0x83f   : > { %5717 = vmatpush3.bf16.msra.mxu1 %v5714_v11 }
 0x8a6   : > { %v2291_v42 = vpop.xlane.xlu1 %2290 }
 0x8a7   : > { %6337 = vrcp.f32 %v2291_v42 }
 0x8aa   : > { %v2294_v43 = vpop.xlane.xlu0 %2293  ;;  %v2391_v55 = vpop.permute.xlu1 %2390 }
 0x8ab   : > { %6339 = vrcp.f32 %v2294_v43 }
 0x8ae   : > { %v6261_v45 = vpop.permute.xlu0 %6260 }
 0x8af   : > { %v6263_v46 = vunpack.i.h.bf16 %v6261_v45  ;;  %v6262_v48 = vunpack.i.l.bf16 %v6261_v45 }
 0x8b1   : > { %v6338_v50 = vpop.eup %6337  ;;  %v5718_v51 = vpack.c.bf16 %v6263_v46, %v6262_v48 }
 0x8b2   : > { %v2296_v52 = vmul.f32 %v6338_v50, %v6330_v23 }
 0x8b3   : > { %5720 = vmatprep.subr.msk.bf16.mxu1 %vm7543_vm4, %v5718_v51 }
 0x8b4   : > { %5456 = vmatprep.mubr.msk.f32.mxu1 %vm2082_vm5, %v2296_v52 }
 0x8b5   : > { %v6340_v53 = vpop.eup %6339 }
 0x8b6   : > { %v2298_v54 = vmul.f32 %v6340_v53, %v6332_v26 }
 0x8b8   : > { %5457 = vmatmul.mubr.msk.f32.vlgmr.msra.gmra.mrb[16].mxu1 %vm2082_vm5, %v2298_v54 }
 0x8b9   : > { %5723 = vmatpush3.bf16.xpose.msk.msra.mxu1 %vm7543_vm4, %v5718_v51  ;;  %5463 = vmatprep.mubr.msk.f32.mxu1 %vm1092_vm1, %v2389_v41 }
 0x8c0   : > { %5464 = vmatmul.mubr.msk.f32.vlgmr.msra.gmra.mrb[18].mxu1 %vm1092_vm1, %v2391_v55 }
 0x911   : > { %v7593_v56 = vpop.f32.mrb[14].mxu1 }
 0x912   : > { %v7595_v57 = vpop.f32.mrb[15].mxu1 }
 0x98b   : > { %v7597_v58 = vpop.f32.mrb[16].mxu1 }
 0x98c   : > { %v7599_v59 = vpop.f32.mrb[17].mxu1 }
 0x993   : > { %v5465_v61 = vpop.f32.mrb[18].mxu1 }
 0x994   : > { %v2470_v60 = vpop.f32.mrb[19].mxu1  ;;  %v2482_v62 = vsel %vm2082_vm5, %v5465_v61, -inf }
 0x995   : > { %2483 = vmax.xlane.f32.xlu1 %v2482_v62  ;;  %v2479_v63 = vsel %vm2082_vm5, %v2470_v60, -inf }
 0x996   : > { %2480 = vmax.xlane.f32.xlu0 %v2479_v63 }
 0x9a6   : > { %6265 = vrot.lane.b32.xlu1 %v7549_v49, %s6861_s0 }
 0x9aa   : > { %2588 = vrot.lane.b32.xlu1 %v7529_v34, %s6863_s4 }
 0x9ae   : > { %2590 = vrot.lane.b32.xlu1 %v7527_v33, %s6863_s4 }
 0xa22   : > { %v2484_v2 = vpop.xlane.xlu1 %2483 }
 0xa23   : > { %v2486_v3 = vsub.f32 %v5465_v61, %v2484_v2  ;;  %v2481_v4 = vpop.xlane.xlu0 %2480 }
 0xa24   : > { %v2485_v5 = vsub.f32 %v2470_v60, %v2481_v4 }
 0xa25   : > { %v2489_v6 = vmul.f32 1.442695, %v2486_v3 }
 0xa26   : > { %v2487_v7 = vmul.f32 1.442695, %v2485_v5  ;;  %v6266_v8 = vpop.permute.xlu1 %6265 }
 0xa27   : > { %6341 = vpow2.f32 %v2489_v6  ;;  %v6268_v9 = vunpack.i.h.bf16 %v6266_v8  ;;  %v6267_v10 = vunpack.i.l.bf16 %v6266_v8 }
 0xa28   : > { %6343 = vpow2.f32 %v2487_v7 }
 0xa29   : > { %v5724_v11 = vpack.c.bf16 %v6268_v9, %v6267_v10 }
 0xa2a   : > { %v2589_v26 = vpop.permute.xlu1 %2588 }
 0xa2b   : > { %5725 = vmatprep.subr.bf16.mxu0 %v5724_v11 }
 0xa2c   : > { %5727 = vmatpush3.bf16.msra.mxu0 %v5724_v11 }
 0xa31   : > { %v6342_v12 = vpop.eup %6341 }
 0xa32   : > { %v2494_v34 = vsel %vm2082_vm5, %v6342_v12, 0.0  ;;  %v6344_v13 = vpop.eup %6343 }
 0xa33   : > { %2495 = vadd.xlane.f32.xlu0 %v2494_v34  ;;  %v2491_v33 = vsel %vm2082_vm5, %v6344_v13, 0.0 }
 0xa37   : > { %2492 = vadd.xlane.f32.xlu0 %v2491_v33 }
 0xa4d   : > { %6270 = vrot.lane.b32.xlu0 %v7547_v47, %s6863_s4  ;;  %v2591_v47 = vpop.permute.xlu1 %2590 }
 0xac0   : > { %v2496_v14 = vpop.xlane.xlu0 %2495 }
 0xac1   : > { %6345 = vrcp.f32 %v2496_v14 }
 0xac4   : > { %v2493_v15 = vpop.xlane.xlu0 %2492 }
 0xac5   : > { %6347 = vrcp.f32 %v2493_v15  ;;  %v2856_v15 = vld [vmem:[#allocation13 + $0x8] sm:$0xff] }
 0xac8   : > { %v6271_v16 = vpop.permute.xlu0 %6270 }
 0xac9   : > { %v6273_v17 = vunpack.i.h.bf16 %v6271_v16  ;;  %v6272_v18 = vunpack.i.l.bf16 %v6271_v16  ;;  %v2860_v16 = vld [vmem:[#allocation13 + $0x28] sm:$0xff] }
 0xacb   : > { %v5728_v19 = vpack.c.bf16 %v6273_v17, %v6272_v18  ;;  %v6346_v20 = vpop.eup %6345  ;;  %v2858_v17 = vld [vmem:[#allocation13 + $0x18] sm:$0xff]  ;;  %v5738_v18 = vpack.c.bf16 %v2860_v16, %v2856_v15  ;;  %v2892_v16 = vld [vmem:[#allocation13 + $0x128] sm:$0xff] }
 0xacc   : > { %v2500_v25 = vmul.f32 %v6346_v20, %v6342_v12  ;;  %v2855_v20 = vld [vmem:[#allocation13] sm:$0xff] }
 0xacd   : > { %5730 = vmatprep.subr.msk.bf16.mxu0 %vm7543_vm4, %v5728_v19 }
 0xacf   : > { %v6348_v22 = vpop.eup %6347 }
 0xad0   : > { %v2498_v23 = vmul.f32 %v6348_v22, %v6344_v13 }
 0xad2   : > { %5470 = vmatprep.mubr.msk.f32.mxu0 %vm2082_vm5, %v2498_v23 }
 0xad3   : > { %5471 = vmatmul.mubr.msk.f32.vlgmr.msra.gmra.mrb[16].mxu0 %vm2082_vm5, %v2500_v25  ;;  %v2861_v25 = vld [vmem:[#allocation13 + $0x30] sm:$0xff] }
 0xad4   : > { %5733 = vmatpush3.bf16.xpose.msk.msra.mxu0 %vm7543_vm4, %v5728_v19  ;;  %5477 = vmatprep.mubr.msk.f32.mxu0 %vm1092_vm1, %v2589_v26  ;;  %v2862_v19 = vld [vmem:[#allocation13 + $0x38] sm:$0xff]  ;;  %v2864_v26 = vld [vmem:[#allocation13 + $0x48] sm:$0xff] }
 0xad5   : > { %v5770_v22 = vpack.c.bf16 %v2862_v19, %v2858_v17  ;;  %v2890_v17 = vld [vmem:[#allocation13 + $0x118] sm:$0xff] }
 0xad6   : > { %v2894_v19 = vld [vmem:[#allocation13 + $0x138] sm:$0xff] }
 0xad7   : > { %5771 = vmatprep.subr.bf16.mxu0 %v5770_v22  ;;  %v5786_v22 = vpack.c.bf16 %v2894_v19, %v2890_v17  ;;  %v2820_v19 = vld [vmem:[%s8031_s14] sm:$0x3]  ;;  %s7747_s14 = scalar_lea.vmem [#allocation22], %s4974_s24 }
 0xadb   : > { %5478 = vmatmul.mubr.msk.f32.vlgmr.msra.gmra.mrb[18].mxu0 %vm1092_vm1, %v2591_v47 }
 0xadc   : > { %3082 = vmatprep.mubr.f32.mxu0 %v6859_v1 }
 0xba6   : > { %v5472_v27 = vpop.f32.mrb[16].mxu0 }
 0xba7   : > { %v2579_v28 = vpop.f32.mrb[17].mxu0 }
 0xbae   : > { %v5479_v29 = vpop.f32.mrb[18].mxu0 }
 0xbaf   : > { %v2670_v32 = vpop.f32.mrb[19].mxu0  ;;  %v2682_v36 = vsel %vm2082_vm5, %v5479_v29, -inf }
 0xbb0   : > { %2683 = vmax.xlane.f32.xlu1 %v2682_v36  ;;  %v2679_v38 = vsel %vm2082_vm5, %v2670_v32, -inf  ;;  %v2863_v36 = vld [vmem:[#allocation13 + $0x40] sm:$0xff] }
 0xbb1   : > { %2680 = vmax.xlane.f32.xlu0 %v2679_v38  ;;  %v2867_v38 = vld [vmem:[#allocation13 + $0x60] sm:$0xff] }
 0xbc1   : > { %6275 = vrot.lane.b32.xlu1 %v7549_v49, %s6863_s4 }
 0xbc5   : > { %2798 = vrot.lane.b32.xlu1 %v2579_v28, %s6861_s0  ;;  %v2866_v28 = vld [vmem:[#allocation13 + $0x58] sm:$0xff] }
 0xc3d   : > { %v2684_v40 = vpop.xlane.xlu1 %2683 }
 0xc3e   : > { %v2686_v41 = vsub.f32 %v5479_v29, %v2684_v40  ;;  %v2681_v42 = vpop.xlane.xlu0 %2680  ;;  %v2870_v29 = vld [vmem:[#allocation13 + $0x78] sm:$0xff]  ;;  %v2865_v40 = vld [vmem:[#allocation13 + $0x50] sm:$0xff] }
 0xc3f   : > { %v2685_v43 = vsub.f32 %v2670_v32, %v2681_v42  ;;  %v5774_v32 = vpack.c.bf16 %v2870_v29, %v2866_v28  ;;  %v2869_v42 = vld [vmem:[#allocation13 + $0x70] sm:$0xff]  ;;  %v2898_v28 = vld [vmem:[#allocation13 + $0x158] sm:$0xff] }
 0xc40   : > { %v2689_v45 = vmul.f32 1.442695, %v2686_v41  ;;  %v5744_v41 = vpack.c.bf16 %v2867_v38, %v2863_v36  ;;  %v2899_v36 = vld [vmem:[#allocation13 + $0x160] sm:$0xff] }
 0xc41   : > { %v2687_v46 = vmul.f32 1.442695, %v2685_v43  ;;  %v6276_v48 = vpop.permute.xlu1 %6275  ;;  %v2872_v43 = vld [vmem:[#allocation13 + $0x88] sm:$0xff] }
 0xc42   : > { %v6278_v50 = vunpack.i.h.bf16 %v6276_v48  ;;  %v6277_v51 = vunpack.i.l.bf16 %v6276_v48 }
 0xc43   : > { %6349 = vpow2.f32 %v2687_v46  ;;  %v5776_v46 = vpack.c.bf16 %v2869_v42, %v2865_v40  ;;  %v2901_v42 = vld [vmem:[#allocation13 + $0x170] sm:$0xff] }
 0xc44   : > { %v5734_v52 = vpack.c.bf16 %v6278_v50, %v6277_v51  ;;  %6351 = vpow2.f32 %v2689_v45  ;;  %v2876_v45 = vld [vmem:[#allocation13 + $0xa8] sm:$0xff]  ;;  %v2874_v50 = vld [vmem:[#allocation13 + $0x98] sm:$0xff] }
 0xc45   : > { %v2799_v5 = vpop.permute.xlu1 %2798  ;;  %v5746_v48 = vpack.c.bf16 %v2876_v45, %v2872_v43  ;;  %v2878_v51 = vld [vmem:[#allocation13 + $0xb8] sm:$0xff]  ;;  %v2904_v45 = vld [vmem:[#allocation13 + $0x188] sm:$0xff] }
 0xc46   : > { %5735 = vmatprep.subr.bf16.mxu1 %v5734_v52 }
 0xc47   : > { %5737 = vmatpush3.bf16.msra.mxu1 %v5734_v52  ;;  %v2871_v52 = vld [vmem:[#allocation13 + $0x80] sm:$0xff] }
 0xc48   : > { %5739 = vmatprep.subr.bf16.mxu1 %v5738_v18 }
 0xc4d   : > { %v6350_v53 = vpop.eup %6349 }
 0xc4e   : > { %v2691_v54 = vsel %vm2082_vm5, %v6350_v53, 0.0  ;;  %v6352_v49 = vpop.eup %6351 }
 0xc4f   : > { %2692 = vadd.xlane.f32.xlu0 %v2691_v54  ;;  %v2694_v55 = vsel %vm2082_vm5, %v6352_v49, 0.0  ;;  %v2875_v54 = vld [vmem:[#allocation13 + $0xa0] sm:$0xff] }
 0xc53   : > { %2695 = vadd.xlane.f32.xlu0 %v2694_v55  ;;  %v2877_v55 = vld [vmem:[#allocation13 + $0xb0] sm:$0xff] }
 0xc69   : > { %2790 = vrot.lane.b32.xlu0 %v7599_v59, %s6863_s4 }
 0xc6d   : > { %2792 = vrot.lane.b32.xlu0 %v7597_v58, %s6863_s4 }
 0xcdc   : > { %v2693_v61 = vpop.xlane.xlu0 %2692 }
 0xcdd   : > { %6353 = vrcp.f32 %v2693_v61  ;;  %v5748_v61 = vpack.c.bf16 %v2875_v54, %v2871_v52  ;;  %v2903_v52 = vld [vmem:[#allocation13 + $0x180] sm:$0xff]  ;;  %v2905_v54 = vld [vmem:[#allocation13 + $0x190] sm:$0xff] }
 0xce0   : > { %v2696_v60 = vpop.xlane.xlu0 %2695 }
 0xce1   : > { %6355 = vrcp.f32 %v2696_v60 }
 0xce4   : > { %v2791_v58 = vpop.permute.xlu0 %2790 }
 0xce5   : > { %v2812_v6 = vsel %vm1092_vm1, %v7595_v57, %v2791_v58 }
 0xce6   : > { %v2814_v8 = vsel %vm1767_vm6, %v2812_v6, %v2799_v5  ;;  %v2880_v6 = vld [vmem:[#allocation13 + $0xc8] sm:$0xff] }
 0xce7   : > { %v6354_v62 = vpop.eup %6353 }
 0xce8   : > { %v2698_v63 = vmul.f32 %v6354_v62, %v6350_v53  ;;  %v2793_v9 = vpop.permute.xlu0 %2792  ;;  %v5778_v53 = vpack.c.bf16 %v2878_v51, %v2874_v50  ;;  %v2910_v51 = vld [vmem:[#allocation13 + $0x1b8] sm:$0xff] }
 0xce9   : > { %v2813_v12 = vsel %vm1092_vm1, %v7593_v56, %v2793_v9  ;;  %v2857_v56 = vld [vmem:[#allocation13 + $0x10] sm:$0xff] }
 0xcea   : > { %5484 = vmatprep.mubr.msk.f32.mxu1 %vm2082_vm5, %v2698_v63  ;;  %v5772_v47 = vpack.c.bf16 %v2861_v25, %v2857_v56  ;;  %v2889_v56 = vld [vmem:[#allocation13 + $0x110] sm:$0xff] }
 0xceb   : > { %v6356_v2 = vpop.eup %6355  ;;  %v2893_v25 = vld [vmem:[#allocation13 + $0x130] sm:$0xff] }
 0xcec   : > { %v2700_v3 = vmul.f32 %v6356_v2, %v6352_v49  ;;  %5773 = vmatpush1.bf16.msra.mxu0 %v5772_v47  ;;  %v2873_v49 = vld [vmem:[#allocation13 + $0x90] sm:$0xff]  ;;  %v2896_v47 = vld [vmem:[#allocation13 + $0x148] sm:$0xff] }
 0xced   : > { %5775 = vmatprep.subr.bf16.mxu0 %v5774_v32  ;;  %v5780_v60 = vpack.c.bf16 %v2877_v55, %v2873_v49  ;;  %v2895_v32 = vld [vmem:[#allocation13 + $0x140] sm:$0xff]  ;;  %v2909_v49 = vld [vmem:[#allocation13 + $0x1b0] sm:$0xff] }
 0xcee   : > { %5485 = vmatmul.mubr.msk.f32.vlgmr.msra.gmra.mrb[20].mxu1 %vm2082_vm5, %v2700_v3  ;;  %v5760_v40 = vpack.c.bf16 %v2899_v36, %v2895_v32  ;;  %v5796_v55 = vpack.c.bf16 %v2909_v49, %v2905_v54  ;;  %v3153_v32 = vld [vmem:[#allocation14 + $0x190] sm:$0xff]  ;;  %v3154_v36 = vld [vmem:[#allocation14 + $0x198] sm:$0xff] }
 0xcef   : > { %3005 = vmatprep.mubr.f32.mxu1 %v6859_v1 }
 0xcf0   : > { %5777 = vmatpush1.bf16.msra.mxu0 %v5776_v46  ;;  %v2908_v46 = vld [vmem:[#allocation13 + $0x1a8] sm:$0xff] }
 0xcf1   : > { %5779 = vmatprep.subr.bf16.mxu0 %v5778_v53  ;;  %v5762_v50 = vpack.c.bf16 %v2908_v46, %v2904_v45  ;;  %v2907_v53 = vld [vmem:[#allocation13 + $0x1a0] sm:$0xff]  ;;  %v3106_v45 = vld [vmem:[#allocation14 + $0x18] sm:$0xff] }
 0xcf4   : > { %5781 = vmatpush1.bf16.msra.mxu0 %v5780_v60  ;;  %v2916_v60 = vld [vmem:[#allocation13 + $0x1e8] sm:$0xff] }
 0xdc1   : > { %v5486_v4 = vpop.f32.mrb[20].mxu1 }
 0xdc2   : > { %2808 = vrot.lane.b32.xlu0 %v5486_v4, %s6862_s8  ;;  %v2779_v59 = vpop.f32.mrb[21].mxu1 }
 0xdc3   : > { %2806 = vrot.lane.b32.xlu1 %v2779_v59, %s6862_s8 }
 0xdc7   : > { %2800 = vrot.lane.b32.xlu1 %v5472_v27, %s6861_s0  ;;  %v2868_v27 = vld [vmem:[#allocation13 + $0x68] sm:$0xff] }
 0xe34   : > { %v2809_v13 = vpop.permute.xlu0 %2808 }
 0xe35   : > { %v2807_v7 = vpop.permute.xlu1 %2806 }
 0xe36   : > { %v2816_v10 = vsel %vm1769_vm7, %v2814_v8, %v2807_v7  ;;  %v2884_v7 = vld [vmem:[#allocation13 + $0xe8] sm:$0xff]  ;;  %v2882_v8 = vld [vmem:[#allocation13 + $0xd8] sm:$0xff] }
 0xe37   : > { %v2818_v11 = vadd.f32 %v2816_v10, %v7503_v21  ;;  %v2859_v21 = vld [vmem:[#allocation13 + $0x20] sm:$0xff]  ;;  %v5750_v9 = vpack.c.bf16 %v2884_v7, %v2880_v6  ;;  %v2886_v10 = vld [vmem:[#allocation13 + $0xf8] sm:$0xff]  ;;  %v2913_v7 = vld [vmem:[#allocation13 + $0x1d0] sm:$0xff] }
 0xe38   : > { %v5740_v23 = vpack.c.bf16 %v2859_v21, %v2855_v20  ;;  %v2887_v20 = vld [vmem:[#allocation13 + $0x100] sm:$0xff] }
 0xe39   : > { %v2801_v34 = vpop.permute.xlu1 %2800  ;;  %2821 = vadd.xlane.f32.xlu1 %v2818_v11  ;;  %v2891_v21 = vld [vmem:[#allocation13 + $0x120] sm:$0xff] }
 0xe3a   : > { %v2815_v33 = vsel %vm1767_vm6, %v2813_v12, %v2801_v34  ;;  %5741 = vmatpush1.bf16.msra.mxu1 %v5740_v23  ;;  %v2879_v12 = vld [vmem:[#allocation13 + $0xc0] sm:$0xff]  ;;  %v5782_v34 = vpack.c.bf16 %v2886_v10, %v2882_v8  ;;  %v5756_v23 = vpack.c.bf16 %v2891_v21, %v2887_v20  ;;  %v3120_v10 = vld [vmem:[#allocation14 + $0x88] sm:$0xff]  ;;  %v7670_v20 = vsub.s32 1, %v7464_v24 }
 0xe3b   : > { %v2817_v57 = vsel %vm1769_vm7, %v2815_v33, %v2809_v13  ;;  %v2881_v33 = vld [vmem:[#allocation13 + $0xd0] sm:$0xff] }
 0xe3c   : > { %v2819_v14 = vadd.f32 %v2817_v57, %v7507_v30  ;;  %v5742_v30 = vpack.c.bf16 %v2868_v27, %v2864_v26  ;;  %v2885_v57 = vld [vmem:[#allocation13 + $0xf0] sm:$0xff]  ;;  %5783 = vmatprep.subr.bf16.mxu0 %v5782_v34  ;;  %v5788_v26 = vpack.c.bf16 %v2893_v25, %v2889_v56  ;;  %v2900_v27 = vld [vmem:[#allocation13 + $0x168] sm:$0xff]  ;;  %v2852_v56 = vrot.slane %v2820_v19, %v7670_v20  ;;  %v3103_v25 = vld [vmem:[#allocation14] sm:$0xff] }
 0xe3d   : > { %v5784_v15 = vpack.c.bf16 %v2885_v57, %v2881_v33  ;;  %v5758_v29 = vpack.c.bf16 %v2900_v27, %v2896_v47  ;;  %v3152_v34 = vld [vmem:[#allocation14 + $0x188] sm:$0xff]  ;;  %v3135_v47 = vld [vmem:[#allocation14 + $0x100] sm:$0xff] }
 0xe3e   : > { %2823 = vadd.xlane.f32.xlu0 %v2819_v14  ;;  %5743 = vmatprep.subr.bf16.mxu1 %v5742_v30  ;;  %v2902_v30 = vld [vmem:[#allocation13 + $0x178] sm:$0xff]  ;;  %v3136_v27 = vld [vmem:[#allocation14 + $0x108] sm:$0xff] }
 0xe3f   : > { %5745 = vmatpush1.bf16.msra.mxu1 %v5744_v41  ;;  %5785 = vmatpush1.bf16.msra.mxu0 %v5784_v15  ;;  %v5790_v38 = vpack.c.bf16 %v2902_v30, %v2898_v28  ;;  %v2897_v41 = vld [vmem:[#allocation13 + $0x150] sm:$0xff]  ;;  %v3122_v30 = vld [vmem:[#allocation14 + $0x98] sm:$0xff] }
 0xe40   : > { %5747 = vmatprep.subr.bf16.mxu1 %v5746_v48  ;;  %5787 = vmatprep.subr.bf16.mxu0 %v5786_v22  ;;  %v5792_v43 = vpack.c.bf16 %v2901_v42, %v2897_v41  ;;  %v2906_v48 = vld [vmem:[#allocation13 + $0x198] sm:$0xff]  ;;  %v3121_v28 = vld [vmem:[#allocation14 + $0x90] sm:$0xff]  ;;  %v5836_v42 = vpack.c.bf16 %v3136_v27, %v3135_v47 }
 0xe41   : > { %v5806_v46 = vpack.c.bf16 %v3122_v30, %v3121_v28  ;;  %v3130_v47 = vld [vmem:[#allocation14 + $0xd8] sm:$0xff]  ;;  %v3161_v27 = vld [vmem:[#allocation14 + $0x1d0] sm:$0xff] }
 0xe42   : > { %v3162_v28 = vld [vmem:[#allocation14 + $0x1d8] sm:$0xff] }
 0xe43   : > { %5749 = vmatpush1.bf16.msra.mxu1 %v5748_v61  ;;  %5789 = vmatpush1.bf16.msra.mxu0 %v5788_v26  ;;  %v2912_v61 = vld [vmem:[#allocation13 + $0x1c8] sm:$0xff] }
 0xe44   : > { %5751 = vmatprep.subr.bf16.mxu1 %v5750_v9  ;;  %5791 = vmatprep.subr.bf16.mxu0 %v5790_v38  ;;  %v3119_v9 = vld [vmem:[#allocation14 + $0x80] sm:$0xff]  ;;  %v3104_v26 = vld [vmem:[#allocation14 + $0x8] sm:$0xff] }
 0xe45   : > { %v5804_v41 = vpack.c.bf16 %v3104_v26, %v3103_v25  ;;  %v3144_v25 = vld [vmem:[#allocation14 + $0x148] sm:$0xff]  ;;  %v3129_v26 = vld [vmem:[#allocation14 + $0xd0] sm:$0xff] }
 0xe47   : > { %5793 = vmatpush1.bf16.msra.mxu0 %v5792_v43  ;;  %v3105_v43 = vld [vmem:[#allocation14 + $0x10] sm:$0xff] }
 0xec6   : > { %v2822_v62 = vpop.xlane.xlu1 %2821 }
 0xec7   : > { %v2825_v63 = vmul.f32 0.0078125, %v2822_v62  ;;  %v2914_v62 = vld [vmem:[#allocation13 + $0x1d8] sm:$0xff] }
 0xec9   : > { %v7649_v2 = vsub.f32 %v2818_v11, %v2825_v63  ;;  %v2883_v11 = vld [vmem:[#allocation13 + $0xe0] sm:$0xff]  ;;  %v5766_v63 = vpack.c.bf16 %v2916_v60, %v2912_v61  ;;  %v3108_v61 = vld [vmem:[#allocation14 + $0x28] sm:$0xff] }
 0xeca   : > { %v5752_v13 = vpack.c.bf16 %v2883_v11, %v2879_v12  ;;  %v3151_v12 = vld [vmem:[#allocation14 + $0x180] sm:$0xff]  ;;  %v5802_v11 = vpack.c.bf16 %v3120_v10, %v3119_v9  ;;  %v3109_v9 = vld [vmem:[#allocation14 + $0x30] sm:$0xff]  ;;  %v3110_v10 = vld [vmem:[#allocation14 + $0x38] sm:$0xff] }
 0xecb   : > { %v2824_v3 = vpop.xlane.xlu0 %2823  ;;  %v2829_v4 = vmul.f32 %v7649_v2, %v7649_v2 }
 0xecc   : > { %v2826_v59 = vmul.f32 0.0078125, %v2824_v3  ;;  %5753 = vmatpush1.bf16.msra.mxu1 %v5752_v13  ;;  %v2918_v3 = vld [vmem:[#allocation13 + $0x1f8] sm:$0xff]  ;;  %v5834_v13 = vpack.c.bf16 %v3152_v34, %v3151_v12  ;;  %v3141_v34 = vld [vmem:[#allocation14 + $0x130] sm:$0xff] }
 0xecd   : > { %2831 = vadd.xlane.f32.xlu0 %v2829_v4  ;;  %v2911_v4 = vld [vmem:[#allocation13 + $0x1c0] sm:$0xff] }
 0xece   : > { %v7653_v58 = vsub.f32 %v2819_v14, %v2826_v59  ;;  %v2888_v14 = vld [vmem:[#allocation13 + $0x108] sm:$0xff]  ;;  %v2915_v59 = vld [vmem:[#allocation13 + $0x1e0] sm:$0xff] }
 0xecf   : > { %v5754_v18 = vpack.c.bf16 %v2892_v16, %v2888_v14  ;;  %v5768_v6 = vpack.c.bf16 %v2915_v59, %v2911_v4  ;;  %v3140_v4 = vld [vmem:[#allocation14 + $0x128] sm:$0xff]  ;;  %v3125_v59 = vld [vmem:[#allocation14 + $0xb0] sm:$0xff] }
 0xed0   : > { %v2830_v5 = vmul.f32 %v7653_v58, %v7653_v58 }
 0xed1   : > { %5755 = vmatprep.subr.bf16.mxu1 %v5754_v18  ;;  %v7664_v18 = vsub.s32 0, %v7464_v24 }
 0xed2   : > { %2833 = vadd.xlane.f32.xlu1 %v2830_v5  ;;  %5757 = vmatpush1.bf16.msra.mxu1 %v5756_v23  ;;  %v5798_v5 = vpack.c.bf16 %v2918_v3, %v2914_v62  ;;  %v3139_v3 = vld [vmem:[#allocation14 + $0x120] sm:$0xff] }
 0xed3   : > { %5759 = vmatprep.subr.bf16.mxu1 %v5758_v29  ;;  %v2846_v21 = vrot.slane %v2820_v19, %v7664_v18  ;;  %v3111_v19 = vld [vmem:[#allocation14 + $0x40] sm:$0xff] }
 0xed6   : > { %5761 = vmatpush1.bf16.msra.mxu1 %v5760_v40 }
 0xed7   : > { %5763 = vmatprep.subr.bf16.mxu1 %v5762_v50  ;;  %v3137_v50 = vld [vmem:[#allocation14 + $0x110] sm:$0xff] }
 0xee3   : > { %1755 = vrot.lane.b32.xlu0 %v7535_v35, %s6863_s4  ;;  %1759 = vrot.lane.b32.xlu1 %v7537_v37, %s6861_s0  ;;  %v5794_v35 = vpack.c.bf16 %v2910_v51, %v2906_v48  ;;  %v5764_v37 = vpack.c.bf16 %v2907_v53, %v2903_v52  ;;  %v5838_v48 = vpack.c.bf16 %v3154_v36, %v3153_v32  ;;  %v3138_v51 = vld [vmem:[#allocation14 + $0x118] sm:$0xff]  ;;  %v3123_v52 = vld [vmem:[#allocation14 + $0xa0] sm:$0xff]  ;;  %v3124_v53 = vld [vmem:[#allocation14 + $0xa8] sm:$0xff] }
 0xee4   : > { %v5840_v49 = vpack.c.bf16 %v3138_v51, %v3137_v50  ;;  %v5810_v62 = vpack.c.bf16 %v3124_v53, %v3123_v52  ;;  %v3113_v32 = vld [vmem:[#allocation14 + $0x50] sm:$0xff]  ;;  %v3114_v36 = vld [vmem:[#allocation14 + $0x58] sm:$0xff] }
 0xee5   : > { %5795 = vmatprep.subr.bf16.mxu0 %v5794_v35  ;;  %5765 = vmatpush1.bf16.msra.mxu1 %v5764_v37  ;;  %v3155_v35 = vld [vmem:[#allocation14 + $0x1a0] sm:$0xff]  ;;  %v3156_v37 = vld [vmem:[#allocation14 + $0x1a8] sm:$0xff]  ;;  %v5824_v50 = vpack.c.bf16 %v3114_v36, %v3113_v32 }
 0xee6   : > { %5797 = vmatpush1.bf16.msra.mxu0 %v5796_v55  ;;  %5767 = vmatprep.subr.bf16.mxu1 %v5766_v63  ;;  %v3107_v55 = vld [vmem:[#allocation14 + $0x20] sm:$0xff]  ;;  %v5842_v63 = vpack.c.bf16 %v3156_v37, %v3155_v35  ;;  %v3116_v37 = vld [vmem:[#allocation14 + $0x68] sm:$0xff] }
 0xee7   : > { %1763 = vrot.lane.b32.xlu1 %v7539_v39, %s6862_s8  ;;  %v2917_v39 = vld [vmem:[#allocation13 + $0x1f0] sm:$0xff]  ;;  %5799 = vmatprep.subr.bf16.mxu0 %v5798_v5  ;;  %v3126_v5 = vld [vmem:[#allocation14 + $0xb8] sm:$0xff]  ;;  %v3115_v35 = vld [vmem:[#allocation14 + $0x60] sm:$0xff] }
 0xee8   : > { %v5800_v8 = vpack.c.bf16 %v2917_v39, %v2913_v7  ;;  %v3158_v7 = vld [vmem:[#allocation14 + $0x1b8] sm:$0xff]  ;;  %v5812_v39 = vpack.c.bf16 %v3108_v61, %v3107_v55  ;;  %v5814_v12 = vpack.c.bf16 %v3126_v5, %v3125_v59  ;;  %v3133_v61 = vld [vmem:[#allocation14 + $0xf0] sm:$0xff] }
 0xee9   : > { %5769 = vmatpush1.bf16.msra.mxu1 %v5768_v6  ;;  %v3157_v6 = vld [vmem:[#allocation14 + $0x1b0] sm:$0xff]  ;;  %v3118_v5 = vld [vmem:[#allocation14 + $0x78] sm:$0xff] }
 0xeea   : > { %5801 = vmatpush1.bf16.msra.mxu0 %v5800_v8  ;;  %5803 = vmatprep.subr.bf16.mxu1 %v5802_v11  ;;  %v5844_v8 = vpack.c.bf16 %v3140_v4, %v3139_v3  ;;  %v5846_v11 = vpack.c.bf16 %v3158_v7, %v3157_v6  ;;  %v3166_v4 = vld [vmem:[#allocation14 + $0x1f8] sm:$0xff]  ;;  %v3117_v59 = vld [vmem:[#allocation14 + $0x70] sm:$0xff] }
 0xeeb   : > { %5835 = vmatprep.subr.bf16.mxu0 %v5834_v13  ;;  %v3142_v13 = vld [vmem:[#allocation14 + $0x138] sm:$0xff]  ;;  %v5832_v7 = vpack.c.bf16 %v3118_v5, %v3117_v59 }
 0xf5a   : > { %v2832_v33 = vpop.xlane.xlu0 %2831 }
 0xf5b   : > { %v2835_v57 = vmul.f32 0.0078125, %v2832_v33  ;;  %v3127_v33 = vld [vmem:[#allocation14 + $0xc0] sm:$0xff] }
 0xf5d   : > { %v2837_v15 = vadd.f32 1e-05, %v2835_v57  ;;  %v3128_v57 = vld [vmem:[#allocation14 + $0xc8] sm:$0xff] }
 0xf5f   : > { %6357 = vrsqrt.f32 %v2837_v15  ;;  %v2834_v14 = vpop.xlane.xlu1 %2833  ;;  %v3159_v15 = vld [vmem:[#allocation14 + $0x1c0] sm:$0xff] }
 0xf60   : > { %v2836_v16 = vmul.f32 0.0078125, %v2834_v14  ;;  %v3160_v14 = vld [vmem:[#allocation14 + $0x1c8] sm:$0xff] }
 0xf62   : > { %v2838_v17 = vadd.f32 1e-05, %v2836_v16  ;;  %v5816_v16 = vpack.c.bf16 %v3110_v10, %v3109_v9  ;;  %v2931_v10 = vsub.s32 2, %v7464_v24 }
 0xf64   : > { %6359 = vrsqrt.f32 %v2838_v17  ;;  %v5848_v17 = vpack.c.bf16 %v3142_v13, %v3141_v34 }
 0xf69   : > { %v6358_v22 = vpop.eup %6357 }
 0xf6a   : > { %v2841_v23 = vmul.f32 %v6358_v22, %v7649_v2  ;;  %v5818_v22 = vpack.c.bf16 %v3128_v57, %v3127_v33 }
 0xf6c   : > { %v2847_v29 = vmul.f32 %v2846_v21, %v2841_v23  ;;  %v5850_v23 = vpack.c.bf16 %v3160_v14, %v3159_v15 }
 0xf6e   : > { %v6360_v38 = vpop.eup %6359  ;;  %v7675_v40 = vadd.f32 %v2852_v56, %v2847_v29 }
 0xf6f   : > { %v2842_v2 = vmul.f32 %v6360_v38, %v7653_v58  ;;  %v5808_v58 = vpack.c.bf16 %v3106_v45, %v3105_v43  ;;  %v5822_v38 = vpack.c.bf16 %v3130_v47, %v3129_v26  ;;  %v3146_v43 = vld [vmem:[#allocation14 + $0x158] sm:$0xff]  ;;  %v3131_v45 = vld [vmem:[#allocation14 + $0xe0] sm:$0xff] }
 0xf70   : > { %3006 = vmatmul.mubr.f32.vlgmr.msra.gmra.mrb[22].mxu1 %v7675_v40  ;;  %3083 = vmatmul.mubr.f32.vlgmr.msra.gmra.mrb[20].mxu0 %v7675_v40 }
 0xf71   : > { %3011 = vmatprep.mubr.f32.mxu1 %v6859_v1  ;;  %3088 = vmatprep.mubr.f32.mxu0 %v6859_v1  ;;  %v2848_v54 = vmul.f32 %v2846_v21, %v2842_v2  ;;  %v3112_v21 = vld [vmem:[#allocation14 + $0x48] sm:$0xff] }
 0xf72   : > { %5805 = vmatpush3.bf16.msra.mxu1 %v5804_v41  ;;  %5837 = vmatpush3.bf16.msra.mxu0 %v5836_v42  ;;  %v5820_v29 = vpack.c.bf16 %v3112_v21, %v3111_v19  ;;  %v5854_v41 = vpack.c.bf16 %v3162_v28, %v3161_v27  ;;  %v3145_v42 = vld [vmem:[#allocation14 + $0x150] sm:$0xff]  ;;  %v3132_v2 = vld [vmem:[#allocation14 + $0xe8] sm:$0xff] }
 0xf73   : > { %v7682_v60 = vadd.f32 %v2852_v56, %v2848_v54  ;;  %5807 = vmatprep.subr.bf16.mxu1 %v5806_v46  ;;  %5839 = vmatprep.subr.bf16.mxu0 %v5838_v48  ;;  %v3143_v56 = vld [vmem:[#allocation14 + $0x140] sm:$0xff]  ;;  %v3164_v48 = vld [vmem:[#allocation14 + $0x1e8] sm:$0xff]  ;;  %v5856_v51 = vpack.c.bf16 %v3146_v43, %v3145_v42  ;;  %v5826_v52 = vpack.c.bf16 %v3132_v2, %v3131_v45 }
 0xf74   : > { %v5852_v30 = vpack.c.bf16 %v3144_v25, %v3143_v56  ;;  %v3163_v46 = vld [vmem:[#allocation14 + $0x1e0] sm:$0xff] }
 0xf75   : > { %3012 = vmatmul.mubr.f32.gmra.mrb[24].mxu1 %v7682_v60  ;;  %3089 = vmatmul.mubr.f32.gmra.mrb[22].mxu0 %v7682_v60  ;;  %v5858_v53 = vpack.c.bf16 %v3164_v48, %v3163_v46  ;;  %v3147_v54 = vld [vmem:[#allocation14 + $0x160] sm:$0xff]  ;;  %v1760_v46 = vpop.permute.xlu1 %1759 }
 0xf76   : > { %5809 = vmatpush3.bf16.msra.mxu1 %v5808_v58  ;;  %5841 = vmatpush3.bf16.msra.mxu0 %v5840_v49  ;;  %v5828_v58 = vpack.c.bf16 %v3116_v37, %v3115_v35  ;;  %v3148_v49 = vld [vmem:[#allocation14 + $0x168] sm:$0xff] }
 0xf77   : > { %5811 = vmatprep.subr.bf16.mxu1 %v5810_v62  ;;  %5843 = vmatprep.subr.bf16.mxu0 %v5842_v63  ;;  %v5860_v55 = vpack.c.bf16 %v3148_v49, %v3147_v54  ;;  %v3134_v62 = vld [vmem:[#allocation14 + $0xf8] sm:$0xff]  ;;  %v3165_v63 = vld [vmem:[#allocation14 + $0x1f0] sm:$0xff]  ;;  %v1756_v54 = vpop.permute.xlu0 %1755 }
 0xf78   : > { %v5830_v3 = vpack.c.bf16 %v3134_v62, %v3133_v61  ;;  %v5862_v6 = vpack.c.bf16 %v3166_v4, %v3165_v63  ;;  %v1766_v4 = vsel %vm1092_vm1, %v7525_v31, %v1756_v54  ;;  %v3447_v31 = vld [vmem:[#allocation17] sm:$0xff]  ;;  %v3462_v54 = vld [vmem:[#allocation17 + $0x78] sm:$0xff] }
 0xf7a   : > { %5813 = vmatpush3.bf16.msra.mxu1 %v5812_v39  ;;  %5845 = vmatpush3.bf16.msra.mxu0 %v5844_v8  ;;  %v3149_v39 = vld [vmem:[#allocation14 + $0x170] sm:$0xff]  ;;  %v3150_v8 = vld [vmem:[#allocation14 + $0x178] sm:$0xff] }
 0xf7b   : > { %5815 = vmatprep.subr.bf16.mxu1 %v5814_v12  ;;  %5847 = vmatprep.subr.bf16.mxu0 %v5846_v11  ;;  %v5864_v9 = vpack.c.bf16 %v3150_v8, %v3149_v39  ;;  %v2919_v12 = vld [vmem:[%s8032_s11] sm:$0xf]  ;;  %v2935_v11 = vsub.s32 3, %v7464_v24 }
 0xf7c   : > { %v2924_v34 = vrot.slane %v2919_v12, %v7664_v18  ;;  %v2932_v13 = vrot.slane %v2919_v12, %v2931_v10  ;;  %v2928_v33 = vrot.slane %v2919_v12, %v7670_v20 }
 0xf7d   : > { %v2936_v57 = vrot.slane %v2919_v12, %v2935_v11  ;;  %v6371_v12 = vld [vmem:[%s7389_s7] sm:$0xff]  ;;  %s8039_s7 = sld [smem:[#allocation56_spill]] }
 0xf7e   : > { %5817 = vmatpush3.bf16.msra.mxu1 %v5816_v16  ;;  %5849 = vmatpush3.bf16.msra.mxu0 %v5848_v17 }
 0xf7f   : > { %5819 = vmatprep.subr.bf16.mxu1 %v5818_v22  ;;  %5851 = vmatprep.subr.bf16.mxu0 %v5850_v23 }
 0xf82   : > { %5821 = vmatpush3.bf16.msra.mxu1 %v5820_v29  ;;  %5853 = vmatpush3.bf16.msra.mxu0 %v5852_v30 }
 0xf83   : > { %5823 = vmatprep.subr.bf16.mxu1 %v5822_v38  ;;  %5855 = vmatprep.subr.bf16.mxu0 %v5854_v41  ;;  %s7845_s21 = scalar_lea.hbm %s8039_s7, %s5050_s19 }
 0xf86   : > { %5825 = vmatpush3.bf16.msra.mxu1 %v5824_v50  ;;  %5857 = vmatpush3.bf16.msra.mxu0 %v5856_v51  ;;  %v5024_v51 = vld [vmem:[%s8033_s20] ss:$0 sm:$0xff]  ;;  %s4719_s20 = sshll.u32 %s7747_s14, 4  ;;  %s7839_s20 = int_to_ptr.vmem [resolvable:$true] %s4719_s20 }
 0xf87   : > { %5827 = vmatprep.subr.bf16.mxu1 %v5826_v52  ;;  %5859 = vmatprep.subr.bf16.mxu0 %v5858_v53  ;;  %s6712_s24 = scalar_lea.vmem %s7839_s20, 256 }
 0xf88   : > { %p6713_p3 = scmp.ne.s32.totalorder %s7839_s20, %s6712_s24 }
 0xf8a   : > { %5829 = vmatpush3.bf16.msra.mxu1 %v5828_v58  ;;  %5861 = vmatpush3.bf16.msra.mxu0 %v5860_v55  ;;  %v1764_v58 = vpop.permute.xlu1 %1763  ;;  %p6714_p4 = pnand %p6713_p3, %p8040_p6 }
 0xf8b   : > { %5831 = vmatprep.subr.bf16.mxu1 %v5830_v3  ;;  %5863 = vmatprep.subr.bf16.mxu0 %v5862_v6  ;;  %v1768_v6 = vsel %vm1767_vm6, %v1766_v4, %v1760_v46  ;;  %v3464_v4 = vld [vmem:[#allocation17 + $0x88] sm:$0xff] }
 0xf8c   : > { %v1770_v39 = vsel %vm1769_vm7, %v1768_v6, %v1764_v58  ;;  %v3367_v6 = vld [vmem:[#allocation16 + $0x30] sm:$0xff]  ;;  %p6715_p8 = pneg %p6714_p4 }
 0xf8e   : > { %5833 = vmatpush3.bf16.msra.mxu1 %v5832_v7  ;;  %5865 = vmatpush3.bf16.msra.mxu0 %v5864_v9 }
 0xf8f   : > { %5866 = vmatprep.subr.bf16.mxu1 %v6858_v0 }
0x1043   : > { %v3007_v15 = vpop.f32.mrb[22].mxu1  ;;  %v3084_v14 = vpop.f32.mrb[20].mxu0 }
0x1044   : > { %v3008_v16 = vadd.f32 %v3007_v15, %v2924_v34  ;;  %v3085_v17 = vadd.f32 %v3084_v14, %v2932_v13  ;;  %v3009_v19 = vpop.f32.mrb[23].mxu1  ;;  %v3086_v21 = vpop.f32.mrb[21].mxu0  ;;  %v3449_v14 = vld [vmem:[#allocation17 + $0x10] sm:$0xff] }
0x1045   : > { %v3010_v22 = vadd.f32 %v3009_v19, %v2928_v33  ;;  %v3087_v23 = vadd.f32 %v3086_v21, %v2936_v57  ;;  %v5892_v19 = vpack.c.bf16 %v3449_v14, %v3447_v31  ;;  %v3361_v21 = vld [vmem:[#allocation16] sm:$0xff]  ;;  %v3370_v31 = vld [vmem:[#allocation16 + $0x48] sm:$0xff] }
0x1046   : > { %v3095_v26 = vmax.f32 %v3008_v16, 0.0  ;;  %v3097_v47 = vmax.f32 %v3085_v17, 0.0  ;;  %v3452_v16 = vld [vmem:[#allocation17 + $0x28] sm:$0xff]  ;;  %v3454_v17 = vld [vmem:[#allocation17 + $0x38] sm:$0xff] }
0x1047   : > { %v3096_v56 = vmax.f32 %v3010_v22, 0.0  ;;  %v3098_v25 = vmax.f32 %v3087_v23, 0.0  ;;  %v3362_v22 = vld [vmem:[#allocation16 + $0x8] sm:$0xff]  ;;  %v3451_v23 = vld [vmem:[#allocation17 + $0x20] sm:$0xff] }
0x1048   : > { %v3013_v27 = vpop.f32.mrb[24].mxu1  ;;  %v3090_v28 = vpop.f32.mrb[22].mxu0 }
0x1049   : > { %v3014_v29 = vadd.f32 %v3013_v27, %v2924_v34  ;;  %v3091_v30 = vadd.f32 %v3090_v28, %v2932_v13  ;;  %v3015_v32 = vpop.f32.mrb[25].mxu1  ;;  %v3092_v36 = vpop.f32.mrb[23].mxu0  ;;  %3238 = vmatprep.mubr.f32.mxu1 %v3096_v56  ;;  %3313 = vmatprep.mubr.f32.mxu0 %v3098_v25  ;;  %v1771_v34 = vadd.f32 %v6371_v12, %v1770_v39  ;;  %v3453_v25 = vld [vmem:[#allocation17 + $0x30] sm:$0xff]  ;;  %v3364_v28 = vld [vmem:[#allocation16 + $0x18] sm:$0xff]  ;;  %v3463_v39 = vld [vmem:[#allocation17 + $0x80] sm:$0xff] }
0x104a   : > { %v3016_v38 = vadd.f32 %v3015_v32, %v2928_v33  ;;  %v3093_v41 = vadd.f32 %v3092_v36, %v2936_v57  ;;  %3239 = vmatmul.mubr.f32.vlgmr.msra.gmra.mrb[26].mxu1 %v3095_v26  ;;  %3314 = vmatmul.mubr.f32.vlgmr.msra.gmra.mrb[24].mxu0 %v3097_v47  ;;  %v3448_v33 = vld [vmem:[#allocation17 + $0x8] sm:$0xff]  ;;  %v3450_v57 = vld [vmem:[#allocation17 + $0x18] sm:$0xff]  ;;  %v5867_v56 = vpack.c.bf16 %v3362_v22, %v3361_v21  ;;  %v3363_v27 = vld [vmem:[#allocation16 + $0x10] sm:$0xff] }
0x104b   : > { %v3099_v45 = vmax.f32 %v3014_v29, 0.0  ;;  %v3101_v2 = vmax.f32 %v3091_v30, 0.0  ;;  %v5890_v15 = vpack.c.bf16 %v3450_v57, %v3448_v33  ;;  %v3456_v26 = vld [vmem:[#allocation17 + $0x48] sm:$0xff]  ;;  %v3458_v47 = vld [vmem:[#allocation17 + $0x58] sm:$0xff]  ;;  %v5870_v30 = vpack.c.bf16 %v3364_v28, %v3363_v27  ;;  %v3455_v32 = vld [vmem:[#allocation17 + $0x40] sm:$0xff] }
0x104c   : > { %v3100_v42 = vmax.f32 %v3016_v38, 0.0  ;;  %v3102_v43 = vmax.f32 %v3093_v41, 0.0  ;;  %5868 = vmatpush3.bf16.msra.mxu1 %v5867_v56  ;;  %v5898_v29 = vpack.c.bf16 %v3458_v47, %v3456_v26  ;;  %v3457_v36 = vld [vmem:[#allocation17 + $0x50] sm:$0xff]  ;;  %v3369_v57 = vld [vmem:[#allocation16 + $0x40] sm:$0xff]  ;;  %v3478_v27 = vld [vmem:[#allocation17 + $0xf8] sm:$0xff] }
0x104d   : > { %5891 = vmatprep.subr.bf16.mxu0 %v5890_v15  ;;  %5869 = vmatprep.subr.bf16.mxu1 %v6858_v0  ;;  %v5900_v38 = vpack.c.bf16 %v3457_v36, %v3455_v32  ;;  %v3467_v15 = vld [vmem:[#allocation17 + $0xa0] sm:$0xff]  ;;  %v5879_v14 = vpack.c.bf16 %v3370_v31, %v3369_v57  ;;  %v3371_v22 = vld [vmem:[#allocation16 + $0x50] sm:$0xff] }
0x104e   : > { %3243 = vmatprep.mubr.f32.mxu1 %v3100_v42  ;;  %3318 = vmatprep.mubr.f32.mxu0 %v3102_v43  ;;  %v3471_v56 = vld [vmem:[#allocation17 + $0xc0] sm:$0xff]  ;;  %v3473_v26 = vld [vmem:[#allocation17 + $0xd0] sm:$0xff] }
0x104f   : > { %3244 = vmatmul.mubr.f32.gmra.mrb[28].mxu1 %v3099_v45  ;;  %3319 = vmatmul.mubr.f32.gmra.mrb[26].mxu0 %v3101_v2  ;;  %v5916_v47 = vpack.c.bf16 %v3473_v26, %v3471_v56  ;;  %v3475_v32 = vld [vmem:[#allocation17 + $0xe0] sm:$0xff] }
0x1050   : > { %3543 = vmatprep.mubr.f32.mxu0 %v6859_v1  ;;  %5519 = vmatprep.mubr.msk.f32.mxu1 %vm6860_vm0, %v6859_v1 }
0x1051   : > { %5893 = vmatpush1.bf16.msra.mxu0 %v5892_v19  ;;  %5871 = vmatpush3.bf16.msra.mxu1 %v5870_v30  ;;  %v3472_v19 = vld [vmem:[#allocation17 + $0xc8] sm:$0xff] }
0x1052   : > { %5872 = vmatprep.subr.bf16.mxu1 %v6858_v0  ;;  %v3374_v30 = vld [vmem:[#allocation16 + $0x68] sm:$0xff] }
0x111d   : > { %v5166_v48 = vpop.f32.mrb[26].mxu1  ;;  %v5204_v50 = vpop.f32.mrb[24].mxu0 }
0x111e   : > { %v5167_v52 = vpop.f32.mrb[27].mxu1  ;;  %v5205_v53 = vpop.f32.mrb[25].mxu0 }
0x111f   : > { %v5168_v35 = vadd.f32 %v5167_v52, %v5166_v48  ;;  %v5206_v37 = vadd.f32 %v5205_v53, %v5204_v50 }
0x1121   : > { %v3241_v49 = vadd.f32 %v5168_v35, %v5024_v51 }
0x1122   : > { %v5169_v55 = vpop.f32.mrb[28].mxu1  ;;  %v5207_v61 = vpop.f32.mrb[26].mxu0 }
0x1123   : > { %v3316_v62 = vadd.f32 %v5206_v37, %v3241_v49  ;;  %v5170_v63 = vpop.f32.mrb[29].mxu1  ;;  %v5208_v3 = vpop.f32.mrb[27].mxu0  ;;  %v3460_v37 = vld [vmem:[#allocation17 + $0x68] sm:$0xff]  ;;  %v3365_v49 = vld [vmem:[#allocation16 + $0x20] sm:$0xff] }
0x1124   : > { %v5171_v59 = vadd.f32 %v5170_v63, %v5169_v55  ;;  %v5209_v5 = vadd.f32 %v5208_v3, %v5207_v61  ;;  %v5902_v58 = vpack.c.bf16 %v3462_v54, %v3460_v37  ;;  %v3366_v55 = vld [vmem:[#allocation16 + $0x28] sm:$0xff]  ;;  %v3459_v61 = vld [vmem:[#allocation17 + $0x60] sm:$0xff]  ;;  %v3461_v63 = vld [vmem:[#allocation17 + $0x70] sm:$0xff] }
0x1125   : > { %v3324_v7 = vadd.f32 %v3316_v62, %v7675_v40  ;;  %v5894_v40 = vpack.c.bf16 %v3454_v17, %v3452_v16  ;;  %v5873_v62 = vpack.c.bf16 %v3366_v55, %v3365_v49  ;;  %v5904_v3 = vpack.c.bf16 %v3461_v63, %v3459_v61  ;;  %v3469_v16 = vld [vmem:[#allocation17 + $0xb0] sm:$0xff] }
0x1126   : > { %v3246_v8 = vadd.f32 %v5171_v59, %v5024_v51  ;;  %v3466_v59 = vld [vmem:[#allocation17 + $0x98] sm:$0xff]  ;;  %v5912_v17 = vpack.c.bf16 %v3469_v16, %v3467_v15  ;;  %v3326_v55 = vld [vmem:[%s8034_s6] sm:$0x3] }
0x1127   : > { %3327 = vadd.xlane.f32.xlu0 %v3324_v7  ;;  %5895 = vmatprep.subr.bf16.mxu0 %v5894_v40  ;;  %v3474_v40 = vld [vmem:[#allocation17 + $0xd8] sm:$0xff]  ;;  %v3352_v61 = vrot.slane %v3326_v55, %v7664_v18  ;;  %v1772_v63 = vld [vmem:[%s8035_s25] sm:$0x3]  ;;  %s4701_s25 = scalar_lea.sflag [#allocation4], %s7373_s18 }
0x1128   : > { %v3321_v9 = vadd.f32 %v5209_v5, %v3246_v8  ;;  %5874 = vmatpush3.bf16.msra.mxu1 %v5873_v62  ;;  %v5906_v5 = vpack.c.bf16 %v3466_v59, %v3464_v4  ;;  %v5914_v21 = vpack.c.bf16 %v3474_v40, %v3472_v19  ;;  %v3358_v4 = vrot.slane %v3326_v55, %v7670_v20 }
0x1129   : > { %5875 = vmatprep.subr.bf16.mxu1 %v6858_v0 }
0x112a   : > { %v3325_v13 = vadd.f32 %v3321_v9, %v7682_v60  ;;  %v5896_v60 = vpack.c.bf16 %v3453_v25, %v3451_v23  ;;  %v3465_v9 = vld [vmem:[#allocation17 + $0x90] sm:$0xff]  ;;  %v3372_v23 = vld [vmem:[#allocation16 + $0x58] sm:$0xff] }
0x112b   : > { %1773 = vadd.xlane.f32.xlu0 %v1771_v34  ;;  %v5908_v12 = vpack.c.bf16 %v3465_v9, %v3463_v39  ;;  %v5882_v25 = vpack.c.bf16 %v3372_v23, %v3371_v22  ;;  %v1793_v9 = vrot.slane %v1772_v63, %v7670_v20 }
0x112c   : > { %3329 = vadd.xlane.f32.xlu1 %v3325_v13  ;;  %5897 = vmatpush1.bf16.msra.mxu0 %v5896_v60  ;;  %v3476_v60 = vld [vmem:[#allocation17 + $0xe8] sm:$0xff] }
0x112d   : > { %5899 = vmatprep.subr.bf16.mxu0 %v5898_v29  ;;  %v5918_v28 = vpack.c.bf16 %v3478_v27, %v3476_v60  ;;  %v3373_v29 = vld [vmem:[#allocation16 + $0x60] sm:$0xff] }
0x112e   : > { %v5885_v36 = vpack.c.bf16 %v3374_v30, %v3373_v29 }
0x1130   : > { %5901 = vmatpush1.bf16.msra.mxu0 %v5900_v38  ;;  %v3477_v38 = vld [vmem:[#allocation17 + $0xf0] sm:$0xff] }
0x1131   : > { %5903 = vmatprep.subr.bf16.mxu0 %v5902_v58 }
0x1134   : > { %5905 = vmatpush1.bf16.msra.mxu0 %v5904_v3 }
0x1135   : > { %5907 = vmatprep.subr.bf16.mxu0 %v5906_v5  ;;  %v1788_v5 = vrot.slane %v1772_v63, %v7664_v18 }
0x1138   : > { %5909 = vmatpush1.bf16.msra.mxu0 %v5908_v12 }
0x11b4   : > { %v3328_v41 = vpop.xlane.xlu0 %3327 }
0x11b5   : > { %v3331_v42 = vmul.f32 0.0078125, %v3328_v41  ;;  %v5920_v41 = vpack.c.bf16 %v3477_v38, %v3475_v32 }
0x11b7   : > { %v7713_v43 = vsub.f32 %v3324_v7, %v3331_v42  ;;  %v3368_v7 = vld [vmem:[#allocation16 + $0x38] sm:$0xff]  ;;  %v3375_v42 = vld [vmem:[#allocation16 + $0x70] sm:$0xff] }
0x11b8   : > { %v1774_v45 = vpop.xlane.xlu0 %1773  ;;  %v5876_v8 = vpack.c.bf16 %v3368_v7, %v3367_v6 }
0x11b9   : > { %v1776_v2 = vmul.f32 0.0078125, %v1774_v45  ;;  %v3330_v46 = vpop.xlane.xlu1 %3329  ;;  %v3335_v48 = vmul.f32 %v7713_v43, %v7713_v43  ;;  %v3376_v45 = vld [vmem:[#allocation16 + $0x78] sm:$0xff] }
0x11ba   : > { %v3332_v50 = vmul.f32 0.0078125, %v3330_v46  ;;  %5877 = vmatpush3.bf16.msra.mxu1 %v5876_v8 }
0x11bb   : > { %v7717_v51 = vsub.f32 %v1771_v34, %v1776_v2  ;;  %3337 = vadd.xlane.f32.xlu0 %v3335_v48  ;;  %v3468_v34 = vld [vmem:[#allocation17 + $0xa8] sm:$0xff]  ;;  %5878 = vmatprep.subr.bf16.mxu1 %v6858_v0  ;;  %v5888_v2 = vpack.c.bf16 %v3376_v45, %v3375_v42 }
0x11bc   : > { %v7719_v52 = vsub.f32 %v3325_v13, %v3332_v50  ;;  %v3470_v13 = vld [vmem:[#allocation17 + $0xb8] sm:$0xff] }
0x11bd   : > { %v1778_v53 = vmul.f32 %v7717_v51, %v7717_v51  ;;  %v5910_v33 = vpack.c.bf16 %v3470_v13, %v3468_v34 }
0x11be   : > { %v3336_v35 = vmul.f32 %v7719_v52, %v7719_v52  ;;  %5880 = vmatpush3.bf16.msra.mxu1 %v5879_v14 }
0x11bf   : > { %1779 = vadd.xlane.f32.xlu0 %v1778_v53  ;;  %5911 = vmatprep.subr.bf16.mxu0 %v5910_v33 }
0x11c0   : > { %3339 = vadd.xlane.f32.xlu1 %v3336_v35  ;;  %5913 = vmatpush1.bf16.msra.mxu0 %v5912_v17 }
0x11c1   : > { %5881 = vmatprep.subr.bf16.mxu1 %v6858_v0  ;;  %5915 = vmatprep.subr.bf16.mxu0 %v5914_v21 }
0x11c2   : > { %5883 = vmatpush3.bf16.msra.mxu1 %v5882_v25 }
0x11c3   : > { %5884 = vmatprep.subr.bf16.mxu1 %v6858_v0 }
0x11c4   : > { %5917 = vmatpush1.bf16.msra.mxu0 %v5916_v47 }
0x11c5   : > { %5919 = vmatprep.subr.bf16.mxu0 %v5918_v28 }
0x11c6   : > { %5886 = vmatpush3.bf16.msra.mxu1 %v5885_v36 }
0x11c7   : > { %5887 = vmatprep.subr.bf16.mxu1 %v6858_v0 }
0x11c8   : > { %5921 = vmatpush1.bf16.msra.mxu0 %v5920_v41 }
0x11c9   : > { %5926 = vmatprep.subr.bf16.mxu0 %v6858_v0 }
0x11ca   : > { %5889 = vmatpush3.bf16.msra.mxu1 %v5888_v2 }
0x11cb   : > { %5922 = vmatprep.subr.bf16.mxu1 %v6858_v0 }
0x1248   : > { %v3338_v46 = vpop.xlane.xlu0 %3337 }
0x1249   : > { %v3341_v48 = vmul.f32 0.0078125, %v3338_v46 }
0x124b   : > { %v3343_v50 = vadd.f32 1e-05, %v3341_v48 }
0x124c   : > { %v1780_v53 = vpop.xlane.xlu0 %1779 }
0x124d   : > { %6361 = vrsqrt.f32 %v3343_v50  ;;  %v1781_v35 = vmul.f32 0.0078125, %v1780_v53  ;;  %v3340_v37 = vpop.xlane.xlu1 %3339 }
0x124e   : > { %v3342_v54 = vmul.f32 0.0078125, %v3340_v37 }
0x124f   : > { %v1782_v58 = vadd.f32 1e-05, %v1781_v35 }
0x1250   : > { %v3344_v49 = vadd.f32 1e-05, %v3342_v54 }
0x1251   : > { %6363 = vrsqrt.f32 %v1782_v58 }
0x1252   : > { %6365 = vrsqrt.f32 %v3344_v49 }
0x1257   : > { %v6362_v62 = vpop.eup %6361 }
0x1258   : > { %v3347_v3 = vmul.f32 %v6362_v62, %v7713_v43 }
0x125a   : > { %v3353_v59 = vmul.f32 %v3352_v61, %v3347_v3 }
0x125b   : > { %v6364_v6 = vpop.eup %6363 }
0x125c   : > { %v6366_v7 = vpop.eup %6365  ;;  %v1784_v39 = vmul.f32 %v6364_v6, %v7717_v51  ;;  %v3359_v8 = vadd.f32 %v3358_v4, %v3353_v59 }
0x125d   : > { %v3348_v12 = vmul.f32 %v6366_v7, %v7719_v52 }
0x125e   : > { %3544 = vmatmul.mubr.f32.vlgmr.msra.gmra.mrb[28].mxu0 %v3359_v8  ;;  %v1789_v34 = vmul.f32 %v1788_v5, %v1784_v39  ;;  %4697 = vst [vmem:[%s7747_s14] sm:$0xff] %v3359_v8 }
0x125f   : > { %3549 = vmatprep.mubr.f32.mxu0 %v6859_v1  ;;  %v3354_v43 = vmul.f32 %v3352_v61, %v3348_v12 }
0x1260   : > { %v7751_v13 = vadd.f32 %v1793_v9, %v1789_v34 }
0x1261   : > { %v3360_v33 = vadd.f32 %v3358_v4, %v3354_v43 }
0x1262   : > { %5520 = vmatmul.mubr.f32.vlgmr.msra.gmra.mrb[30].mxu1 %v7751_v13 }
0x1263   : > { %3550 = vmatmul.mubr.f32.gmra.mrb[30].mxu0 %v3360_v33  ;;  %4698 = vst [vmem:[%s7747_s14 + $0x8] sm:$0xff] %v3360_v33  ;;  %5526 = vmatprep.mubr.msk.f32.mxu1 %vm6860_vm0, %v6859_v1 }
0x1264   : > { %5533 = vmatprep.mubr.msk.f32.mxu0 %vm6860_vm0, %v6859_v1 }
0x1331   : > { %v3545_v51 = vpop.f32.mrb[28].mxu0 }
0x1332   : > { %v3547_v52 = vpop.f32.mrb[29].mxu0 }
0x1335   : > { %v3443_v57 = vpop.f32.mrb[30].mxu1 }
0x1336   : > { %v3551_v31 = vpop.f32.mrb[30].mxu0  ;;  %3708 = vrot.lane.b32.xlu0 %v3443_v57, %s6862_s8  ;;  %v5521_v15 = vpop.f32.mrb[31].mxu1 }
0x1337   : > { %v5923_v14 = vpack.c.bf16 %v3551_v31, %v3545_v51  ;;  %v3553_v16 = vpop.f32.mrb[31].mxu0  ;;  %v6279_v17 = vpack.i.bf16 %v3551_v31, %v3545_v51  ;;  %v4232_v31 = vld [vmem:[#allocation19 + $0x8] sm:$0xff] }
0x1338   : > { %v5927_v19 = vpack.c.bf16 %v3553_v16, %v3547_v52  ;;  %v6284_v40 = vpack.i.bf16 %v3553_v16, %v3547_v52  ;;  %v4236_v15 = vld [vmem:[#allocation19 + $0x28] sm:$0xff]  ;;  %v4238_v16 = vld [vmem:[#allocation19 + $0x38] sm:$0xff] }
0x1339   : > { %6280 = vrot.lane.b32.xlu1 %v6279_v17, %s6862_s8  ;;  %5925 = vmatpush3.bf16.xpose.msk.msra.mxu1 %vm7543_vm4, %v5923_v14  ;;  %v4234_v14 = vld [vmem:[#allocation19 + $0x18] sm:$0xff] }
0x133a   : > { %5928 = vmatpush3.bf16.msra.mxu0 %v5927_v19  ;;  %3871 = vrot.lane.b32.xlu0 %v3443_v57, %s6861_s0  ;;  %v4235_v19 = vld [vmem:[#allocation19 + $0x20] sm:$0xff] }
0x133b   : > { %5929 = vmatprep.subr.bf16.mxu1 %v6858_v0  ;;  %5933 = vmatprep.subr.bf16.mxu0 %v6858_v0 }
0x133d   : > { %6285 = vrot.lane.b32.xlu1 %v6284_v40, %s6862_s8 }
0x133e   : > { %6300 = vrot.lane.b32.xlu0 %v6279_v17, %s6863_s4 }
0x1340   : > { %5527 = vmatmul.mubr.msk.f32.vlgmr.msra.gmra.mrb[32].mxu1 %vm1092_vm1, %v3443_v57 }
0x1341   : > { %6290 = vrot.lane.b32.xlu1 %v6279_v17, %s6861_s0  ;;  %5540 = vmatprep.mubr.msk.f32.mxu1 %vm6860_vm0, %v6859_v1  ;;  %v4231_v17 = vld [vmem:[#allocation19] sm:$0xff] }
0x1342   : > { %6305 = vrot.lane.b32.xlu0 %v6284_v40, %s6863_s4 }
0x1345   : > { %6295 = vrot.lane.b32.xlu1 %v6284_v40, %s6861_s0  ;;  %v5982_v40 = vpack.c.bf16 %v4238_v16, %v4234_v14  ;;  %v4265_v14 = vld [vmem:[#allocation19 + $0x110] sm:$0xff]  ;;  %v4272_v16 = vld [vmem:[#allocation19 + $0x148] sm:$0xff] }
0x1349   : > { %4032 = vrot.lane.b32.xlu1 %v3443_v57, %s6863_s4 }
0x13a8   : > { %v3709_v47 = vpop.permute.xlu0 %3708 }
0x13ab   : > { %v6281_v21 = vpop.permute.xlu1 %6280 }
0x13ac   : > { %v6283_v22 = vunpack.i.h.bf16 %v6281_v21  ;;  %v6282_v23 = vunpack.i.l.bf16 %v6281_v21  ;;  %v3872_v42 = vpop.permute.xlu0 %3871  ;;  %v5952_v21 = vpack.c.bf16 %v4235_v19, %v4231_v17  ;;  %v4276_v19 = vld [vmem:[#allocation19 + $0x168] sm:$0xff] }
0x13ae   : > { %v5930_v56 = vpack.c.bf16 %v6283_v22, %v6282_v23  ;;  %v4233_v22 = vld [vmem:[#allocation19 + $0x10] sm:$0xff] }
0x13af   : > { %v6286_v25 = vpop.permute.xlu1 %6285  ;;  %v4237_v23 = vld [vmem:[#allocation19 + $0x30] sm:$0xff] }
0x13b0   : > { %5932 = vmatpush3.bf16.xpose.msk.msra.mxu1 %vm7543_vm4, %v5930_v56  ;;  %v6288_v30 = vunpack.i.h.bf16 %v6286_v25  ;;  %v6287_v32 = vunpack.i.l.bf16 %v6286_v25  ;;  %v6301_v45 = vpop.permute.xlu0 %6300  ;;  %v4240_v56 = vld [vmem:[#allocation19 + $0x48] sm:$0xff]  ;;  %v5984_v25 = vpack.c.bf16 %v4237_v23, %v4233_v22  ;;  %v5970_v22 = vpack.c.bf16 %v4276_v19, %v4272_v16  ;;  %v4514_v16 = vld [vmem:[#allocation20 + $0x198] sm:$0xff] }
0x13b1   : > { %5940 = vmatprep.subr.bf16.mxu1 %v6858_v0  ;;  %v6303_v63 = vunpack.i.h.bf16 %v6301_v45  ;;  %v6302_v3 = vunpack.i.l.bf16 %v6301_v45 }
0x13b2   : > { %v5934_v36 = vpack.c.bf16 %v6288_v30, %v6287_v32  ;;  %v4241_v30 = vld [vmem:[#allocation19 + $0x50] sm:$0xff] }
0x13b3   : > { %v6291_v26 = vpop.permute.xlu1 %6290  ;;  %v5944_v4 = vpack.c.bf16 %v6303_v63, %v6302_v3  ;;  %v4256_v63 = vld [vmem:[#allocation19 + $0xc8] sm:$0xff] }
0x13b4   : > { %v6293_v2 = vunpack.i.h.bf16 %v6291_v26  ;;  %v6292_v46 = vunpack.i.l.bf16 %v6291_v26  ;;  %v6306_v53 = vpop.permute.xlu0 %6305  ;;  %v4244_v26 = vld [vmem:[#allocation19 + $0x68] sm:$0xff] }
0x13b5   : > { %v6308_v37 = vunpack.i.h.bf16 %v6306_v53  ;;  %v6307_v54 = vunpack.i.l.bf16 %v6306_v53  ;;  %v4251_v53 = vld [vmem:[#allocation19 + $0xa0] sm:$0xff]  ;;  %v4260_v3 = vld [vmem:[#allocation19 + $0xe8] sm:$0xff] }
0x13b6   : > { %v5937_v48 = vpack.c.bf16 %v6293_v2, %v6292_v46  ;;  %v4250_v2 = vld [vmem:[#allocation19 + $0x98] sm:$0xff] }
0x13b7   : > { %v6296_v60 = vpop.permute.xlu1 %6295  ;;  %5541 = vmatmul.mubr.msk.f32.vlgmr.msra.gmra.mrb[34].mxu1 %vm1092_vm1, %v3709_v47  ;;  %v5948_v58 = vpack.c.bf16 %v6308_v37, %v6307_v54  ;;  %v4242_v47 = vld [vmem:[#allocation19 + $0x58] sm:$0xff]  ;;  %v4253_v37 = vld [vmem:[#allocation19 + $0xb0] sm:$0xff] }
0x13b8   : > { %v6298_v27 = vunpack.i.h.bf16 %v6296_v60  ;;  %v6297_v28 = vunpack.i.l.bf16 %v6296_v60  ;;  %5561 = vmatprep.mubr.msk.f32.mxu1 %vm6860_vm0, %v6859_v1  ;;  %v4246_v60 = vld [vmem:[#allocation19 + $0x78] sm:$0xff] }
0x13b9   : > { %v4254_v46 = vld [vmem:[#allocation19 + $0xb8] sm:$0xff] }
0x13ba   : > { %v5941_v29 = vpack.c.bf16 %v6298_v27, %v6297_v28  ;;  %v5986_v27 = vpack.c.bf16 %v4246_v60, %v4242_v47  ;;  %v4239_v28 = vld [vmem:[#allocation19 + $0x40] sm:$0xff]  ;;  %v4277_v60 = vld [vmem:[#allocation19 + $0x170] sm:$0xff] }
0x13bb   : > { %v4033_v5 = vpop.permute.xlu1 %4032 }
0x13bc   : > { %5942 = vmatpush3.bf16.msra.mxu1 %v5941_v29  ;;  %v4243_v29 = vld [vmem:[#allocation19 + $0x60] sm:$0xff] }
0x13bd   : > { %5943 = vmatprep.subr.bf16.mxu1 %v6858_v0  ;;  %v5956_v32 = vpack.c.bf16 %v4243_v29, %v4239_v28 }
0x1413   : > { %v3631_v38 = vpop.f32.mrb[32].mxu1 }
0x1414   : > { %v5528_v41 = vpop.f32.mrb[33].mxu1  ;;  %5534 = vmatmul.mubr.msk.f32.vlgmr.msra.gmra.mrb[32].mxu0 %vm2082_vm5, %v3631_v38  ;;  %v4248_v38 = vld [vmem:[#allocation19 + $0x88] sm:$0xff] }
0x1415   : > { %5935 = vmatpush3.bf16.msra.mxu0 %v5934_v36  ;;  %5547 = vmatprep.mubr.msk.f32.mxu0 %vm6860_vm0, %v6859_v1  ;;  %v4245_v36 = vld [vmem:[#allocation19 + $0x70] sm:$0xff]  ;;  %v4252_v41 = vld [vmem:[#allocation19 + $0xa8] sm:$0xff] }
0x1416   : > { %5936 = vmatprep.subr.bf16.mxu0 %v6858_v0  ;;  %v5958_v45 = vpack.c.bf16 %v4252_v41, %v4248_v38  ;;  %v4283_v41 = vld [vmem:[#allocation19 + $0x1a0] sm:$0xff] }
0x148a   : > { %v3786_v50 = vpop.f32.mrb[34].mxu1 }
0x148b   : > { %v5542_v35 = vpop.f32.mrb[35].mxu1  ;;  %5548 = vmatmul.mubr.msk.f32.vlgmr.msra.gmra.mrb[34].mxu0 %vm2082_vm5, %v3786_v50  ;;  %v5990_v50 = vpack.c.bf16 %v4254_v46, %v4250_v2  ;;  %v4288_v46 = vld [vmem:[#allocation19 + $0x1c8] sm:$0xff] }
0x148c   : > { %5939 = vmatpush3.bf16.xpose.msk.msra.mxu0 %vm7543_vm4, %v5937_v48  ;;  %5554 = vmatprep.mubr.msk.f32.mxu0 %vm6860_vm0, %v6859_v1  ;;  %v4247_v48 = vld [vmem:[#allocation19 + $0x80] sm:$0xff]  ;;  %v4249_v35 = vld [vmem:[#allocation19 + $0x90] sm:$0xff] }
0x148d   : > { %5947 = vmatprep.subr.bf16.mxu0 %v6858_v0  ;;  %v5960_v54 = vpack.c.bf16 %v4251_v53, %v4247_v48  ;;  %v4292_v48 = vld [vmem:[#allocation19 + $0x1e8] sm:$0xff] }
0x1493   : > { %5555 = vmatmul.mubr.msk.f32.vlgmr.msra.gmra.mrb[36].mxu0 %vm1092_vm1, %v3872_v42  ;;  %v5988_v42 = vpack.c.bf16 %v4245_v36, %v4241_v30  ;;  %v4282_v30 = vld [vmem:[#allocation19 + $0x198] sm:$0xff]  ;;  %v4279_v36 = vld [vmem:[#allocation19 + $0x180] sm:$0xff] }
0x1494   : > { %5949 = vmatpush3.bf16.msra.mxu0 %v5948_v58  ;;  %5575 = vmatprep.mubr.msk.f32.mxu0 %vm6860_vm0, %v6859_v1  ;;  %v5992_v58 = vpack.c.bf16 %v4253_v37, %v4249_v35  ;;  %v5976_v2 = vpack.c.bf16 %v4283_v41, %v4279_v36  ;;  %v5978_v35 = vpack.c.bf16 %v4292_v48, %v4288_v46  ;;  %v4294_v37 = vld [vmem:[#allocation19 + $0x1f8] sm:$0xff]  ;;  %v4499_v41 = vld [vmem:[#allocation20 + $0x120] sm:$0xff]  ;;  %v4517_v46 = vld [vmem:[#allocation20 + $0x1b0] sm:$0xff] }
0x1495   : > { %v4518_v48 = vld [vmem:[#allocation20 + $0x1b8] sm:$0xff] }
0x14e7   : > { %v3704_v49 = vpop.f32.mrb[32].mxu0 }
0x14e8   : > { %v5535_v55 = vpop.f32.mrb[33].mxu0 }
0x155e   : > { %v3867_v61 = vpop.f32.mrb[34].mxu0 }
0x155f   : > { %4194 = vrot.lane.b32.xlu1 %v3867_v61, %s6863_s4  ;;  %v5549_v62 = vpop.f32.mrb[35].mxu0 }
0x1566   : > { %v3949_v59 = vpop.f32.mrb[36].mxu0 }
0x1567   : > { %v5556_v0 = vpop.f32.mrb[37].mxu0  ;;  %5562 = vmatmul.mubr.msk.f32.vlgmr.msra.gmra.mrb[36].mxu1 %vm2082_vm5, %v3949_v59  ;;  %v5962_v59 = vpack.c.bf16 %v4260_v3, %v4256_v63 }
0x1568   : > { %5946 = vmatpush3.bf16.xpose.msk.msra.mxu1 %vm7543_vm4, %v5944_v4  ;;  %5568 = vmatprep.mubr.msk.f32.mxu1 %vm6860_vm0, %v6859_v1  ;;  %v4258_v4 = vld [vmem:[#allocation19 + $0xd8] sm:$0xff] }
0x1569   : > { %5983 = vmatprep.subr.bf16.mxu1 %v5982_v40  ;;  %v4262_v0 = vld [vmem:[#allocation19 + $0xf8] sm:$0xff] }
0x156a   : > { %v4274_v40 = vld [vmem:[#allocation19 + $0x158] sm:$0xff] }
0x156f   : > { %5569 = vmatmul.mubr.msk.f32.vlgmr.msra.gmra.mrb[38].mxu1 %vm1092_vm1, %v4033_v5  ;;  %v4255_v5 = vld [vmem:[#allocation19 + $0xc0] sm:$0xff] }
0x1570   : > { %4452 = vmatprep.mubr.f32.mxu1 %v6859_v1  ;;  %5985 = vmatpush1.bf16.msra.mxu1 %v5984_v25  ;;  %v4275_v25 = vld [vmem:[#allocation19 + $0x160] sm:$0xff] }
0x1571   : > { %5987 = vmatprep.subr.bf16.mxu1 %v5986_v27  ;;  %v4284_v27 = vld [vmem:[#allocation19 + $0x1a8] sm:$0xff] }
0x1574   : > { %5989 = vmatpush1.bf16.msra.mxu1 %v5988_v42  ;;  %v4281_v42 = vld [vmem:[#allocation19 + $0x190] sm:$0xff] }
0x1575   : > { %5991 = vmatprep.subr.bf16.mxu1 %v5990_v50  ;;  %v4290_v50 = vld [vmem:[#allocation19 + $0x1d8] sm:$0xff] }
0x1578   : > { %5993 = vmatpush1.bf16.msra.mxu1 %v5992_v58  ;;  %v4291_v58 = vld [vmem:[#allocation19 + $0x1e0] sm:$0xff] }
0x15d1   : > { %v4195_v12 = vpop.permute.xlu1 %4194 }
0x15d2   : > { %v4205_v43 = vsel %vm1092_vm1, %v3704_v49, %v4195_v12  ;;  %v4264_v12 = vld [vmem:[#allocation19 + $0x108] sm:$0xff] }
0x163a   : > { %v4028_v6 = vpop.f32.mrb[36].mxu1 }
0x163b   : > { %4198 = vrot.lane.b32.xlu0 %v4028_v6, %s6861_s0  ;;  %v5563_v7 = vpop.f32.mrb[37].mxu1  ;;  %v4259_v6 = vld [vmem:[#allocation19 + $0xe0] sm:$0xff]  ;;  %s6864_s0 = smov [#allocation22]  }
0x163c   : > { %v5994_v7 = vpack.c.bf16 %v4262_v0, %v4258_v4  ;;  %v4479_v4 = vld [vmem:[#allocation20 + $0x80] sm:$0xff] }
0x163d   : > { %v4511_v0 = vld [vmem:[#allocation20 + $0x180] sm:$0xff] }
0x163e   : > { %5995 = vmatprep.subr.bf16.mxu1 %v5994_v7 }
0x1642   : > { %v4110_v39 = vpop.f32.mrb[38].mxu1 }
0x1643   : > { %v5570_v8 = vpop.f32.mrb[39].mxu1  ;;  %5576 = vmatmul.mubr.msk.f32.vlgmr.msra.gmra.mrb[38].mxu0 %vm2082_vm5, %v4110_v39  ;;  %v5964_v39 = vpack.c.bf16 %v4259_v6, %v4255_v5  ;;  %v4512_v6 = vld [vmem:[#allocation20 + $0x188] sm:$0xff] }
0x1644   : > { %4381 = vmatprep.mubr.f32.mxu0 %v6859_v1  ;;  %v5950_v1 = vpack.c.bf16 %v4236_v15, %v4232_v31  ;;  %v4257_v8 = vld [vmem:[#allocation19 + $0xd0] sm:$0xff]  ;;  %v6046_v7 = vpack.c.bf16 %v4512_v6, %v4511_v0  ;;  %v4472_v6 = vld [vmem:[#allocation20 + $0x48] sm:$0xff] }
0x1646   : > { %5951 = vmatprep.subr.bf16.mxu0 %v5950_v1  ;;  %v4269_v1 = vld [vmem:[#allocation19 + $0x130] sm:$0xff] }
0x1647   : > { %5953 = vmatpush1.bf16.msra.mxu0 %v5952_v21  ;;  %v6000_v17 = vpack.c.bf16 %v4269_v1, %v4265_v14  ;;  %v4278_v21 = vld [vmem:[#allocation19 + $0x178] sm:$0xff]  ;;  %v4513_v1 = vld [vmem:[#allocation20 + $0x190] sm:$0xff] }
0x1648   : > { %v6002_v23 = vpack.c.bf16 %v4278_v21, %v4274_v40  ;;  %v4482_v14 = vld [vmem:[#allocation20 + $0x98] sm:$0xff]  ;;  %v4465_v21 = vld [vmem:[#allocation20 + $0x10] sm:$0xff] }
0x16ad   : > { %v4199_v34 = vpop.permute.xlu0 %4198 }
0x16ae   : > { %v4206_v33 = vsel %vm1767_vm6, %v4205_v43, %v4199_v34  ;;  %v4268_v34 = vld [vmem:[#allocation19 + $0x128] sm:$0xff]  ;;  %v4266_v43 = vld [vmem:[#allocation19 + $0x118] sm:$0xff] }
0x1716   : > { %v4189_v44 = vpop.f32.mrb[38].mxu0 }
0x1717   : > { %4202 = vrot.lane.b32.xlu1 %v4189_v44, %s6862_s8  ;;  %v5577_v9 = vpop.f32.mrb[39].mxu0  ;;  %v4261_v44 = vld [vmem:[#allocation19 + $0xf0] sm:$0xff]  ;;  %s8036_s8 = sld [smem:[#allocation50_spill]] }
0x1718   : > { %v5996_v9 = vpack.c.bf16 %v4261_v44, %v4257_v8 }
0x171a   : > { %5997 = vmatpush1.bf16.msra.mxu1 %v5996_v9 }
0x171d   : > { %v4209_v9 = vld [vmem:[%s8036_s8] sm:$0x3]  ;;  %s6716_s8 = sshll.u32 %s6864_s0, 4  ;;  %s6717_s8 = int_to_ptr.vmem [resolvable:$false] %s6716_s8 }
0x171e   : > { %s6718_s14 = scalar_lea.vmem %s6717_s8, 512  ;;  %p6719_p5 = scmp.lt.s32.totalorder %s7839_s20, %s6717_s8 }
0x171f   : > { %p6720_p10 = scmp.lt.s32.totalorder %s6718_s14, %s6712_s24 }
0x1721   : > { %p6721_p1 = por %p6720_p10, %p6719_p5 }
0x1723   : > { %p6722_p11 = pnand %p6721_p1, %p6715_p8 }
0x1789   : > { %v4203_v51 = vpop.permute.xlu1 %4202 }
0x178a   : > { %v4207_v52 = vsel %vm1769_vm7, %v4206_v33, %v4203_v51  ;;  %v5966_v33 = vpack.c.bf16 %v4268_v34, %v4264_v12  ;;  %v4270_v51 = vld [vmem:[#allocation19 + $0x138] sm:$0xff]  ;;  %v4224_v12 = vrot.slane %v4209_v9, %v7664_v18 }
0x178b   : > { %v4208_v57 = vadd.f32 %v4207_v52, %v7751_v13  ;;  %v5954_v13 = vpack.c.bf16 %v4244_v26, %v4240_v56  ;;  %v4263_v52 = vld [vmem:[#allocation19 + $0x100] sm:$0xff]  ;;  %v5998_v31 = vpack.c.bf16 %v4270_v51, %v4266_v43  ;;  %v4273_v26 = vld [vmem:[#allocation19 + $0x150] sm:$0xff] }
0x178c   : > { %v4271_v56 = vld [vmem:[#allocation19 + $0x140] sm:$0xff]  ;;  %v6004_v28 = vpack.c.bf16 %v4277_v60, %v4273_v26  ;;  %v4497_v26 = vld [vmem:[#allocation20 + $0x110] sm:$0xff]  ;;  %v4484_v60 = vld [vmem:[#allocation20 + $0xa8] sm:$0xff] }
0x178d   : > { %4210 = vadd.xlane.f32.xlu0 %v4208_v57  ;;  %5955 = vmatprep.subr.bf16.mxu0 %v5954_v13  ;;  %v5972_v47 = vpack.c.bf16 %v4275_v25, %v4271_v56  ;;  %v4280_v13 = vld [vmem:[#allocation19 + $0x188] sm:$0xff]  ;;  %v4463_v43 = vld [vmem:[#allocation20] sm:$0xff]  ;;  %v6050_v25 = vpack.c.bf16 %v4514_v16, %v4513_v1  ;;  %v4506_v1 = vld [vmem:[#allocation20 + $0x158] sm:$0xff] }
0x178e   : > { %5957 = vmatpush1.bf16.msra.mxu0 %v5956_v32  ;;  %5999 = vmatprep.subr.bf16.mxu1 %v5998_v31  ;;  %v5974_v29 = vpack.c.bf16 %v4284_v27, %v4280_v13  ;;  %v4286_v32 = vld [vmem:[#allocation19 + $0x1b8] sm:$0xff]  ;;  %v4496_v31 = vld [vmem:[#allocation20 + $0x108] sm:$0xff]  ;;  %v4515_v13 = vld [vmem:[#allocation20 + $0x1a0] sm:$0xff] }
0x178f   : > { %5959 = vmatprep.subr.bf16.mxu0 %v5958_v45  ;;  %6001 = vmatpush1.bf16.msra.mxu1 %v6000_v17  ;;  %v6006_v38 = vpack.c.bf16 %v4286_v32, %v4282_v30  ;;  %v4285_v45 = vld [vmem:[#allocation19 + $0x1b0] sm:$0xff]  ;;  %v4516_v27 = vld [vmem:[#allocation20 + $0x1a8] sm:$0xff]  ;;  %v4467_v30 = vld [vmem:[#allocation20 + $0x20] sm:$0xff] }
0x1790   : > { %6003 = vmatprep.subr.bf16.mxu1 %v6002_v23  ;;  %v6008_v53 = vpack.c.bf16 %v4285_v45, %v4281_v42  ;;  %v4468_v32 = vld [vmem:[#allocation20 + $0x28] sm:$0xff]  ;;  %v4485_v45 = vld [vmem:[#allocation20 + $0xb0] sm:$0xff]  ;;  %v4491_v16 = vld [vmem:[#allocation20 + $0xe0] sm:$0xff] }
0x1791   : > { %v4500_v42 = vld [vmem:[#allocation20 + $0x128] sm:$0xff] }
0x1792   : > { %5961 = vmatpush1.bf16.msra.mxu0 %v5960_v54  ;;  %v4287_v54 = vld [vmem:[#allocation19 + $0x1c0] sm:$0xff] }
0x1793   : > { %5963 = vmatprep.subr.bf16.mxu0 %v5962_v59  ;;  %6005 = vmatpush1.bf16.msra.mxu1 %v6004_v28  ;;  %v5980_v63 = vpack.c.bf16 %v4291_v58, %v4287_v54  ;;  %v4480_v59 = vld [vmem:[#allocation20 + $0x88] sm:$0xff]  ;;  %v6058_v58 = vpack.c.bf16 %v4518_v48, %v4517_v46  ;;  %v4510_v46 = vld [vmem:[#allocation20 + $0x178] sm:$0xff] }
0x1794   : > { %6007 = vmatprep.subr.bf16.mxu1 %v6006_v38  ;;  %v6014_v5 = vpack.c.bf16 %v4480_v59, %v4479_v4  ;;  %v6054_v38 = vpack.c.bf16 %v4516_v27, %v4515_v13  ;;  %v4520_v4 = vld [vmem:[#allocation20 + $0x1c8] sm:$0xff] }
0x1795   : > { %v4508_v13 = vld [vmem:[#allocation20 + $0x168] sm:$0xff] }
0x1796   : > { %5965 = vmatpush1.bf16.msra.mxu0 %v5964_v39 }
0x1797   : > { %5967 = vmatprep.subr.bf16.mxu0 %v5966_v33  ;;  %6009 = vmatpush1.bf16.msra.mxu1 %v6008_v53  ;;  %v4464_v33 = vld [vmem:[#allocation20 + $0x8] sm:$0xff]  ;;  %v6056_v53 = vpack.c.bf16 %v4500_v42, %v4499_v41  ;;  %v4478_v41 = vld [vmem:[#allocation20 + $0x78] sm:$0xff] }
0x1798   : > { %v6016_v19 = vpack.c.bf16 %v4464_v33, %v4463_v43  ;;  %v4522_v43 = vld [vmem:[#allocation20 + $0x1d8] sm:$0xff] }
0x181a   : > { %v4211_v49 = vpop.xlane.xlu0 %4210 }
0x181b   : > { %v4212_v55 = vmul.f32 0.0078125, %v4211_v49  ;;  %v6010_v49 = vpack.c.bf16 %v4294_v37, %v4290_v50  ;;  %v6024_v50 = vpack.c.bf16 %v4468_v32, %v4467_v30  ;;  %v4470_v37 = vld [vmem:[#allocation20 + $0x38] sm:$0xff]  ;;  %v4525_v30 = vld [vmem:[#allocation20 + $0x1f0] sm:$0xff] }
0x181d   : > { %v7811_v61 = vsub.f32 %v4208_v57, %v4212_v55  ;;  %v4267_v57 = vld [vmem:[#allocation19 + $0x120] sm:$0xff]  ;;  %v4289_v55 = vld [vmem:[#allocation19 + $0x1d0] sm:$0xff]  ;;  %6011 = vmatprep.subr.bf16.mxu1 %v6010_v49 }
0x181e   : > { %v5968_v15 = vpack.c.bf16 %v4267_v57, %v4263_v52  ;;  %v4229_v52 = vrot.slane %v4209_v9, %v7670_v20  ;;  %v4495_v57 = vld [vmem:[#allocation20 + $0x100] sm:$0xff]  ;;  %v4501_v49 = vld [vmem:[#allocation20 + $0x130] sm:$0xff] }
0x181f   : > { %v4214_v62 = vmul.f32 %v7811_v61, %v7811_v61  ;;  %v6048_v40 = vpack.c.bf16 %v4496_v31, %v4495_v57  ;;  %v4489_v9 = vld [vmem:[#allocation20 + $0xd0] sm:$0xff]  ;;  %v4474_v57 = vld [vmem:[#allocation20 + $0x58] sm:$0xff] }
0x1820   : > { %5969 = vmatpush1.bf16.msra.mxu0 %v5968_v15  ;;  %v4481_v15 = vld [vmem:[#allocation20 + $0x90] sm:$0xff] }
0x1821   : > { %4215 = vadd.xlane.f32.xlu1 %v4214_v62  ;;  %5971 = vmatprep.subr.bf16.mxu0 %v5970_v22  ;;  %v4293_v62 = vld [vmem:[#allocation19 + $0x1f0] sm:$0xff]  ;;  %v4466_v22 = vld [vmem:[#allocation20 + $0x18] sm:$0xff]  ;;  %v6018_v56 = vpack.c.bf16 %v4482_v14, %v4481_v15 }
0x1822   : > { %v6012_v3 = vpack.c.bf16 %v4293_v62, %v4289_v55  ;;  %v6020_v28 = vpack.c.bf16 %v4466_v22, %v4465_v21  ;;  %v4502_v55 = vld [vmem:[#allocation20 + $0x138] sm:$0xff]  ;;  %v4487_v62 = vld [vmem:[#allocation20 + $0xc0] sm:$0xff]  ;;  %v4505_v14 = vld [vmem:[#allocation20 + $0x150] sm:$0xff] }
0x1823   : > { %v6060_v0 = vpack.c.bf16 %v4502_v55, %v4501_v49  ;;  %v6068_v22 = vpack.c.bf16 %v4506_v1, %v4505_v14 }
0x1824   : > { %5973 = vmatpush1.bf16.msra.mxu0 %v5972_v47  ;;  %6013 = vmatpush1.bf16.msra.mxu1 %v6012_v3  ;;  %v4498_v47 = vld [vmem:[#allocation20 + $0x118] sm:$0xff]  ;;  %v4519_v3 = vld [vmem:[#allocation20 + $0x1c0] sm:$0xff] }
0x1825   : > { %5975 = vmatprep.subr.bf16.mxu0 %v5974_v29  ;;  %6047 = vmatprep.subr.bf16.mxu1 %v6046_v7  ;;  %v6052_v29 = vpack.c.bf16 %v4498_v47, %v4497_v26  ;;  %v4475_v26 = vld [vmem:[#allocation20 + $0x60] sm:$0xff]  ;;  %v4476_v47 = vld [vmem:[#allocation20 + $0x68] sm:$0xff] }
0x1828   : > { %5977 = vmatpush1.bf16.msra.mxu0 %v5976_v2  ;;  %v4486_v2 = vld [vmem:[#allocation20 + $0xb8] sm:$0xff] }
0x1829   : > { %5979 = vmatprep.subr.bf16.mxu0 %v5978_v35  ;;  %v4469_v35 = vld [vmem:[#allocation20 + $0x30] sm:$0xff]  ;;  %v6026_v54 = vpack.c.bf16 %v4486_v2, %v4485_v45 }
0x182a   : > { %v6028_v59 = vpack.c.bf16 %v4470_v37, %v4469_v35  ;;  %v4509_v2 = vld [vmem:[#allocation20 + $0x170] sm:$0xff] }
0x182b   : > { %v6076_v48 = vpack.c.bf16 %v4510_v46, %v4509_v2 }
0x182c   : > { %5981 = vmatpush1.bf16.msra.mxu0 %v5980_v63  ;;  %v4488_v63 = vld [vmem:[#allocation20 + $0xc8] sm:$0xff] }
0x182d   : > { %6015 = vmatprep.subr.bf16.mxu0 %v6014_v5  ;;  %v4471_v5 = vld [vmem:[#allocation20 + $0x40] sm:$0xff]  ;;  %v6030_v7 = vpack.c.bf16 %v4488_v63, %v4487_v62 }
0x182e   : > { %v6032_v33 = vpack.c.bf16 %v4472_v6, %v4471_v5 }
0x18ae   : > { %v4216_v39 = vpop.xlane.xlu1 %4215 }
0x18af   : > { %v4217_v8 = vmul.f32 0.0078125, %v4216_v39  ;;  %v6062_v39 = vpack.c.bf16 %v4520_v4, %v4519_v3 }
0x18b1   : > { %v4218_v44 = vadd.f32 1e-05, %v4217_v8  ;;  %v4503_v8 = vld [vmem:[#allocation20 + $0x140] sm:$0xff] }
0x18b3   : > { %6367 = vrsqrt.f32 %v4218_v44  ;;  %v4504_v44 = vld [vmem:[#allocation20 + $0x148] sm:$0xff] }
0x18bd   : > { %v6368_v34 = vpop.eup %6367 }
0x18be   : > { %v4220_v51 = vmul.f32 %v6368_v34, %v7811_v61  ;;  %v4483_v61 = vld [vmem:[#allocation20 + $0xa0] sm:$0xff]  ;;  %v4521_v34 = vld [vmem:[#allocation20 + $0x1d0] sm:$0xff] }
0x18bf   : > { %v6022_v36 = vpack.c.bf16 %v4484_v60, %v4483_v61  ;;  %v6066_v15 = vpack.c.bf16 %v4522_v43, %v4521_v34  ;;  %v4507_v61 = vld [vmem:[#allocation20 + $0x160] sm:$0xff]  ;;  %v6040_v60 = vpack.c.bf16 %v4476_v47, %v4475_v26 }
0x18c0   : > { %v4225_v17 = vmul.f32 %v4224_v12, %v4220_v51  ;;  %v4490_v12 = vld [vmem:[#allocation20 + $0xd8] sm:$0xff]  ;;  %v6064_v51 = vpack.c.bf16 %v4504_v44, %v4503_v8  ;;  %v6072_v27 = vpack.c.bf16 %v4508_v13, %v4507_v61 }
0x18c1   : > { %v6034_v31 = vpack.c.bf16 %v4490_v12, %v4489_v9 }
0x18c2   : > { %v7821_v23 = vadd.f32 %v4229_v52, %v4225_v17  ;;  %v4473_v52 = vld [vmem:[#allocation20 + $0x50] sm:$0xff]  ;;  %v4492_v17 = vld [vmem:[#allocation20 + $0xe8] sm:$0xff] }
0x18c3   : > { %v6036_v21 = vpack.c.bf16 %v4474_v57, %v4473_v52 }
0x18c4   : > { %4382 = vmatmul.mubr.f32.vlgmr.msra.gmra.mrb[40].mxu0 %v7821_v23  ;;  %4453 = vmatmul.mubr.f32.vlgmr.msra.gmra.mrb[40].mxu1 %v7821_v23 }
0x18c5   : > { %6017 = vmatpush3.bf16.msra.mxu0 %v6016_v19  ;;  %6049 = vmatpush3.bf16.msra.mxu1 %v6048_v40  ;;  %v4523_v19 = vld [vmem:[#allocation20 + $0x1e0] sm:$0xff]  ;;  %v4524_v40 = vld [vmem:[#allocation20 + $0x1e8] sm:$0xff] }
0x18c6   : > { %6019 = vmatprep.subr.bf16.mxu0 %v6018_v56  ;;  %6051 = vmatprep.subr.bf16.mxu1 %v6050_v25  ;;  %v6038_v56 = vpack.c.bf16 %v4492_v17, %v4491_v16  ;;  %v6070_v25 = vpack.c.bf16 %v4524_v40, %v4523_v19 }
0x18c9   : > { %6021 = vmatpush3.bf16.msra.mxu0 %v6020_v28  ;;  %6053 = vmatpush3.bf16.msra.mxu1 %v6052_v29  ;;  %v4493_v28 = vld [vmem:[#allocation20 + $0xf0] sm:$0xff]  ;;  %v4494_v29 = vld [vmem:[#allocation20 + $0xf8] sm:$0xff] }
0x18ca   : > { %6023 = vmatprep.subr.bf16.mxu0 %v6022_v36  ;;  %6055 = vmatprep.subr.bf16.mxu1 %v6054_v38  ;;  %v6042_v32 = vpack.c.bf16 %v4494_v29, %v4493_v28  ;;  %v4526_v36 = vld [vmem:[#allocation20 + $0x1f8] sm:$0xff]  ;;  %v4477_v38 = vld [vmem:[#allocation20 + $0x70] sm:$0xff] }
0x18cb   : > { %v6074_v42 = vpack.c.bf16 %v4526_v36, %v4525_v30  ;;  %v6044_v45 = vpack.c.bf16 %v4478_v41, %v4477_v38 }
0x18cd   : > { %6025 = vmatpush3.bf16.msra.mxu0 %v6024_v50  ;;  %6057 = vmatpush3.bf16.msra.mxu1 %v6056_v53  ;;  %v4295_v50 = vld [vmem:[%s8037_s13] sm:$0xf] }
0x18ce   : > { %6027 = vmatprep.subr.bf16.mxu0 %v6026_v54  ;;  %6059 = vmatprep.subr.bf16.mxu1 %v6058_v58  ;;  %v4300_v53 = vrot.slane %v4295_v50, %v7664_v18  ;;  %v4308_v35 = vrot.slane %v4295_v50, %v2931_v10  ;;  %v4304_v37 = vrot.slane %v4295_v50, %v7670_v20 }
0x18cf   : > { %v4312_v54 = vrot.slane %v4295_v50, %v2935_v11  ;;  %v5041_v11 = vld [vmem:[%s8038_s9] ss:$0 sm:$0xff] }
0x18d1   : > { %6029 = vmatpush3.bf16.msra.mxu0 %v6028_v59  ;;  %6061 = vmatpush3.bf16.msra.mxu1 %v6060_v0 }
0x18d2   : > { %6031 = vmatprep.subr.bf16.mxu0 %v6030_v7  ;;  %6063 = vmatprep.subr.bf16.mxu1 %v6062_v39 }
0x18d5   : > { %6033 = vmatpush3.bf16.msra.mxu0 %v6032_v33  ;;  %6065 = vmatpush3.bf16.msra.mxu1 %v6064_v51 }
0x18d6   : > { %6035 = vmatprep.subr.bf16.mxu0 %v6034_v31  ;;  %6067 = vmatprep.subr.bf16.mxu1 %v6066_v15 }
0x18d9   : > { %6037 = vmatpush3.bf16.msra.mxu0 %v6036_v21  ;;  %6069 = vmatpush3.bf16.msra.mxu1 %v6068_v22 }
0x18da   : > { %6039 = vmatprep.subr.bf16.mxu0 %v6038_v56  ;;  %6071 = vmatprep.subr.bf16.mxu1 %v6070_v25 }
0x18dd   : > { %6041 = vmatpush3.bf16.msra.mxu0 %v6040_v60  ;;  %6073 = vmatpush3.bf16.msra.mxu1 %v6072_v27 }
0x18de   : > { %6043 = vmatprep.subr.bf16.mxu0 %v6042_v32  ;;  %6075 = vmatprep.subr.bf16.mxu1 %v6074_v42 }
0x18e1   : > { %6045 = vmatpush3.bf16.msra.mxu0 %v6044_v45  ;;  %6077 = vmatpush3.bf16.msra.mxu1 %v6076_v48 }
0x1997   : > { %v4383_v58 = vpop.f32.mrb[40].mxu0  ;;  %v4454_v49 = vpop.f32.mrb[40].mxu1 }
0x1998   : > { %v4384_v55 = vadd.f32 %v4383_v58, %v4300_v53  ;;  %v4455_v62 = vadd.f32 %v4454_v49, %v4308_v35  ;;  %v4385_v63 = vpop.f32.mrb[41].mxu0  ;;  %v4456_v3 = vpop.f32.mrb[41].mxu1 }
0x1999   : > { %v4386_v4 = vadd.f32 %v4385_v63, %v4304_v37  ;;  %v4457_v59 = vadd.f32 %v4456_v3, %v4312_v54 }
0x199a   : > { %v4459_v6 = vmax.f32 %v4384_v55, 0.0  ;;  %v4461_v7 = vmax.f32 %v4455_v62, 0.0 }
0x199b   : > { %v4460_v0 = vmax.f32 %v4386_v4, 0.0  ;;  %v4462_v5 = vmax.f32 %v4457_v59, 0.0 }
0x199d   : > { %4598 = vmatprep.mubr.f32.mxu0 %v4460_v0  ;;  %4668 = vmatprep.mubr.f32.mxu1 %v4462_v5 }
0x199e   : > { %4599 = vmatmul.mubr.f32.vlgmr.msra.gmra.mrb[42].mxu0 %v4459_v6  ;;  %4669 = vmatmul.mubr.f32.vlgmr.msra.gmra.mrb[42].mxu1 %v4461_v7 }
0x1a71   : > { %v5283_v10 = vpop.f32.mrb[42].mxu0  ;;  %v5318_v24 = vpop.f32.mrb[42].mxu1 }
0x1a72   : > { %v5284_v39 = vpop.f32.mrb[43].mxu0  ;;  %v5319_v8 = vpop.f32.mrb[43].mxu1 }
0x1a73   : > { %v5285_v44 = vadd.f32 %v5284_v39, %v5283_v10  ;;  %v5320_v9 = vadd.f32 %v5319_v8, %v5318_v24 }
0x1a75   : > { %v4601_v12 = vadd.f32 %v5285_v44, %v5041_v11 }
0x1a77   : > { %v4671_v34 = vadd.f32 %v5320_v9, %v4601_v12 }
0x1a79   : > { %v4674_v43 = vadd.f32 %v4671_v34, %v7821_v23 }
0x1a7b   : > { %4676 = vadd.xlane.f32.xlu0 %v4674_v43 }
0x1b08   : > { %v4677_v33 = vpop.xlane.xlu0 %4676 }
0x1b09   : > { %v4678_v51 = vmul.f32 0.0078125, %v4677_v33 }
0x1b0b   : > { %v4679_v52 = vsub.f32 %v4674_v43, %v4678_v51 }
0x1b0d   : > { %v4680_v57 = vmul.f32 %v4679_v52, %v4679_v52 }
0x1b0f   : > { %4681 = vadd.xlane.f32.xlu0 %v4680_v57 }
0x1b10   : > { %6725 = shalt.err (!%p6722_p11)
}
0x1b11   : > { %s6726_s4 = scalar_lea.hbm %s7845_s21, 256  ;;  %s6730_s11 = scalar_lea.hbm %s8039_s7, 512 }
0x1b12   : > { %p6727_p12 = scmp.ne.s32.totalorder %s7845_s21, %s6726_s4  ;;  %p6731_p9 = scmp.lt.u32.totalorder %s7845_s21, %s8039_s7 }
0x1b13   : > { %p6732_p0 = scmp.lt.u32.totalorder %s6730_s11, %s6726_s4  ;;  %p6734_p3 = scmp.lt.u32.totalorder %s6726_s4, %s7845_s21 }
0x1b14   : > { %p6728_p13 = pnand %p6727_p12, %p8040_p6 }
0x1b15   : > { %p6733_p2 = por %p6732_p0, %p6731_p9 }
0x1b16   : > { %p6729_p7 = pneg %p6728_p13 }
0x1b17   : > { %p6735_p4 = por %p6734_p3, %p6733_p2 }
0x1b19   : > { %p6736_p8 = pnand %p6735_p4, %p6729_p7 }
0x1b1b   : > { %6739 = shalt.err (!%p6736_p8)
}
0x1b1c   : > { %s6865_s19 = smov 128   ;;  %s6866_s16 = smov 8  }
0x1b1d   : > { %6122 = dma.vmem_to_hbm [thread:$0]  (%p8040_p6), %s7839_s20, 256, %s7845_s21, %s4701_s25, %s6865_s19, %s6865_s19, %s6866_s16  }
0x1b1e   : > { %s8041_s0 = sld [smem:[#allocation55_spill]]  ;;  %s5046_s8 = sshll.u32 %s7004_s23, 7 }
0x1b1f   : > { %s894_s14 = scalar_lea.vmem [#allocation23], %s4975_s1  ;;  %s8042_s4 = sld [smem:[#allocation57_spill]] }
0x1b20   : > { %s4735_s20 = sshll.u32 %s894_s14, 4  ;;  %s4706_s13 = scalar_lea.sflag [#allocation24], %s7373_s18  ;;  %s7884_s20 = int_to_ptr.vmem [resolvable:$true] %s4735_s20 }
0x1b21   : > { %s6740_s11 = scalar_lea.vmem %s7884_s20, 128  ;;  %s6867_s23 = smov [#allocation23]  }
0x1b22   : > { %p6741_p5 = scmp.ne.s32.totalorder %s7884_s20, %s6740_s11  ;;  %s6744_s1 = sshll.u32 %s6867_s23, 4  ;;  %s6745_s1 = int_to_ptr.vmem [resolvable:$false] %s6744_s1 }
0x1b23   : > { %s6746_s2 = scalar_lea.vmem %s6745_s1, 256  ;;  %p6747_p11 = scmp.lt.s32.totalorder %s7884_s20, %s6745_s1 }
0x1b24   : > { %v4675_v14 = vld [vmem:[%s8041_s0] sm:$0x3]  ;;  %p6742_p10 = pnand %p6741_p5, %p8040_p6  ;;  %p6748_p12 = scmp.lt.s32.totalorder %s6746_s2, %s6740_s11 }
0x1b25   : > { %v4690_v1 = vrot.slane %v4675_v14, %v7664_v18  ;;  %v4695_v19 = vrot.slane %v4675_v14, %v7670_v20  ;;  %s7882_s27 = scalar_lea.hbm %s8042_s4, %s5046_s8 }
0x1b26   : > { %p6743_p1 = pneg %p6742_p10  ;;  %p6749_p13 = por %p6748_p12, %p6747_p11 }
0x1b28   : > { %p6750_p7 = pnand %p6749_p13, %p6743_p1 }
0x1b9c   : > { %v4682_v23 = vpop.xlane.xlu0 %4681 }
0x1b9d   : > { %v4683_v31 = vmul.f32 0.0078125, %v4682_v23 }
0x1b9f   : > { %v4684_v15 = vadd.f32 1e-05, %v4683_v31 }
0x1ba1   : > { %6369 = vrsqrt.f32 %v4684_v15 }
0x1bab   : > { %v6370_v16 = vpop.eup %6369 }
0x1bac   : > { %v4686_v17 = vmul.f32 %v6370_v16, %v4679_v52 }
0x1bae   : > { %v4691_v40 = vmul.f32 %v4690_v1, %v4686_v17 }
0x1bb0   : > { %v4696_v21 = vadd.f32 %v4695_v19, %v4691_v40 }
0x1bb2   : > { %4699 = vst [vmem:[%s894_s14] sm:$0xff] %v4696_v21 }
0x1bb3   : > { %6753 = shalt.err (!%p6750_p7)
}
0x1bb4   : > { %s6754_s18 = scalar_lea.hbm %s7882_s27, 128  ;;  %s6758_s16 = scalar_lea.hbm %s8042_s4, 256 }
0x1bb5   : > { %p6755_p9 = scmp.ne.s32.totalorder %s7882_s27, %s6754_s18  ;;  %p6759_p3 = scmp.lt.u32.totalorder %s7882_s27, %s8042_s4 }
0x1bb6   : > { %p6760_p4 = scmp.lt.u32.totalorder %s6758_s16, %s6754_s18  ;;  %p6762_p5 = scmp.lt.u32.totalorder %s6754_s18, %s7882_s27 }
0x1bb7   : > { %p6756_p0 = pnand %p6755_p9, %p8040_p6 }
0x1bb8   : > { %p6761_p8 = por %p6760_p4, %p6759_p3 }
0x1bb9   : > { %p6757_p2 = pneg %p6756_p0 }
0x1bba   : > { %p6763_p10 = por %p6762_p5, %p6761_p8 }
0x1bbc   : > { %p6764_p1 = pnand %p6763_p10, %p6757_p2 }
0x1bbe   : > { %6767 = shalt.err (!%p6764_p1)
}
0x1bbf   : > { %6123 = dma.vmem_to_hbm [thread:$0]  (%p8040_p6), %s7884_s20, 128, %s7882_s27, %s4706_s13  }
0x1bc0 PF: > { %s4747_s0 = sand.u32 1, %s6826_s3   ;;  %p8043_p11 = scmp.ne.s32.totalorder %s8010_s12, 0 }
0x1bc1   : > { %p8044_p12 = scmp.ge.s32.totalorder %s6838_s30, 2  ;;  %s4748_s8 = scalar_lea.sflag [#allocation4], %s4747_s0 }
0x1bc3   : > { %p6165_p13 = pnand %p8044_p12, %p8043_p11 }
0x1bc5   : > { %6817 = dma.done.wait (!%p6165_p13), %s4748_s8, 256  }
0x1bc6   : > { %6819 = vsyncadd (!%p6165_p13), %s4748_s8, 4294967040  ;;  %s4757_s14 = scalar_lea.sflag [#allocation24], %s4747_s0 }
0x1bc7   : > { %6821 = dma.done.wait (!%p6165_p13), %s4757_s14, 128  }
0x1bc8   : > { %6823 = vsyncadd (!%p6165_p13), %s4757_s14, 4294967168  ;;  %p47_p6 = scmp.ge.s32.totalorder %s7257_s5, 4   ;;  %s8045_s3 = smov %s6830_s28 }
0x1bc9   : > { %s8046_s28 = smov %s6834_s29  ;;  %s8047_s29 = smov %s7268_s10 }
0x1bca   : > { %s8048_s30 = smov %s7257_s5  ;;  %49 = sbr.rel (!%p47_p6) target bundleno = 38 (0x26), region = 219 }
0x1bd1   :  { %4762 = vsyncpa [#allocation3], 1 }
0x1bd2   :  { %4764 = vsyncpa [#allocation3 + $0x1], 1 }
0x1bd3   :  { %4765 = vsyncpa [#allocation6], 1 }
0x1bd4   :  { %4767 = vsyncpa [#allocation6 + $0x1], 1 }
0x1bd5   :  { %4768 = vsyncpa [#allocation9], 1 }
0x1bd6   :  { %4769 = vsyncpa [#allocation12], 1 }
0x1bd7   :  { %4770 = vsyncpa [#allocation15], 1 }
0x1bd8   :  { %4771 = vsyncpa [#allocation18], 1 }
0x1bd9   :  { %4772 = vsyncpa [#allocation21], 1 }
0x1bda   :  { %4773 = vsyncpa [#allocation4], 1 }
0x1bdb   :  { %4775 = vsyncpa [#allocation4 + $0x1], 1 }
0x1bdc   :  { %4776 = vsyncpa [#allocation24], 1 }
0x1bdd   :  { %4778 = vsyncpa [#allocation24 + $0x1], 1 }

</bundles_post_ra>
